<compile_context>
chip_gen: v6e
topology: v6e:2x2x1
jax: 0.10.0
libtpu: 0.0.40
codegen_flags: <defaults>
</compile_context>

<pallas_src>
import functools

import jax
import jax.numpy as jnp
from jax.experimental import pallas as pl
from jax.experimental.pallas import tpu as pltpu


# ---------------------------------------------------------------------------
# Fused DnCNN stack kernel
# ---------------------------------------------------------------------------

def _ffdnet_dncnn_kernel(x_ref, w_ref, shift_ref, o_ref, buf_ref, *,
                         num_layers, NB, Hd, Wd, C):
    """Fused 3x3-conv (+folded BN +ReLU) stack for NB batch images.

    x_ref:     (NB, Hd, Wd, C)        bf16 input (noise map + downsampled image,
                                      channel-padded with zeros up to C=128)
    w_ref:     (L, 9, C, C)           bf16 weights, BN scale folded in,
                                      w_ref[l, 3*dy+dx, c, co] = w_l[dy, dx, c, co]
    shift_ref: (L, 1, C)              f32 folded BatchNorm shift (0 where no BN)
    o_ref:     (NB, Hd, Wd, C)        bf16 lane-dense output of the last layer
                                      (only the first cout_last channels are real)
    buf_ref:   (NB, Hd+2, Wd+2, C)    bf16 zero-halo activation scratch (VMEM)
    """
    M = NB * Hd * Wd

    # Zero only the 1-pixel halo strips; the interior is fully overwritten below
    # and after every layer.  Re-zero per step (cheap) so correctness does not
    # depend on which core / grid step touched the persistent scratch last.
    zrow = jnp.zeros((NB, 1, Wd + 2, C), buf_ref.dtype)
    zcol = jnp.zeros((NB, Hd + 2, 1, C), buf_ref.dtype)
    buf_ref[:, 0:1, :, :] = zrow
    buf_ref[:, Hd + 1:Hd + 2, :, :] = zrow
    buf_ref[:, :, 0:1, :] = zcol
    buf_ref[:, :, Wd + 1:Wd + 2, :] = zcol

    # Drop the input tile into the interior (this is the 'SAME' zero padding).
    buf_ref[:, 1:1 + Hd, 1:1 + Wd, :] = x_ref[...]

    def conv3x3(l):
        # 9 lane-aligned K=C MXU dots, f32 accumulation; acc starts from the
        # first dot (no zero materialization).  Per-tap ref slices keep vreg
        # pressure bounded.  The per-image halo keeps batch-folded rows from
        # leaking across images.
        acc = None
        for t in range(9):
            dy, dx = divmod(t, 3)
            patch = buf_ref[:, dy:dy + Hd, dx:dx + Wd, :].reshape(M, C)
            d = jnp.dot(patch, w_ref[l, t], preferred_element_type=jnp.float32)
            acc = d if acc is None else acc + d
        return acc + shift_ref[l]                     # folded BN shift (f32)

    def layer_body(l, carry):
        y = jnp.maximum(conv3x3(l), 0.0)              # f32 epilogue, then one cast
        buf_ref[:, 1:1 + Hd, 1:1 + Wd, :] = (
            y.reshape(NB, Hd, Wd, C).astype(buf_ref.dtype))
        return carry

    # Layers 0..L-2 (conv + folded BN + ReLU) as a rolled loop with dynamic
    # weight indexing; only the 9-tap inner loop is unrolled.
    jax.lax.fori_loop(0, num_layers - 1, layer_body, 0)

    # Peeled last layer: no BN / ReLU; lane-dense 128-wide bf16 store (the real
    # output channels are sliced out in the JAX wrapper).
    o_ref[...] = (conv3x3(num_layers - 1)
                  .reshape(NB, Hd, Wd, C).astype(o_ref.dtype))


def _vmem_budget_bytes():
    """Per-generation scoped-VMEM budget: ~3/4 of physical VMEM
    (~96 MB on 128 MiB v5e/v6e, ~48 MB on 64 MiB v7x)."""
    try:
        cap = int(pltpu.get_tpu_info().vmem_capacity_bytes)
    except Exception:
        cap = 64 << 20          # conservative fallback (v7x-sized)
    return (3 * cap) // 4


def _pick_batch_block(N):
    """Fold as many images as possible into the matmul M dimension while keeping
    ~2 grid steps so both v7x TensorCores get work.
    TODO(synk): on single-TC parts (v5e/v6e) fold the whole batch into one step
    once the core count is queryable."""
    if N <= 1:
        return max(N, 1)
    target = -(-N // 2)                          # ceil(N / 2)
    for nb in range(target, 0, -1):
        if N % nb == 0:
            return nb
    return 1


def fused_dncnn_pallas(x_nhwc, w_packed, shift_packed, *, batch_block=None):
    """Run the whole fused conv stack with one pallas_call.  x_nhwc is bf16,
    channel-padded to the lane-aligned feature width C."""
    N, Hd, Wd, C = x_nhwc.shape
    L = w_packed.shape[0]
    NB = _pick_batch_block(N) if batch_block is None else batch_block
    assert N % NB == 0, (N, NB)

    kernel = functools.partial(_ffdnet_dncnn_kernel, num_layers=L,
                               NB=NB, Hd=Hd, Wd=Wd, C=C)

    # Scoped-VMEM estimate: double-buffered I/O tiles + (double-buffered, see
    # TODO above) constant weights/shift + padded-activation scratch.
    bytes_io = NB * Hd * Wd * C * 2 * 2                           # in + out tiles (bf16)
    bytes_consts = int(w_packed.size) * 2 + int(shift_packed.size) * 4
    bytes_scratch = NB * (Hd + 2) * (Wd + 2) * C * 2
    est = 2 * (bytes_io + bytes_consts) + bytes_scratch
    vmem_limit = int(min(max(2 * est, 32 << 20), _vmem_budget_bytes()))

    return pl.pallas_call(
        kernel,
        out_shape=jax.ShapeDtypeStruct((N, Hd, Wd, C), jnp.bfloat16),
        grid=(N // NB,),
        in_specs=[
            pl.BlockSpec((NB, Hd, Wd, C), lambda n: (n, 0, 0, 0)),
            pl.BlockSpec((L, 9, C, C), lambda n: (0, 0, 0, 0)),   # VMEM-resident
            pl.BlockSpec((L, 1, C), lambda n: (0, 0, 0)),         # VMEM-resident
        ],
        out_specs=pl.BlockSpec((NB, Hd, Wd, C), lambda n: (n, 0, 0, 0)),
        scratch_shapes=[pltpu.VMEM((NB, Hd + 2, Wd + 2, C), jnp.bfloat16)],
        compiler_params=pltpu.CompilerParams(
            dimension_semantics=("parallel",),    # batch blocks independent
            vmem_limit_bytes=vmem_limit),
    )(x_nhwc, w_packed, shift_packed)


# ---------------------------------------------------------------------------
# Parameter construction (synthetic, matching FFDNet.__init__ shapes)
# ---------------------------------------------------------------------------

def init_ffdnet_params(key, is_gray=False):
    """Returns [(w_folded(3,3,cin,cout) f32, shift(cout,) f32)], feat, cout_last.

    Eval-mode BatchNorm is folded: scale goes into the conv weights, shift stays
    as an additive epilogue term.
    TODO(synk): training-mode BN (per-batch statistics) would need a cross-tile
    reduction over (N, H, W); eval-mode semantics used here."""
    if is_gray:
        num_layers, cin0, feat, cout_last = 15, 5, 64, 4
    else:
        num_layers, cin0, feat, cout_last = 12, 15, 96, 12
    chans = [cin0] + [feat] * (num_layers - 1) + [cout_last]
    params = []
    for i in range(num_layers):
        cin, cout = chans[i], chans[i + 1]
        key, wk, gk, bk, mk, vk = jax.random.split(key, 6)
        w = jax.random.normal(wk, (3, 3, cin, cout), jnp.float32)
        w = w * (2.0 / (9.0 * cin)) ** 0.5
        if 0 < i < num_layers - 1:                       # layers with BatchNorm
            gamma = 1.0 + 0.2 * jax.random.normal(gk, (cout,), jnp.float32)
            beta = 0.1 * jax.random.normal(bk, (cout,), jnp.float32)
            mean = 0.1 * jax.random.normal(mk, (cout,), jnp.float32)
            var = 1.0 + 0.2 * jax.random.uniform(vk, (cout,), jnp.float32)
            scale = gamma * jax.lax.rsqrt(var + 1e-5)
            shift = beta - mean * scale
        else:
            scale = jnp.ones((cout,), jnp.float32)
            shift = jnp.zeros((cout,), jnp.float32)
        params.append((w * scale.reshape(1, 1, 1, cout), shift))   # fold BN scale
    return params, feat, cout_last


def pack_ffdnet_params(folded_params, C):
    """Zero-pad channels to the lane-aligned width C, reorder as (L, 9, C, C)
    with tap index t = 3*dy + dx, cast weights to bf16."""
    ws, shifts = [], []
    for w, shift in folded_params:
        cin, cout = w.shape[2], w.shape[3]
        wp = jnp.zeros((3, 3, C, C), jnp.float32).at[:, :, :cin, :cout].set(w)
        ws.append(wp.reshape(9, C, C))
        shifts.append(jnp.zeros((1, C), jnp.float32).at[0, :cout].set(shift))
    w_packed = jnp.stack(ws, axis=0).astype(jnp.bfloat16)    # (L, 9, C, C)
    shift_packed = jnp.stack(shifts, axis=0)                 # (L, 1, C) f32
    return w_packed, shift_packed


# ---------------------------------------------------------------------------
# NCHW glue matching FFDNet_downsample / FFDNet_upsample
# ---------------------------------------------------------------------------

def ffdnet_downsample(x_nchw):
    # down[n, 4c+2a+b, i, j] = x[n, c, 2i+a, 2j+b]  (matches FFDNet_downsample)
    N, C, H, W = x_nchw.shape
    xd = x_nchw.reshape(N, C, H // 2, 2, W // 2, 2)
    return xd.transpose(0, 1, 3, 5, 2, 4).reshape(N, 4 * C, H // 2, W // 2)


def ffdnet_upsample(h_nchw):
    # up[n, co, 2i+a, 2j+b] = h[n, 4co+2a+b, i, j]  (matches FFDNet_upsample)
    N, Cin, Hin, Win = h_nchw.shape
    Co = Cin // 4
    up = h_nchw.reshape(N, Co, 2, 2, Hin, Win)
    return up.transpose(0, 1, 4, 2, 5, 3).reshape(N, Co, 2 * Hin, 2 * Win)


def ffdnet_forward_pallas(w_packed, shift_packed, cout_last, x_nchw, *,
                          batch_block=None):
    C = w_packed.shape[-1]
    N, Cc, H, W = x_nchw.shape
    noise_map = jnp.full((N, Cc, H // 2, W // 2), 30.0 / 255.0, jnp.float32)
    x_cat = jnp.concatenate([noise_map, ffdnet_downsample(x_nchw)], axis=1)
    h = x_cat.transpose(0, 2, 3, 1)                          # NHWC (N, Hd, Wd, 5*Cc)
    cin0 = h.shape[-1]
    # One-time channel pad to the lane-aligned feature width, bf16 for the MXU.
    h = jnp.pad(h, ((0, 0), (0, 0), (0, 0), (0, C - cin0))).astype(jnp.bfloat16)
    out = fused_dncnn_pallas(h, w_packed, shift_packed, batch_block=batch_block)
    # Lane-dense (128-wide) kernel store; slice the real output channels here.
    out = out[..., :cout_last].astype(jnp.float32)
    return ffdnet_upsample(out.transpose(0, 3, 1, 2))        # (N, Cc, H, W)


def ffdnet_forward_reference(folded_params, x_nchw):
    """Pure-JAX reference with the same bf16-operand / f32-accumulate / bf16-store
    numerics as the kernel."""
    N, Cc, H, W = x_nchw.shape
    noise_map = jnp.full((N, Cc, H // 2, W // 2), 30.0 / 255.0, jnp.float32)
    h = jnp.concatenate([noise_map, ffdnet_downsample(x_nchw)], axis=1)
    h = h.transpose(0, 2, 3, 1)                              # NHWC
    L = len(folded_params)
    for i, (w, shift) in enumerate(folded_params):
        xb = h.astype(jnp.bfloat16).astype(jnp.float32)      # round operands like MXU bf16
        wb = w.astype(jnp.bfloat16).astype(jnp.float32)
        y = jax.lax.conv_general_dilated(
            xb, wb, window_strides=(1, 1), padding="SAME",
            dimension_numbers=("NHWC", "HWIO", "NHWC"))
        y = y + shift.reshape(1, 1, 1, -1)
        h = jnp.maximum(y, 0.0) if i < L - 1 else y
    h = h.astype(jnp.bfloat16).astype(jnp.float32)           # kernel stores bf16 output
    return ffdnet_upsample(h.transpose(0, 3, 1, 2))


if __name__ == "__main__":
    key = jax.random.PRNGKey(0)
    pkey, xkey = jax.random.split(key)

    # Color FFDNet (is_gray=False): 12 conv layers, 15 downsampled channels,
    # 96 feature maps (padded to 128 for lane/MXU alignment), 12 output features.
    folded_params, feat, cout_last = init_ffdnet_params(pkey, is_gray=False)
    C_pad = ((feat + 127) // 128) * 128                      # 96 -> 128
    w_packed, shift_packed = pack_ffdnet_params(folded_params, C_pad)

    x = jax.random.normal(xkey, (2, 3, 16, 16), dtype=jnp.float32)   # NCHW

    y = ffdnet_forward_pallas(w_packed, shift_packed, cout_last, x)
    y = jax.block_until_ready(y)

    y_ref = jax.block_until_ready(ffdnet_forward_reference(folded_params, x))

    assert y.shape == x.shape, (y.shape, x.shape)
    max_err = float(jnp.max(jnp.abs(y - y_ref)))
    assert jnp.allclose(y, y_ref, rtol=1e-2, atol=1e-2), max_err

    print("KERNEL_OK")
</pallas_src>

<mosaic_0001>
module attributes {stable_mosaic.version = 11 : i64} {
  func.func @_ffdnet_dncnn_kernel(%arg0: i32, %arg1: memref<1x8x8x128xbf16, #tpu.memory_space<vmem>>, %arg2: memref<12x9x128x128xbf16, #tpu.memory_space<vmem>>, %arg3: memref<12x1x128xf32, #tpu.memory_space<vmem>>, %arg4: memref<1x8x8x128xbf16, #tpu.memory_space<vmem>>, %arg5: memref<1x10x10x128xbf16, #tpu.memory_space<vmem>>) attributes {dimension_semantics = [#tpu.dimension_semantics<parallel>], iteration_bounds = array<i64: 2>, scalar_prefetch = 0 : i64, scratch_operands = 1 : i64, tpu.core_type = #tpu.core_type<tc>, window_params = [{transform_indices = @transform_0, window_bounds = array<i64: 1, 8, 8, 128>}, {pipeline_mode = #tpu.pipeline_mode<synchronous>, transform_indices = @transform_1, window_bounds = array<i64: 12, 9, 128, 128>}, {pipeline_mode = #tpu.pipeline_mode<synchronous>, transform_indices = @transform_2, window_bounds = array<i64: 12, 1, 128>}, {transform_indices = @transform_3, window_bounds = array<i64: 1, 8, 8, 128>}]} {
    %cst = arith.constant 0.000000e+00 : bf16
    %0 = vector.broadcast %cst : bf16 to vector<1x1x10x128xbf16>
    %cst_0 = arith.constant 0.000000e+00 : bf16
    %1 = vector.broadcast %cst_0 : bf16 to vector<1x10x1x128xbf16>
    %c0 = arith.constant 0 : index
    %c0_1 = arith.constant 0 : index
    %c0_2 = arith.constant 0 : index
    %c0_3 = arith.constant 0 : index
    %2 = vector.load %arg5[%c0, %c0_1, %c0_2, %c0_3] : memref<1x10x10x128xbf16, #tpu.memory_space<vmem>>, vector<1x1x10x128xbf16>
    tpu.vector_store %arg5[%c0, %c0_1, %c0_2, %c0_3], %0 {strides = array<i32>} : memref<1x10x10x128xbf16, #tpu.memory_space<vmem>>, vector<1x1x10x128xbf16>,
    %c0_4 = arith.constant 0 : index
    %c9 = arith.constant 9 : index
    %c0_5 = arith.constant 0 : index
    %c0_6 = arith.constant 0 : index
    %3 = vector.load %arg5[%c0_4, %c9, %c0_5, %c0_6] : memref<1x10x10x128xbf16, #tpu.memory_space<vmem>>, vector<1x1x10x128xbf16>
    tpu.vector_store %arg5[%c0_4, %c9, %c0_5, %c0_6], %0 {strides = array<i32>} : memref<1x10x10x128xbf16, #tpu.memory_space<vmem>>, vector<1x1x10x128xbf16>,
    %c0_7 = arith.constant 0 : index
    %c0_8 = arith.constant 0 : index
    %c0_9 = arith.constant 0 : index
    %c0_10 = arith.constant 0 : index
    %4 = vector.load %arg5[%c0_7, %c0_8, %c0_9, %c0_10] : memref<1x10x10x128xbf16, #tpu.memory_space<vmem>>, vector<1x10x1x128xbf16>
    tpu.vector_store %arg5[%c0_7, %c0_8, %c0_9, %c0_10], %1 {strides = array<i32>} : memref<1x10x10x128xbf16, #tpu.memory_space<vmem>>, vector<1x10x1x128xbf16>,
    %c0_11 = arith.constant 0 : index
    %c0_12 = arith.constant 0 : index
    %c9_13 = arith.constant 9 : index
    %c0_14 = arith.constant 0 : index
    %5 = vector.load %arg5[%c0_11, %c0_12, %c9_13, %c0_14] : memref<1x10x10x128xbf16, #tpu.memory_space<vmem>>, vector<1x10x1x128xbf16>
    tpu.vector_store %arg5[%c0_11, %c0_12, %c9_13, %c0_14], %1 {strides = array<i32>} : memref<1x10x10x128xbf16, #tpu.memory_space<vmem>>, vector<1x10x1x128xbf16>,
    %c0_15 = arith.constant 0 : index
    %c0_16 = arith.constant 0 : index
    %c0_17 = arith.constant 0 : index
    %c0_18 = arith.constant 0 : index
    %6 = vector.load %arg1[%c0_15, %c0_16, %c0_17, %c0_18] : memref<1x8x8x128xbf16, #tpu.memory_space<vmem>>, vector<1x8x8x128xbf16>
    %c0_19 = arith.constant 0 : index
    %c1 = arith.constant 1 : index
    %c1_20 = arith.constant 1 : index
    %c0_21 = arith.constant 0 : index
    %7 = vector.load %arg5[%c0_19, %c1, %c1_20, %c0_21] : memref<1x10x10x128xbf16, #tpu.memory_space<vmem>>, vector<1x8x8x128xbf16>
    tpu.vector_store %arg5[%c0_19, %c1, %c1_20, %c0_21], %6 {strides = array<i32>} : memref<1x10x10x128xbf16, #tpu.memory_space<vmem>>, vector<1x8x8x128xbf16>,
    %c0_i32 = arith.constant 0 : i32
    %c11_i32 = arith.constant 11 : i32
    %8 = arith.addi %c0_i32, %c11_i32 : i32
    %c1_i32 = arith.constant 1 : i32
    scf.for %arg6 = %c0_i32 to %8 step %c1_i32  : i32 {
      %c0_103 = arith.constant 0 : index
      %c0_104 = arith.constant 0 : index
      %c0_105 = arith.constant 0 : index
      %c0_106 = arith.constant 0 : index
      %69 = vector.load %arg5[%c0_103, %c0_104, %c0_105, %c0_106] : memref<1x10x10x128xbf16, #tpu.memory_space<vmem>>, vector<1x8x8x128xbf16>
      %70 = vector.shape_cast %69 : vector<1x8x8x128xbf16> to vector<64x128xbf16>
      %71 = arith.index_cast %arg6 : i32 to index
      %c0_107 = arith.constant 0 : index
      %c0_108 = arith.constant 0 : index
      %c0_109 = arith.constant 0 : index
      %72 = vector.load %arg2[%71, %c0_107, %c0_108, %c0_109] : memref<12x9x128x128xbf16, #tpu.memory_space<vmem>>, vector<1x1x128x128xbf16>
      %73 = vector.shape_cast %72 : vector<1x1x128x128xbf16> to vector<128x128xbf16>
      %cst_110 = arith.constant dense<0.000000e+00> : vector<64x128xf32>
      %74 = tpu.matmul %70, %73, %cst_110 {dimension_numbers = #tpu.dot_dimension_numbers<[1], [0], [0], [1], [0, 0, 1, 1], [], []>} : vector<64x128xbf16>, vector<128x128xbf16>, vector<64x128xf32> -> vector<64x128xf32>
      %c0_111 = arith.constant 0 : index
      %c0_112 = arith.constant 0 : index
      %c1_113 = arith.constant 1 : index
      %c0_114 = arith.constant 0 : index
      %75 = vector.load %arg5[%c0_111, %c0_112, %c1_113, %c0_114] : memref<1x10x10x128xbf16, #tpu.memory_space<vmem>>, vector<1x8x8x128xbf16>
      %76 = vector.shape_cast %75 : vector<1x8x8x128xbf16> to vector<64x128xbf16>
      %77 = arith.index_cast %arg6 : i32 to index
      %c1_115 = arith.constant 1 : index
      %c0_116 = arith.constant 0 : index
      %c0_117 = arith.constant 0 : index
      %78 = vector.load %arg2[%77, %c1_115, %c0_116, %c0_117] : memref<12x9x128x128xbf16, #tpu.memory_space<vmem>>, vector<1x1x128x128xbf16>
      %79 = vector.shape_cast %78 : vector<1x1x128x128xbf16> to vector<128x128xbf16>
      %cst_118 = arith.constant dense<0.000000e+00> : vector<64x128xf32>
      %80 = tpu.matmul %76, %79, %cst_118 {dimension_numbers = #tpu.dot_dimension_numbers<[1], [0], [0], [1], [0, 0, 1, 1], [], []>} : vector<64x128xbf16>, vector<128x128xbf16>, vector<64x128xf32> -> vector<64x128xf32>
      %81 = arith.addf %74, %80 : vector<64x128xf32>
      %c0_119 = arith.constant 0 : index
      %c0_120 = arith.constant 0 : index
      %c2_121 = arith.constant 2 : index
      %c0_122 = arith.constant 0 : index
      %82 = vector.load %arg5[%c0_119, %c0_120, %c2_121, %c0_122] : memref<1x10x10x128xbf16, #tpu.memory_space<vmem>>, vector<1x8x8x128xbf16>
      %83 = vector.shape_cast %82 : vector<1x8x8x128xbf16> to vector<64x128xbf16>
      %84 = arith.index_cast %arg6 : i32 to index
      %c2_123 = arith.constant 2 : index
      %c0_124 = arith.constant 0 : index
      %c0_125 = arith.constant 0 : index
      %85 = vector.load %arg2[%84, %c2_123, %c0_124, %c0_125] : memref<12x9x128x128xbf16, #tpu.memory_space<vmem>>, vector<1x1x128x128xbf16>
      %86 = vector.shape_cast %85 : vector<1x1x128x128xbf16> to vector<128x128xbf16>
      %cst_126 = arith.constant dense<0.000000e+00> : vector<64x128xf32>
      %87 = tpu.matmul %83, %86, %cst_126 {dimension_numbers = #tpu.dot_dimension_numbers<[1], [0], [0], [1], [0, 0, 1, 1], [], []>} : vector<64x128xbf16>, vector<128x128xbf16>, vector<64x128xf32> -> vector<64x128xf32>
      %88 = arith.addf %81, %87 : vector<64x128xf32>
      %c0_127 = arith.constant 0 : index
      %c1_128 = arith.constant 1 : index
      %c0_129 = arith.constant 0 : index
      %c0_130 = arith.constant 0 : index
      %89 = vector.load %arg5[%c0_127, %c1_128, %c0_129, %c0_130] : memref<1x10x10x128xbf16, #tpu.memory_space<vmem>>, vector<1x8x8x128xbf16>
      %90 = vector.shape_cast %89 : vector<1x8x8x128xbf16> to vector<64x128xbf16>
      %91 = arith.index_cast %arg6 : i32 to index
      %c3_131 = arith.constant 3 : index
      %c0_132 = arith.constant 0 : index
      %c0_133 = arith.constant 0 : index
      %92 = vector.load %arg2[%91, %c3_131, %c0_132, %c0_133] : memref<12x9x128x128xbf16, #tpu.memory_space<vmem>>, vector<1x1x128x128xbf16>
      %93 = vector.shape_cast %92 : vector<1x1x128x128xbf16> to vector<128x128xbf16>
      %cst_134 = arith.constant dense<0.000000e+00> : vector<64x128xf32>
      %94 = tpu.matmul %90, %93, %cst_134 {dimension_numbers = #tpu.dot_dimension_numbers<[1], [0], [0], [1], [0, 0, 1, 1], [], []>} : vector<64x128xbf16>, vector<128x128xbf16>, vector<64x128xf32> -> vector<64x128xf32>
      %95 = arith.addf %88, %94 : vector<64x128xf32>
      %c0_135 = arith.constant 0 : index
      %c1_136 = arith.constant 1 : index
      %c1_137 = arith.constant 1 : index
      %c0_138 = arith.constant 0 : index
      %96 = vector.load %arg5[%c0_135, %c1_136, %c1_137, %c0_138] : memref<1x10x10x128xbf16, #tpu.memory_space<vmem>>, vector<1x8x8x128xbf16>
      %97 = vector.shape_cast %96 : vector<1x8x8x128xbf16> to vector<64x128xbf16>
      %98 = arith.index_cast %arg6 : i32 to index
      %c4_139 = arith.constant 4 : index
      %c0_140 = arith.constant 0 : index
      %c0_141 = arith.constant 0 : index
      %99 = vector.load %arg2[%98, %c4_139, %c0_140, %c0_141] : memref<12x9x128x128xbf16, #tpu.memory_space<vmem>>, vector<1x1x128x128xbf16>
      %100 = vector.shape_cast %99 : vector<1x1x128x128xbf16> to vector<128x128xbf16>
      %cst_142 = arith.constant dense<0.000000e+00> : vector<64x128xf32>
      %101 = tpu.matmul %97, %100, %cst_142 {dimension_numbers = #tpu.dot_dimension_numbers<[1], [0], [0], [1], [0, 0, 1, 1], [], []>} : vector<64x128xbf16>, vector<128x128xbf16>, vector<64x128xf32> -> vector<64x128xf32>
      %102 = arith.addf %95, %101 : vector<64x128xf32>
      %c0_143 = arith.constant 0 : index
      %c1_144 = arith.constant 1 : index
      %c2_145 = arith.constant 2 : index
      %c0_146 = arith.constant 0 : index
      %103 = vector.load %arg5[%c0_143, %c1_144, %c2_145, %c0_146] : memref<1x10x10x128xbf16, #tpu.memory_space<vmem>>, vector<1x8x8x128xbf16>
      %104 = vector.shape_cast %103 : vector<1x8x8x128xbf16> to vector<64x128xbf16>
      %105 = arith.index_cast %arg6 : i32 to index
      %c5_147 = arith.constant 5 : index
      %c0_148 = arith.constant 0 : index
      %c0_149 = arith.constant 0 : index
      %106 = vector.load %arg2[%105, %c5_147, %c0_148, %c0_149] : memref<12x9x128x128xbf16, #tpu.memory_space<vmem>>, vector<1x1x128x128xbf16>
      %107 = vector.shape_cast %106 : vector<1x1x128x128xbf16> to vector<128x128xbf16>
      %cst_150 = arith.constant dense<0.000000e+00> : vector<64x128xf32>
      %108 = tpu.matmul %104, %107, %cst_150 {dimension_numbers = #tpu.dot_dimension_numbers<[1], [0], [0], [1], [0, 0, 1, 1], [], []>} : vector<64x128xbf16>, vector<128x128xbf16>, vector<64x128xf32> -> vector<64x128xf32>
      %109 = arith.addf %102, %108 : vector<64x128xf32>
      %c0_151 = arith.constant 0 : index
      %c2_152 = arith.constant 2 : index
      %c0_153 = arith.constant 0 : index
      %c0_154 = arith.constant 0 : index
      %110 = vector.load %arg5[%c0_151, %c2_152, %c0_153, %c0_154] : memref<1x10x10x128xbf16, #tpu.memory_space<vmem>>, vector<1x8x8x128xbf16>
      %111 = vector.shape_cast %110 : vector<1x8x8x128xbf16> to vector<64x128xbf16>
      %112 = arith.index_cast %arg6 : i32 to index
      %c6_155 = arith.constant 6 : index
      %c0_156 = arith.constant 0 : index
      %c0_157 = arith.constant 0 : index
      %113 = vector.load %arg2[%112, %c6_155, %c0_156, %c0_157] : memref<12x9x128x128xbf16, #tpu.memory_space<vmem>>, vector<1x1x128x128xbf16>
      %114 = vector.shape_cast %113 : vector<1x1x128x128xbf16> to vector<128x128xbf16>
      %cst_158 = arith.constant dense<0.000000e+00> : vector<64x128xf32>
      %115 = tpu.matmul %111, %114, %cst_158 {dimension_numbers = #tpu.dot_dimension_numbers<[1], [0], [0], [1], [0, 0, 1, 1], [], []>} : vector<64x128xbf16>, vector<128x128xbf16>, vector<64x128xf32> -> vector<64x128xf32>
      %116 = arith.addf %109, %115 : vector<64x128xf32>
      %c0_159 = arith.constant 0 : index
      %c2_160 = arith.constant 2 : index
      %c1_161 = arith.constant 1 : index
      %c0_162 = arith.constant 0 : index
      %117 = vector.load %arg5[%c0_159, %c2_160, %c1_161, %c0_162] : memref<1x10x10x128xbf16, #tpu.memory_space<vmem>>, vector<1x8x8x128xbf16>
      %118 = vector.shape_cast %117 : vector<1x8x8x128xbf16> to vector<64x128xbf16>
      %119 = arith.index_cast %arg6 : i32 to index
      %c7_163 = arith.constant 7 : index
      %c0_164 = arith.constant 0 : index
      %c0_165 = arith.constant 0 : index
      %120 = vector.load %arg2[%119, %c7_163, %c0_164, %c0_165] : memref<12x9x128x128xbf16, #tpu.memory_space<vmem>>, vector<1x1x128x128xbf16>
      %121 = vector.shape_cast %120 : vector<1x1x128x128xbf16> to vector<128x128xbf16>
      %cst_166 = arith.constant dense<0.000000e+00> : vector<64x128xf32>
      %122 = tpu.matmul %118, %121, %cst_166 {dimension_numbers = #tpu.dot_dimension_numbers<[1], [0], [0], [1], [0, 0, 1, 1], [], []>} : vector<64x128xbf16>, vector<128x128xbf16>, vector<64x128xf32> -> vector<64x128xf32>
      %123 = arith.addf %116, %122 : vector<64x128xf32>
      %c0_167 = arith.constant 0 : index
      %c2_168 = arith.constant 2 : index
      %c2_169 = arith.constant 2 : index
      %c0_170 = arith.constant 0 : index
      %124 = vector.load %arg5[%c0_167, %c2_168, %c2_169, %c0_170] : memref<1x10x10x128xbf16, #tpu.memory_space<vmem>>, vector<1x8x8x128xbf16>
      %125 = vector.shape_cast %124 : vector<1x8x8x128xbf16> to vector<64x128xbf16>
      %126 = arith.index_cast %arg6 : i32 to index
      %c8_171 = arith.constant 8 : index
      %c0_172 = arith.constant 0 : index
      %c0_173 = arith.constant 0 : index
      %127 = vector.load %arg2[%126, %c8_171, %c0_172, %c0_173] : memref<12x9x128x128xbf16, #tpu.memory_space<vmem>>, vector<1x1x128x128xbf16>
      %128 = vector.shape_cast %127 : vector<1x1x128x128xbf16> to vector<128x128xbf16>
      %cst_174 = arith.constant dense<0.000000e+00> : vector<64x128xf32>
      %129 = tpu.matmul %125, %128, %cst_174 {dimension_numbers = #tpu.dot_dimension_numbers<[1], [0], [0], [1], [0, 0, 1, 1], [], []>} : vector<64x128xbf16>, vector<128x128xbf16>, vector<64x128xf32> -> vector<64x128xf32>
      %130 = arith.addf %123, %129 : vector<64x128xf32>
      %131 = arith.index_cast %arg6 : i32 to index
      %c0_175 = arith.constant 0 : index
      %c0_176 = arith.constant 0 : index
      %132 = vector.load %arg3[%131, %c0_175, %c0_176] : memref<12x1x128xf32, #tpu.memory_space<vmem>>, vector<1x1x128xf32>
      %133 = vector.shape_cast %132 : vector<1x1x128xf32> to vector<1x128xf32>
      %134 = vector.broadcast %133 : vector<1x128xf32> to vector<64x128xf32>
      %135 = arith.addf %130, %134 : vector<64x128xf32>
      %cst_177 = arith.constant 0.000000e+00 : f32
      %136 = vector.broadcast %cst_177 : f32 to vector<64x128xf32>
      %137 = arith.maximumf %135, %136 : vector<64x128xf32>
      %138 = vector.shape_cast %137 : vector<64x128xf32> to vector<1x8x8x128xf32>
      %139 = arith.truncf %138 : vector<1x8x8x128xf32> to vector<1x8x8x128xbf16>
      %c0_178 = arith.constant 0 : index
      %c1_179 = arith.constant 1 : index
      %c1_180 = arith.constant 1 : index
      %c0_181 = arith.constant 0 : index
      %140 = vector.load %arg5[%c0_178, %c1_179, %c1_180, %c0_181] : memref<1x10x10x128xbf16, #tpu.memory_space<vmem>>, vector<1x8x8x128xbf16>
      tpu.vector_store %arg5[%c0_178, %c1_179, %c1_180, %c0_181], %139 {strides = array<i32>} : memref<1x10x10x128xbf16, #tpu.memory_space<vmem>>, vector<1x8x8x128xbf16>,
    }
    %c11_i32_22 = arith.constant 11 : i32
    %c0_23 = arith.constant 0 : index
    %c0_24 = arith.constant 0 : index
    %c0_25 = arith.constant 0 : index
    %c0_26 = arith.constant 0 : index
    %9 = vector.load %arg5[%c0_23, %c0_24, %c0_25, %c0_26] : memref<1x10x10x128xbf16, #tpu.memory_space<vmem>>, vector<1x8x8x128xbf16>
    %10 = vector.shape_cast %9 : vector<1x8x8x128xbf16> to vector<64x128xbf16>
    %c11 = arith.constant 11 : index
    %c0_27 = arith.constant 0 : index
    %c0_28 = arith.constant 0 : index
    %c0_29 = arith.constant 0 : index
    %11 = vector.load %arg2[%c11, %c0_27, %c0_28, %c0_29] : memref<12x9x128x128xbf16, #tpu.memory_space<vmem>>, vector<1x1x128x128xbf16>
    %12 = vector.shape_cast %11 : vector<1x1x128x128xbf16> to vector<128x128xbf16>
    %cst_30 = arith.constant dense<0.000000e+00> : vector<64x128xf32>
    %13 = tpu.matmul %10, %12, %cst_30 {dimension_numbers = #tpu.dot_dimension_numbers<[1], [0], [0], [1], [0, 0, 1, 1], [], []>} : vector<64x128xbf16>, vector<128x128xbf16>, vector<64x128xf32> -> vector<64x128xf32>
    %c0_31 = arith.constant 0 : index
    %c0_32 = arith.constant 0 : index
    %c1_33 = arith.constant 1 : index
    %c0_34 = arith.constant 0 : index
    %14 = vector.load %arg5[%c0_31, %c0_32, %c1_33, %c0_34] : memref<1x10x10x128xbf16, #tpu.memory_space<vmem>>, vector<1x8x8x128xbf16>
    %15 = vector.shape_cast %14 : vector<1x8x8x128xbf16> to vector<64x128xbf16>
    %c11_35 = arith.constant 11 : index
    %c1_36 = arith.constant 1 : index
    %c0_37 = arith.constant 0 : index
    %c0_38 = arith.constant 0 : index
    %16 = vector.load %arg2[%c11_35, %c1_36, %c0_37, %c0_38] : memref<12x9x128x128xbf16, #tpu.memory_space<vmem>>, vector<1x1x128x128xbf16>
    %17 = vector.shape_cast %16 : vector<1x1x128x128xbf16> to vector<128x128xbf16>
    %cst_39 = arith.constant dense<0.000000e+00> : vector<64x128xf32>
    %18 = tpu.matmul %15, %17, %cst_39 {dimension_numbers = #tpu.dot_dimension_numbers<[1], [0], [0], [1], [0, 0, 1, 1], [], []>} : vector<64x128xbf16>, vector<128x128xbf16>, vector<64x128xf32> -> vector<64x128xf32>
    %19 = arith.addf %13, %18 : vector<64x128xf32>
    %c0_40 = arith.constant 0 : index
    %c0_41 = arith.constant 0 : index
    %c2 = arith.constant 2 : index
    %c0_42 = arith.constant 0 : index
    %20 = vector.load %arg5[%c0_40, %c0_41, %c2, %c0_42] : memref<1x10x10x128xbf16, #tpu.memory_space<vmem>>, vector<1x8x8x128xbf16>
    %21 = vector.shape_cast %20 : vector<1x8x8x128xbf16> to vector<64x128xbf16>
    %c11_43 = arith.constant 11 : index
    %c2_44 = arith.constant 2 : index
    %c0_45 = arith.constant 0 : index
    %c0_46 = arith.constant 0 : index
    %22 = vector.load %arg2[%c11_43, %c2_44, %c0_45, %c0_46] : memref<12x9x128x128xbf16, #tpu.memory_space<vmem>>, vector<1x1x128x128xbf16>
    %23 = vector.shape_cast %22 : vector<1x1x128x128xbf16> to vector<128x128xbf16>
    %cst_47 = arith.constant dense<0.000000e+00> : vector<64x128xf32>
    %24 = tpu.matmul %21, %23, %cst_47 {dimension_numbers = #tpu.dot_dimension_numbers<[1], [0], [0], [1], [0, 0, 1, 1], [], []>} : vector<64x128xbf16>, vector<128x128xbf16>, vector<64x128xf32> -> vector<64x128xf32>
    %25 = arith.addf %19, %24 : vector<64x128xf32>
    %c0_48 = arith.constant 0 : index
    %c1_49 = arith.constant 1 : index
    %c0_50 = arith.constant 0 : index
    %c0_51 = arith.constant 0 : index
    %26 = vector.load %arg5[%c0_48, %c1_49, %c0_50, %c0_51] : memref<1x10x10x128xbf16, #tpu.memory_space<vmem>>, vector<1x8x8x128xbf16>
    %27 = vector.shape_cast %26 : vector<1x8x8x128xbf16> to vector<64x128xbf16>
    %c11_52 = arith.constant 11 : index
    %c3 = arith.constant 3 : index
    %c0_53 = arith.constant 0 : index
    %c0_54 = arith.constant 0 : index
    %28 = vector.load %arg2[%c11_52, %c3, %c0_53, %c0_54] : memref<12x9x128x128xbf16, #tpu.memory_space<vmem>>, vector<1x1x128x128xbf16>
    %29 = vector.shape_cast %28 : vector<1x1x128x128xbf16> to vector<128x128xbf16>
    %cst_55 = arith.constant dense<0.000000e+00> : vector<64x128xf32>
    %30 = tpu.matmul %27, %29, %cst_55 {dimension_numbers = #tpu.dot_dimension_numbers<[1], [0], [0], [1], [0, 0, 1, 1], [], []>} : vector<64x128xbf16>, vector<128x128xbf16>, vector<64x128xf32> -> vector<64x128xf32>
    %31 = arith.addf %25, %30 : vector<64x128xf32>
    %c0_56 = arith.constant 0 : index
    %c1_57 = arith.constant 1 : index
    %c1_58 = arith.constant 1 : index
    %c0_59 = arith.constant 0 : index
    %32 = vector.load %arg5[%c0_56, %c1_57, %c1_58, %c0_59] : memref<1x10x10x128xbf16, #tpu.memory_space<vmem>>, vector<1x8x8x128xbf16>
    %33 = vector.shape_cast %32 : vector<1x8x8x128xbf16> to vector<64x128xbf16>
    %c11_60 = arith.constant 11 : index
    %c4 = arith.constant 4 : index
    %c0_61 = arith.constant 0 : index
    %c0_62 = arith.constant 0 : index
    %34 = vector.load %arg2[%c11_60, %c4, %c0_61, %c0_62] : memref<12x9x128x128xbf16, #tpu.memory_space<vmem>>, vector<1x1x128x128xbf16>
    %35 = vector.shape_cast %34 : vector<1x1x128x128xbf16> to vector<128x128xbf16>
    %cst_63 = arith.constant dense<0.000000e+00> : vector<64x128xf32>
    %36 = tpu.matmul %33, %35, %cst_63 {dimension_numbers = #tpu.dot_dimension_numbers<[1], [0], [0], [1], [0, 0, 1, 1], [], []>} : vector<64x128xbf16>, vector<128x128xbf16>, vector<64x128xf32> -> vector<64x128xf32>
    %37 = arith.addf %31, %36 : vector<64x128xf32>
    %c0_64 = arith.constant 0 : index
    %c1_65 = arith.constant 1 : index
    %c2_66 = arith.constant 2 : index
    %c0_67 = arith.constant 0 : index
    %38 = vector.load %arg5[%c0_64, %c1_65, %c2_66, %c0_67] : memref<1x10x10x128xbf16, #tpu.memory_space<vmem>>, vector<1x8x8x128xbf16>
    %39 = vector.shape_cast %38 : vector<1x8x8x128xbf16> to vector<64x128xbf16>
    %c11_68 = arith.constant 11 : index
    %c5 = arith.constant 5 : index
    %c0_69 = arith.constant 0 : index
    %c0_70 = arith.constant 0 : index
    %40 = vector.load %arg2[%c11_68, %c5, %c0_69, %c0_70] : memref<12x9x128x128xbf16, #tpu.memory_space<vmem>>, vector<1x1x128x128xbf16>
    %41 = vector.shape_cast %40 : vector<1x1x128x128xbf16> to vector<128x128xbf16>
    %cst_71 = arith.constant dense<0.000000e+00> : vector<64x128xf32>
    %42 = tpu.matmul %39, %41, %cst_71 {dimension_numbers = #tpu.dot_dimension_numbers<[1], [0], [0], [1], [0, 0, 1, 1], [], []>} : vector<64x128xbf16>, vector<128x128xbf16>, vector<64x128xf32> -> vector<64x128xf32>
    %43 = arith.addf %37, %42 : vector<64x128xf32>
    %c0_72 = arith.constant 0 : index
    %c2_73 = arith.constant 2 : index
    %c0_74 = arith.constant 0 : index
    %c0_75 = arith.constant 0 : index
    %44 = vector.load %arg5[%c0_72, %c2_73, %c0_74, %c0_75] : memref<1x10x10x128xbf16, #tpu.memory_space<vmem>>, vector<1x8x8x128xbf16>
    %45 = vector.shape_cast %44 : vector<1x8x8x128xbf16> to vector<64x128xbf16>
    %c11_76 = arith.constant 11 : index
    %c6 = arith.constant 6 : index
    %c0_77 = arith.constant 0 : index
    %c0_78 = arith.constant 0 : index
    %46 = vector.load %arg2[%c11_76, %c6, %c0_77, %c0_78] : memref<12x9x128x128xbf16, #tpu.memory_space<vmem>>, vector<1x1x128x128xbf16>
    %47 = vector.shape_cast %46 : vector<1x1x128x128xbf16> to vector<128x128xbf16>
    %cst_79 = arith.constant dense<0.000000e+00> : vector<64x128xf32>
    %48 = tpu.matmul %45, %47, %cst_79 {dimension_numbers = #tpu.dot_dimension_numbers<[1], [0], [0], [1], [0, 0, 1, 1], [], []>} : vector<64x128xbf16>, vector<128x128xbf16>, vector<64x128xf32> -> vector<64x128xf32>
    %49 = arith.addf %43, %48 : vector<64x128xf32>
    %c0_80 = arith.constant 0 : index
    %c2_81 = arith.constant 2 : index
    %c1_82 = arith.constant 1 : index
    %c0_83 = arith.constant 0 : index
    %50 = vector.load %arg5[%c0_80, %c2_81, %c1_82, %c0_83] : memref<1x10x10x128xbf16, #tpu.memory_space<vmem>>, vector<1x8x8x128xbf16>
    %51 = vector.shape_cast %50 : vector<1x8x8x128xbf16> to vector<64x128xbf16>
    %c11_84 = arith.constant 11 : index
    %c7 = arith.constant 7 : index
    %c0_85 = arith.constant 0 : index
    %c0_86 = arith.constant 0 : index
    %52 = vector.load %arg2[%c11_84, %c7, %c0_85, %c0_86] : memref<12x9x128x128xbf16, #tpu.memory_space<vmem>>, vector<1x1x128x128xbf16>
    %53 = vector.shape_cast %52 : vector<1x1x128x128xbf16> to vector<128x128xbf16>
    %cst_87 = arith.constant dense<0.000000e+00> : vector<64x128xf32>
    %54 = tpu.matmul %51, %53, %cst_87 {dimension_numbers = #tpu.dot_dimension_numbers<[1], [0], [0], [1], [0, 0, 1, 1], [], []>} : vector<64x128xbf16>, vector<128x128xbf16>, vector<64x128xf32> -> vector<64x128xf32>
    %55 = arith.addf %49, %54 : vector<64x128xf32>
    %c0_88 = arith.constant 0 : index
    %c2_89 = arith.constant 2 : index
    %c2_90 = arith.constant 2 : index
    %c0_91 = arith.constant 0 : index
    %56 = vector.load %arg5[%c0_88, %c2_89, %c2_90, %c0_91] : memref<1x10x10x128xbf16, #tpu.memory_space<vmem>>, vector<1x8x8x128xbf16>
    %57 = vector.shape_cast %56 : vector<1x8x8x128xbf16> to vector<64x128xbf16>
    %c11_92 = arith.constant 11 : index
    %c8 = arith.constant 8 : index
    %c0_93 = arith.constant 0 : index
    %c0_94 = arith.constant 0 : index
    %58 = vector.load %arg2[%c11_92, %c8, %c0_93, %c0_94] : memref<12x9x128x128xbf16, #tpu.memory_space<vmem>>, vector<1x1x128x128xbf16>
    %59 = vector.shape_cast %58 : vector<1x1x128x128xbf16> to vector<128x128xbf16>
    %cst_95 = arith.constant dense<0.000000e+00> : vector<64x128xf32>
    %60 = tpu.matmul %57, %59, %cst_95 {dimension_numbers = #tpu.dot_dimension_numbers<[1], [0], [0], [1], [0, 0, 1, 1], [], []>} : vector<64x128xbf16>, vector<128x128xbf16>, vector<64x128xf32> -> vector<64x128xf32>
    %61 = arith.addf %55, %60 : vector<64x128xf32>
    %c11_96 = arith.constant 11 : index
    %c0_97 = arith.constant 0 : index
    %c0_98 = arith.constant 0 : index
    %62 = vector.load %arg3[%c11_96, %c0_97, %c0_98] : memref<12x1x128xf32, #tpu.memory_space<vmem>>, vector<1x1x128xf32>
    %63 = vector.shape_cast %62 : vector<1x1x128xf32> to vector<1x128xf32>
    %64 = vector.broadcast %63 : vector<1x128xf32> to vector<64x128xf32>
    %65 = arith.addf %61, %64 : vector<64x128xf32>
    %66 = vector.shape_cast %65 : vector<64x128xf32> to vector<1x8x8x128xf32>
    %67 = arith.truncf %66 : vector<1x8x8x128xf32> to vector<1x8x8x128xbf16>
    %c0_99 = arith.constant 0 : index
    %c0_100 = arith.constant 0 : index
    %c0_101 = arith.constant 0 : index
    %c0_102 = arith.constant 0 : index
    %68 = vector.load %arg4[%c0_99, %c0_100, %c0_101, %c0_102] : memref<1x8x8x128xbf16, #tpu.memory_space<vmem>>, vector<1x8x8x128xbf16>
    tpu.vector_store %arg4[%c0_99, %c0_100, %c0_101, %c0_102], %67 {strides = array<i32>} : memref<1x8x8x128xbf16, #tpu.memory_space<vmem>>, vector<1x8x8x128xbf16>,
    return
  }
  func.func @transform_0(%arg0: i32) -> (i32, i32, i32, i32) {
    %c0_i32 = arith.constant 0 : i32
    %c0_i32_0 = arith.constant 0 : i32
    %c0_i32_1 = arith.constant 0 : i32
    %c0_i32_2 = arith.constant 0 : i32
    return %arg0, %c0_i32, %c0_i32_0, %c0_i32_1 : i32, i32, i32, i32
  }
  func.func @transform_1(%arg0: i32) -> (i32, i32, i32, i32) {
    %c0_i32 = arith.constant 0 : i32
    %c0_i32_0 = arith.constant 0 : i32
    %c0_i32_1 = arith.constant 0 : i32
    %c0_i32_2 = arith.constant 0 : i32
    %c0_i32_3 = arith.constant 0 : i32
    return %c0_i32, %c0_i32_0, %c0_i32_1, %c0_i32_2 : i32, i32, i32, i32
  }
  func.func @transform_2(%arg0: i32) -> (i32, i32, i32) {
    %c0_i32 = arith.constant 0 : i32
    %c0_i32_0 = arith.constant 0 : i32
    %c0_i32_1 = arith.constant 0 : i32
    %c0_i32_2 = arith.constant 0 : i32
    return %c0_i32, %c0_i32_0, %c0_i32_1 : i32, i32, i32
  }
  func.func @transform_3(%arg0: i32) -> (i32, i32, i32, i32) {
    %c0_i32 = arith.constant 0 : i32
    %c0_i32_0 = arith.constant 0 : i32
    %c0_i32_1 = arith.constant 0 : i32
    %c0_i32_2 = arith.constant 0 : i32
    return %arg0, %c0_i32, %c0_i32_0, %c0_i32_1 : i32, i32, i32, i32
  }
}

</mosaic_0001>

<bundles_post_ra>
// kernel: tpu_custom_call.1
= control target key start
LH: loop header
LB: loop body
LE: loop exit
PB: predicated region body
PF: predicated region fallthrough
CT: control target
= control target key end

     0   :  { %8 = vsyncpa [#allocation4], 0  ;;  %s7217_s0 = inlined_call_operand.hbm [shape: bf16[2,8,8,128], index: 0, kind: input, shape index: {}]   ;;  %s7218_s1 = inlined_call_operand.hbm [shape: bf16[12,9,128,128], index: 1, kind: input, shape index: {}]   ;;  %s7219_s2 = inlined_call_operand.hbm [shape: f32[12,1,128], index: 2, kind: input, shape index: {}]   ;;  %s7220_s3 = inlined_call_operand.hbm [shape: bf16[2,8,8,128], index: 3, kind: output, shape index: {}]  }
   0x1   :  { %10 = vsyncpa [#allocation4 + $0x1], 0 }
   0x2   :  { %11 = vsyncpa [#allocation7], 0 }
   0x3   :  { %12 = vsyncpa [#allocation5], 0 }
   0x4   :  { %14 = vsyncpa [#allocation5 + $0x1], 0  ;;  %s6334_s12 = smov 0   ;;  %s6336_s13 = smov 0  }
   0x5   :  { %s6338_s14 = smov 0   ;;  %s6340_s15 = smov 0  }
   0x6 LB: > { %s6355_s16 = sadd.s32 4294967295, %s6297_s15   ;;  %s4751_s17 = sadd.s32 4294967294, %s6297_s15   ;;  %s6297_s15 = sphi %s6340_s15, %s7283_s15   ;;  %s6293_s14 = sphi %s6338_s14, %s7282_s14   ;;  %s6289_s13 = sphi %s6336_s13, %s7281_s13   ;;  %s6285_s12 = sphi %s6334_s12, %s7280_s12  }
   0x7   : > { %p40_p0 = scmp.ne.s32.totalorder %s6289_s13, %s6285_s12  ;;  %p7221_p1 = scmp.eq.s32.totalorder %s6355_s16, 0 }
   0x8   : > { %p106_p2 = scmp.eq.s32.totalorder %s6355_s16, 1  ;;  %p112_p3 = scmp.eq.s32.totalorder %s4751_s17, 1 }
   0x9   : > { %p6364_p4 = por %p7221_p1, %p40_p0  ;;  %p4752_p5 = scmp.ge.s32.totalorder %s6297_s15, 1 }
   0xa   : > { %p6369_p6 = por %p112_p3, %p40_p0  ;;  %p119_p7 = scmp.lt.s32.totalorder %s6297_s15, 3 }
   0xb   : > { %s7233_s18 = scalar_select %p6364_p4, 1, 0 }
   0xc   : > { %s7234_s19 = scalar_select %p6369_p6, 1, 0 }
   0xd   : > { %p6374_p8 = pnand %p4752_p5, %p119_p7  ;;  %s6303_s21 = smov [#allocation6]  }
   0xe   : > { %s131_s22 = sshll.u32 %s6303_s21, 4  ;;  %s6304_s24 = smov [#allocation8]   ;;  %s132_s22 = int_to_ptr.vmem [resolvable:$true] %s131_s22 }
   0xf   : > { %s7235_s20 = scalar_select %p6374_p8, 1, 0 }
  0x10   : > { %p5906_p9 = pneg %p6374_p8  ;;  %s144_s25 = sshll.u32 %s6304_s24, 4  ;;  %s145_s25 = int_to_ptr.vmem [resolvable:$true] %s144_s25 }
  0x11   : > { %s6156_s26 = scalar_lea.vmem %s132_s22, 110592  ;;  %p6164_p5 = scmp.lt.s32.totalorder %s132_s22, %s132_s22 }
  0x12   : > { %p6383_p11 = pnand %p5906_p9, %p7221_p1  ;;  %p6157_p13 = scmp.ne.s32.totalorder %s132_s22, %s6156_s26 }
  0x13   : > { %p6165_p7 = scmp.lt.s32.totalorder %s6156_s26, %s6156_s26 }
  0x14   : > { %p6147_p12 = pneg %p6383_p11 }
  0x15   : > { %p6166_p10 = por %p6165_p7, %p6164_p5 }
  0x16   : > { %p6159_p0 = pnand %p6157_p13, %p6147_p12 }
  0x18   : > { %p6160_p3 = pneg %p6159_p0 }
  0x1a   : > { %p6167_p9 = pnand %p6166_p10, %p6160_p3 }
  0x1c   : > { %6170 = shalt.err (!%p6167_p9)
}
  0x1d   : > { %s6305_s27 = smov 64   ;;  %s6306_s28 = smov 4  }
  0x1e   : > { %5909 = dma.hbm_to_vmem [thread:$0]  (!%p6383_p11), %s7218_s1, 110592, %s132_s22, [#allocation7], %s6305_s27, %s6305_s27, %s6306_s28  }
  0x1f   : > { %s6182_s4 = scalar_lea.vmem %s145_s25, 192  ;;  %p6190_p10 = scmp.lt.s32.totalorder %s145_s25, %s145_s25 }
  0x20   : > { %p6183_p13 = scmp.ne.s32.totalorder %s145_s25, %s6182_s4  ;;  %p6191_p3 = scmp.lt.s32.totalorder %s6182_s4, %s6182_s4 }
  0x22   : > { %p6185_p0 = pnand %p6183_p13, %p6147_p12  ;;  %p6192_p7 = por %p6191_p3, %p6190_p10 }
  0x24   : > { %p6186_p5 = pneg %p6185_p0 }
  0x26   : > { %p6193_p9 = pnand %p6192_p7, %p6186_p5 }
  0x28   : > { %6196 = shalt.err (!%p6193_p9)
}
  0x29   : > { %s6307_s5 = smov 16   ;;  %s6308_s6 = smov 1  }
  0x2a   : > { %5912 = dma.hbm_to_vmem [thread:$0]  (!%p6383_p11), %s7219_s2, 192, %s145_s25, [#allocation7], %s6307_s5, %s6307_s5, %s6308_s6  }
  0x2b   : > { %s6409_s9 = sadd.s32 1, %s6297_s15   ;;  %s27_s11 = sadd.s32 1, %s6293_s14 }
  0x2c   : > { %s24_s10 = ssub.s32 %s6297_s15, %s6409_s9  ;;  %p34_p13 = scmp.ne.s32.totalorder %s6293_s14, %s6289_s13 }
  0x2d   : > { %p25_p12 = scmp.eq.s32.totalorder %s24_s10, 0  ;;  %p35_p0 = scmp.eq.s32.totalorder %s6297_s15, 0 }
  0x2e   : > { %p6422_p10 = por %p106_p2, %p34_p13  ;;  %p5923_p3 = scmp.lt.s32.totalorder %s6297_s15, 2 }
  0x2f   : > { %s6418_s17 = scalar_select %p25_p12, %s6293_s14, %s27_s11  }
  0x30   : > { %p36_p5 = por %p35_p0, %p34_p13  ;;  %s158_s22 = sand.u32 1, %s6293_s14  }
  0x31   : > { %s7237_s21 = scalar_select %p6422_p10, 1, 0 }
  0x32   : > { %s4756_s23 = sshll.u32 %s158_s22, 5  ;;  %s5180_s24 = sshll.u32 %s6297_s15, 9 }
  0x33   : > { %s6432_s29 = scalar_lea.hbm %s7217_s0, %s5180_s24  ;;  %s162_s30 = scalar_lea.vmem [#allocation3], %s4756_s23 }
  0x34   : > { %s169_s4 = sshll.u32 %s162_s30, 4  ;;  %p6436_p2 = pnand %p5923_p3, %p36_p5  ;;  %s6434_s4 = int_to_ptr.vmem [resolvable:$true] %s169_s4 }
  0x35   : > { %s6440_s6 = scalar_lea.sflag [#allocation4], %s158_s22  ;;  %s6197_s7 = scalar_lea.hbm %s6432_s29, 512 }
  0x36   : > { %p6198_p11 = scmp.ne.s32.totalorder %s6432_s29, %s6197_s7  ;;  %p6199_p7 = pneg %p6436_p2 }
  0x37   : > { %s6202_s11 = scalar_lea.hbm %s7217_s0, 1024  ;;  %p6203_p13 = scmp.lt.s32.totalorder %s6432_s29, %s7217_s0 }
  0x38   : > { %p6200_p9 = pnand %p6199_p7, %p6198_p11  ;;  %p6204_p0 = scmp.lt.s32.totalorder %s6202_s11, %s6197_s7 }
  0x3a   : > { %p6201_p12 = pneg %p6200_p9  ;;  %p6205_p5 = por %p6204_p0, %p6203_p13 }
  0x3c   : > { %p6206_p3 = pnand %p6205_p5, %p6201_p12 }
  0x3e   : > { %6209 = shalt.err (!%p6206_p3)
}
  0x3f   : > { %s6210_s22 = scalar_lea.vmem %s6434_s4, 512  ;;  %s6309_s25 = smov [#allocation3]  }
  0x40   : > { %p6211_p1 = scmp.ne.s32.totalorder %s6434_s4, %s6210_s22  ;;  %s6215_s26 = sshll.u32 %s6309_s25, 4  ;;  %s6216_s26 = int_to_ptr.vmem [resolvable:$false] %s6215_s26 }
  0x41   : > { %s6217_s30 = scalar_lea.vmem %s6216_s26, 1024  ;;  %p6218_p9 = scmp.lt.s32.totalorder %s6434_s4, %s6216_s26 }
  0x42   : > { %p6213_p6 = pnand %p6211_p1, %p6199_p7  ;;  %p6219_p10 = scmp.lt.s32.totalorder %s6217_s30, %s6210_s22 }
  0x44   : > { %p6214_p11 = pneg %p6213_p6  ;;  %p6220_p4 = por %p6219_p10, %p6218_p9 }
  0x46   : > { %p6221_p8 = pnand %p6220_p4, %p6214_p11 }
  0x48   : > { %6224 = shalt.err (!%p6221_p8)
}
  0x49   : > { %5916 = dma.hbm_to_vmem [thread:$0]  (!%p6436_p2), %s6432_s29, 512, %s6434_s4, %s6440_s6, %s6305_s27, %s6305_s27, %s6306_s28  }
  0x4a   : > { %p7239_p1 = scmp.ne.s32.totalorder %s7235_s20, 0 }
  0x4c   : > { %181 = sbr.rel (%p7239_p1) target bundleno = 887 (0x377), region = 32 }
  0x51   : > { %s6467_s7 = sand.u32 1, %s6289_s13   ;;  %p7240_p4 = scmp.ne.s32.totalorder %s7233_s18, 0 }
  0x52   : > { %s4760_s8 = sshll.u32 %s6467_s7, 5  ;;  %s184_s10 = scalar_lea.sflag [#allocation4], %s6467_s7 }
  0x53   : > { %s6473_s5 = scalar_lea.vmem [#allocation3], %s4760_s8 }
  0x54   : > { %6272 = dma.done.wait (%p7240_p4), %s184_s10, 512  }
  0x55   : > { %6274 = vsyncadd (%p7240_p4), %s184_s10, 4294966784  ;;  %p7241_p6 = scmp.eq.s32.totalorder %s6355_s16, 0 }
  0x57   : > { %6276 = dma.done.wait (%p7241_p6), [#allocation7], 110784   ;;  %p7242_p8 = pmov %p7241_p6 }
  0x58   : > { %v6310_v0 = vmov 0   ;;  %vm224_vm0 = vcmask 1040384   ;;  %vm225_vm1 = vsmask.f32 256  ;;  %v7243_v1 = vmov 0  ;;  %s6581_s18 = scalar_lea.vmem [#allocation9], %s4760_s8 }
  0x59   : > { %6278 = vsyncadd (%p7242_p8), [#allocation7], 4294856512  ;;  %219 = vst [vmem:[#allocation2] sm:$0xf] %v6310_v0  ;;  %vm257_vm3 = vsmask.f32 7938 }
  0x5a   : > { %220 = vst [vmem:[#allocation2 + $0x4] sm:$0x1] %v6310_v0  ;;  %222 = vst [vmem:[#allocation2 + $0x48] sm:$0xf] %v6310_v0  ;;  %v230_v2 = vld [vmem:[#allocation2 + $0x8] sm:$0x1] }
  0x5b   : > { %223 = vst [vmem:[#allocation2 + $0x4c] sm:$0x1] %v6310_v0  ;;  %vm6484_vm2 = vmand %vm224_vm0, %vm225_vm1  ;;  %v233_v3 = vld [vmem:[#allocation2 + $0x10] sm:$0x1]  ;;  %v236_v4 = vld [vmem:[#allocation2 + $0x18] sm:$0x1] }
  0x5c   : > { %v7244_v1 = vsel %vm6484_vm2, 4294967295, %v7243_v1  ;;  %v231_v5 = vsel %vm6484_vm2, 0, %v230_v2  ;;  %v234_v6 = vsel %vm6484_vm2, 0, %v233_v3  ;;  %v237_v7 = vsel %vm6484_vm2, 0, %v236_v4  ;;  %v239_v8 = vld [vmem:[#allocation2 + $0x20] sm:$0x1]  ;;  %vm6498_vm4 = vmand %vm224_vm0, %vm257_vm3 }
  0x5d   : > { %7245 = vst [vmem:[#allocation13_spill] sm:$0xff] %v7244_v1  ;;  %232 = vst [vmem:[#allocation2 + $0x8] sm:$0x1] %v231_v5  ;;  %v240_v9 = vsel %vm6484_vm2, 0, %v239_v8  ;;  %v242_v10 = vld [vmem:[#allocation2 + $0x28] sm:$0x1] }
  0x5e   : > { %235 = vst [vmem:[#allocation2 + $0x10] sm:$0x1] %v234_v6  ;;  %238 = vst [vmem:[#allocation2 + $0x18] sm:$0x1] %v237_v7  ;;  %v245_v11 = vld [vmem:[#allocation2 + $0x30] sm:$0x1] }
  0x5f   : > { %241 = vst [vmem:[#allocation2 + $0x20] sm:$0x1] %v240_v9  ;;  %v243_v13 = vsel %vm6484_vm2, 0, %v242_v10  ;;  %v246_v14 = vsel %vm6484_vm2, 0, %v245_v11  ;;  %v248_v15 = vld [vmem:[#allocation2 + $0x38] sm:$0x1] }
  0x60   : > { %v251_v16 = vld [vmem:[#allocation2 + $0x40] sm:$0x1]  ;;  %244 = vst [vmem:[#allocation2 + $0x28] sm:$0x1] %v243_v13  ;;  %247 = vst [vmem:[#allocation2 + $0x30] sm:$0x1] %v246_v14 }
  0x61   : > { %v249_v17 = vsel %vm6484_vm2, 0, %v248_v15  ;;  %v252_v18 = vsel %vm6484_vm2, 0, %v251_v16  ;;  %v262_v19 = vld [vmem:[#allocation2 + $0xc] sm:$0x1]  ;;  %v265_v20 = vld [vmem:[#allocation2 + $0x14] sm:$0x1] }
  0x62   : > { %250 = vst [vmem:[#allocation2 + $0x38] sm:$0x1] %v249_v17  ;;  %253 = vst [vmem:[#allocation2 + $0x40] sm:$0x1] %v252_v18  ;;  %v263_v21 = vsel %vm6498_vm4, 0, %v262_v19  ;;  %v266_v22 = vsel %vm6498_vm4, 0, %v265_v20 }
  0x63   : > { %v268_v23 = vld [vmem:[#allocation2 + $0x1c] sm:$0x1]  ;;  %v271_v24 = vld [vmem:[#allocation2 + $0x24] sm:$0x1]  ;;  %264 = vst [vmem:[#allocation2 + $0xc] sm:$0x1] %v263_v21 }
  0x64   : > { %267 = vst [vmem:[#allocation2 + $0x14] sm:$0x1] %v266_v22  ;;  %v269_v25 = vsel %vm6498_vm4, 0, %v268_v23  ;;  %v272_v26 = vsel %vm6498_vm4, 0, %v271_v24  ;;  %v274_v27 = vld [vmem:[#allocation2 + $0x2c] sm:$0x1] }
  0x65   : > { %v277_v28 = vld [vmem:[#allocation2 + $0x34] sm:$0x1]  ;;  %270 = vst [vmem:[#allocation2 + $0x1c] sm:$0x1] %v269_v25  ;;  %273 = vst [vmem:[#allocation2 + $0x24] sm:$0x1] %v272_v26 }
  0x66   : > { %v275_v29 = vsel %vm6498_vm4, 0, %v274_v27  ;;  %v278_v30 = vsel %vm6498_vm4, 0, %v277_v28  ;;  %v280_v31 = vld [vmem:[#allocation2 + $0x3c] sm:$0x1]  ;;  %v283_v32 = vld [vmem:[#allocation2 + $0x44] sm:$0x1] }
  0x67   : > { %276 = vst [vmem:[#allocation2 + $0x2c] sm:$0x1] %v275_v29  ;;  %279 = vst [vmem:[#allocation2 + $0x34] sm:$0x1] %v278_v30  ;;  %v281_v33 = vsel %vm6498_vm4, 0, %v280_v31  ;;  %v284_v34 = vsel %vm6498_vm4, 0, %v283_v32 }
  0x68   : > { %v227_v35 = vld [vmem:[#allocation2] sm:$0x1]  ;;  %v254_v36 = vld [vmem:[#allocation2 + $0x48] sm:$0x1]  ;;  %282 = vst [vmem:[#allocation2 + $0x3c] sm:$0x1] %v281_v33 }
  0x69   : > { %285 = vst [vmem:[#allocation2 + $0x44] sm:$0x1] %v284_v34  ;;  %v228_v37 = vsel %vm6484_vm2, 0, %v227_v35  ;;  %v255_v38 = vsel %vm6484_vm2, 0, %v254_v36  ;;  %v259_v39 = vld [vmem:[#allocation2 + $0x4] sm:$0x1] }
  0x6a   : > { %v286_v40 = vld [vmem:[#allocation2 + $0x4c] sm:$0x1]  ;;  %229 = vst [vmem:[#allocation2] sm:$0x1] %v228_v37  ;;  %256 = vst [vmem:[#allocation2 + $0x48] sm:$0x1] %v255_v38 }
  0x6b   : > { %v260_v41 = vsel %vm6498_vm4, 0, %v259_v39  ;;  %v287_v42 = vsel %vm6498_vm4, 0, %v286_v40  ;;  %v289_v43 = vld [vmem:[%s6473_s5] sm:$0xf]  ;;  %vm378_vm5 = vcmask 1043456   ;;  %v7248_v54 = vmov 0 }
  0x6c   : > { %261 = vst [vmem:[#allocation2 + $0x4] sm:$0x1] %v260_v41  ;;  %288 = vst [vmem:[#allocation2 + $0x4c] sm:$0x1] %v287_v42  ;;  %v298_v44 = vshrl.u32 %v289_v43, 16  ;;  %v301_v45 = vshll.u32 %v289_v43, 16 }
  0x6d   : > { %v290_v46 = vld [vmem:[%s6473_s5 + $0x4] sm:$0xf]  ;;  %v291_v49 = vld [vmem:[%s6473_s5 + $0x8] sm:$0xf]  ;;  %v380_v51 = vld [vmem:[#allocation2 + $0x8] sm:$0xf] }
  0x6e   : > { %v306_v47 = vshrl.u32 %v290_v46, 16  ;;  %v309_v48 = vshll.u32 %v290_v46, 16  ;;  %v300_v50 = vrot.slane %v298_v44, 7  ;;  %v386_v52 = vld [vmem:[#allocation2 + $0x10] sm:$0xf]  ;;  %v314_v53 = vshrl.u32 %v291_v49, 16  ;;  %vm6538_vm6 = vmand %vm378_vm5, %vm257_vm3 }
  0x6f   : > { %v7249_v54 = vsel %vm6538_vm6, 4294967295, %v7248_v54  ;;  %v383_v55 = vld [vmem:[#allocation2 + $0xc] sm:$0x1]  ;;  %v317_v57 = vshll.u32 %v291_v49, 16  ;;  %v392_v58 = vld [vmem:[#allocation2 + $0x18] sm:$0xf] }
  0x70   : > { %7250 = vst [vmem:[#allocation14_spill] sm:$0xff] %v7249_v54  ;;  %v308_v56 = vrot.slane %v306_v47, 7  ;;  %v292_v59 = vld [vmem:[%s6473_s5 + $0xc] sm:$0xf]  ;;  %v303_v60 = vor.u32 %v301_v45, %v300_v50  ;;  %v304_v61 = vrot.slane %v300_v50, 4  ;;  %v316_v63 = vrot.slane %v314_v53, 7 }
  0x71   : > { %v389_v62 = vld [vmem:[#allocation2 + $0x14] sm:$0x1]  ;;  %v322_v0 = vshrl.u32 %v292_v59, 16  ;;  %v395_v4 = vld [vmem:[#allocation2 + $0x1c] sm:$0x1]  ;;  %v325_v5 = vshll.u32 %v292_v59, 16 }
  0x72   : > { %v311_v2 = vor.u32 %v309_v48, %v308_v56  ;;  %v312_v3 = vrot.slane %v308_v56, 4  ;;  %v293_v6 = vld [vmem:[%s6473_s5 + $0x10] sm:$0xf]  ;;  %v381_v7 = vsel %vm6538_vm6, %v303_v60, %v380_v51  ;;  %v384_v8 = vsel %vm6484_vm2, %v304_v61, %v383_v55  ;;  %v401_v15 = vld [vmem:[#allocation2 + $0x24] sm:$0x1]  ;;  %s6583_s20 = smov 0  }
  0x73   : > { %v319_v9 = vor.u32 %v317_v57, %v316_v63  ;;  %v320_v10 = vrot.slane %v316_v63, 4  ;;  %v398_v11 = vld [vmem:[#allocation2 + $0x20] sm:$0xf]  ;;  %382 = vst [vmem:[#allocation2 + $0x8] sm:$0xf] %v381_v7  ;;  %v324_v14 = vrot.slane %v322_v0, 7 }
  0x74   : > { %385 = vst [vmem:[#allocation2 + $0xc] sm:$0x1] %v384_v8  ;;  %v387_v12 = vsel %vm6538_vm6, %v311_v2, %v386_v52  ;;  %v390_v13 = vsel %vm6484_vm2, %v312_v3, %v389_v62  ;;  %v330_v16 = vshrl.u32 %v293_v6, 16  ;;  %v294_v17 = vld [vmem:[%s6473_s5 + $0x14] sm:$0xf]  ;;  %v333_v20 = vshll.u32 %v293_v6, 16 }
  0x75   : > { %388 = vst [vmem:[#allocation2 + $0x10] sm:$0xf] %v387_v12  ;;  %391 = vst [vmem:[#allocation2 + $0x14] sm:$0x1] %v390_v13  ;;  %v393_v18 = vsel %vm6538_vm6, %v319_v9, %v392_v58  ;;  %v396_v19 = vsel %vm6484_vm2, %v320_v10, %v395_v4  ;;  %v404_v21 = vld [vmem:[#allocation2 + $0x28] sm:$0xf]  ;;  %v327_v24 = vor.u32 %v325_v5, %v324_v14 }
  0x76   : > { %v338_v22 = vshrl.u32 %v294_v17, 16  ;;  %v295_v23 = vld [vmem:[%s6473_s5 + $0x18] sm:$0xf]  ;;  %394 = vst [vmem:[#allocation2 + $0x18] sm:$0xf] %v393_v18  ;;  %v328_v25 = vrot.slane %v324_v14, 4 }
  0x77   : > { %397 = vst [vmem:[#allocation2 + $0x1c] sm:$0x1] %v396_v19  ;;  %v332_v26 = vrot.slane %v330_v16, 7  ;;  %v407_v27 = vld [vmem:[#allocation2 + $0x2c] sm:$0x1]  ;;  %v341_v28 = vshll.u32 %v294_v17, 16  ;;  %v399_v33 = vsel %vm6538_vm6, %v327_v24, %v398_v11 }
  0x78   : > { %v340_v29 = vrot.slane %v338_v22, 7  ;;  %v410_v30 = vld [vmem:[#allocation2 + $0x30] sm:$0xf]  ;;  %v346_v31 = vshrl.u32 %v295_v23, 16  ;;  %v349_v32 = vshll.u32 %v295_v23, 16  ;;  %v402_v34 = vsel %vm6484_vm2, %v328_v25, %v401_v15 }
  0x79   : > { %v335_v35 = vor.u32 %v333_v20, %v332_v26  ;;  %v336_v36 = vrot.slane %v332_v26, 4  ;;  %v413_v37 = vld [vmem:[#allocation2 + $0x34] sm:$0x1]  ;;  %v296_v38 = vld [vmem:[%s6473_s5 + $0x1c] sm:$0xf] }
  0x7a   : > { %400 = vst [vmem:[#allocation2 + $0x20] sm:$0xf] %v399_v33  ;;  %403 = vst [vmem:[#allocation2 + $0x24] sm:$0x1] %v402_v34  ;;  %v343_v39 = vor.u32 %v341_v28, %v340_v29  ;;  %v344_v40 = vrot.slane %v340_v29, 4  ;;  %v348_v41 = vrot.slane %v346_v31, 7 }
  0x7b   : > { %v354_v42 = vshrl.u32 %v296_v38, 16  ;;  %v405_v43 = vsel %vm6538_vm6, %v335_v35, %v404_v21  ;;  %v408_v44 = vsel %vm6484_vm2, %v336_v36, %v407_v27  ;;  %v416_v45 = vld [vmem:[#allocation2 + $0x38] sm:$0xf]  ;;  %v419_v46 = vld [vmem:[#allocation2 + $0x3c] sm:$0x1]  ;;  %v357_v47 = vshll.u32 %v296_v38, 16 }
  0x7c   : > { %406 = vst [vmem:[#allocation2 + $0x28] sm:$0xf] %v405_v43  ;;  %409 = vst [vmem:[#allocation2 + $0x2c] sm:$0x1] %v408_v44  ;;  %v411_v48 = vsel %vm6538_vm6, %v343_v39, %v410_v30  ;;  %v414_v49 = vsel %vm6484_vm2, %v344_v40, %v413_v37  ;;  %v351_v50 = vor.u32 %v349_v32, %v348_v41  ;;  %v352_v51 = vrot.slane %v348_v41, 4 }
  0x7d   : > { %412 = vst [vmem:[#allocation2 + $0x30] sm:$0xf] %v411_v48  ;;  %415 = vst [vmem:[#allocation2 + $0x34] sm:$0x1] %v414_v49  ;;  %v356_v52 = vrot.slane %v354_v42, 7 }
  0x7e   : > { %v417_v53 = vsel %vm6538_vm6, %v351_v50, %v416_v45  ;;  %v420_v55 = vsel %vm6484_vm2, %v352_v51, %v419_v46  ;;  %v422_v56 = vld [vmem:[#allocation2 + $0x40] sm:$0xf]  ;;  %v425_v57 = vld [vmem:[#allocation2 + $0x44] sm:$0x1] }
  0x7f   : > { %418 = vst [vmem:[#allocation2 + $0x38] sm:$0xf] %v417_v53  ;;  %421 = vst [vmem:[#allocation2 + $0x3c] sm:$0x1] %v420_v55  ;;  %v359_v58 = vor.u32 %v357_v47, %v356_v52  ;;  %v360_v59 = vrot.slane %v356_v52, 4 }
  0x81   : > { %v423_v60 = vsel %vm6538_vm6, %v359_v58, %v422_v56  ;;  %v426_v61 = vsel %vm6484_vm2, %v360_v59, %v425_v57 }
  0x82   : > { %424 = vst [vmem:[#allocation2 + $0x40] sm:$0xf] %v423_v60  ;;  %427 = vst [vmem:[#allocation2 + $0x44] sm:$0x1] %v426_v61 }
  0x83 LB: >> { %v434_v62 = vld [vmem:[#allocation2] sm:$0xf]  ;;  %v435_v63 = vld [vmem:[#allocation2 + $0x8] sm:$0xf]  ;;  %v6588_v0 = vld [vmem:[#allocation2 + $0x4] sm:$0x1]  ;;  %s6301_s20 = sphi %s6583_s20, %s433_s20  }
  0x84   : >> { %v6590_v2 = vld [vmem:[#allocation2 + $0xc] sm:$0x1]  ;;  %vm469_vm7 = vsmask.f32 3328  ;;  %vm470_vm8 = vsmask.f32 7440  ;;  %v4794_v3 = vcombine.low %v434_v62, %v435_v63 }
  0x85   : >> { %s5181_s27 = smul.u32 576, %s6301_s20  ;;  %v473_v4 = vshrl.u32 %v434_v62, 16  ;;  %v476_v5 = vshll.u32 %v434_v62, 16  ;;  %v482_v6 = vshll.u32 %v6588_v0, 16  ;;  %v487_v7 = vshrl.u32 %v435_v63, 16  ;;  %vm6595_vm9 = vmor %vm469_vm7, %vm470_vm8  ;;  %s2421_s29 = scalar_lea.vmem [#allocation8], %s6301_s20 }
  0x86   : >> { %v490_v8 = vshll.u32 %v435_v63, 16  ;;  %v496_v9 = vshll.u32 %v6590_v2, 16  ;;  %5470 = vmatprep.mubr.bf16.mxu1 %v4794_v3  ;;  %v7251_v10 = vmov 0  ;;  %v6605_v24 = vld [vmem:[#allocation2 + $0x10] sm:$0xf]  ;;  %v898_v63 = vrot.slane %v6588_v0, 5 }
  0x87   : >> { %v7252_v10 = vsel %vm6595_vm9, 4294967295, %v7251_v10  ;;  %v475_v11 = vrot.slane %v473_v4, 4  ;;  %v478_v12 = vrot.slane %v476_v5, 5  ;;  %v489_v13 = vrot.slane %v487_v7, 4  ;;  %s6599_s28 = scalar_lea.vmem [#allocation6], %s5181_s27  ;;  %s433_s20 = sadd.s32 1, %s6301_s20  }
  0x88   : >> { %7253 = vst [vmem:[#allocation15_spill] sm:$0xff] %v7252_v10  ;;  %v5976_v14 = vld [vmem:[%s6599_s28 + $0x78] sm:$0xff]   ;;  %v492_v15 = vrot.slane %v490_v8, 5  ;;  %v484_v18 = vrot.slane %v482_v6, 5  ;;  %v5978_v19 = vld [vmem:[%s6599_s28 + $0x70] sm:$0xff]   ;;  %v498_v21 = vrot.slane %v496_v9, 5 }
  0x89   : >> { %v5977_v16 = vld [vmem:[%s6599_s28 + $0x38] sm:$0xff]   ;;  %v479_v17 = vor.u32 %v478_v12, %v475_v11  ;;  %5430 = vmatprep.subr.bf16.mxu0 %v5976_v14  ;;  %v5979_v22 = vld [vmem:[%s6599_s28 + $0x30] sm:$0xff]   ;;  %v5980_v25 = vld [vmem:[%s6599_s28 + $0x68] sm:$0xff]   ;;  %v501_v32 = vshrl.u32 %v6605_v24, 16  ;;  %v504_v34 = vshll.u32 %v6605_v24, 16  ;;  %vm893_vm10 = vcmask 1042432  }
  0x8a   : >> { %v493_v20 = vor.u32 %v492_v15, %v489_v13  ;;  %5454 = vmatprep.subr.bf16.mxu1 %v5977_v16  ;;  %5431 = vmatpush3.bf16.msra.mxu0 %v5976_v14  ;;  %v5981_v27 = vld [vmem:[%s6599_s28 + $0x28] sm:$0xff]   ;;  %v5982_v31 = vld [vmem:[%s6599_s28 + $0x60] sm:$0xff]   ;;  %v5984_v35 = vld [vmem:[%s6599_s28 + $0x58] sm:$0xff]   ;;  %vm894_vm11 = vcmask 1046532   ;;  %p430_p10 = scmp.ge.s32.totalorder %s433_s20, 11  }
  0x8b   : >> { %v480_v23 = vrot.slane %v479_v17, 4  ;;  %5455 = vmatpush3.bf16.msra.mxu1 %v5977_v16  ;;  %5432 = vmatprep.subr.bf16.mxu0 %v5978_v19  ;;  %v5983_v33 = vld [vmem:[%s6599_s28 + $0x20] sm:$0xff]   ;;  %v503_v36 = vrot.slane %v501_v32, 4  ;;  %v5985_v37 = vld [vmem:[%s6599_s28 + $0x18] sm:$0xff]   ;;  %v506_v38 = vrot.slane %v504_v34, 5  ;;  %v5986_v39 = vld [vmem:[%s6599_s28 + $0x50] sm:$0xff]  }
  0x8c   : >> { %v494_v26 = vrot.slane %v493_v20, 4  ;;  %5456 = vmatprep.subr.bf16.mxu1 %v5979_v22  ;;  %v6620_v40 = vld [vmem:[#allocation2 + $0x18] sm:$0xf]  ;;  %v6622_v41 = vld [vmem:[#allocation2 + $0x14] sm:$0x1]  ;;  %v5988_v49 = vld [vmem:[%s6599_s28 + $0x48] sm:$0xff]  }
  0x8d   : >> { %v485_v28 = vsel %vm6595_vm9, %v480_v23, %v484_v18  ;;  %v6624_v42 = vld [vmem:[#allocation2 + $0x1c] sm:$0x1]  ;;  %v5987_v43 = vld [vmem:[%s6599_s28 + $0x10] sm:$0xff]   ;;  %v507_v44 = vor.u32 %v506_v38, %v503_v36  ;;  %v515_v45 = vshrl.u32 %v6620_v40, 16  ;;  %v518_v46 = vshll.u32 %v6620_v40, 16  ;;  %v5989_v52 = vld [vmem:[%s6599_s28 + $0x8] sm:$0xff]  }
  0x8e   : >> { %v499_v29 = vsel %vm6595_vm9, %v494_v26, %v498_v21  ;;  %5433 = vmatpush3.bf16.msra.mxu0 %v5978_v19  ;;  %v510_v47 = vshll.u32 %v6622_v41, 16  ;;  %v524_v48 = vshll.u32 %v6624_v42, 16  ;;  %v5990_v59 = vld [vmem:[%s6599_s28 + $0x40] sm:$0xff]   ;;  %v5994_v3 = vld [vmem:[%s6599_s28 + $0xb8] sm:$0xff]   ;;  %v439_v6 = vld [vmem:[#allocation2 + $0x28] sm:$0xf]  ;;  %v4795_v19 = vcombine.low %v6605_v24, %v6620_v40 }
  0x8f   : >> { %v4782_v30 = vcombine.low %v485_v28, %v499_v29  ;;  %5457 = vmatpush3.bf16.msra.mxu1 %v5979_v22  ;;  %5434 = vmatprep.subr.bf16.mxu0 %v5980_v25  ;;  %v517_v50 = vrot.slane %v515_v45, 4  ;;  %v520_v51 = vrot.slane %v518_v46, 5  ;;  %v508_v53 = vrot.slane %v507_v44, 4  ;;  %v5991_v60 = vld [vmem:[%s6599_s28] sm:$0xff]   ;;  %v5995_v4 = vld [vmem:[%s6599_s28 + $0xf8] sm:$0xff]   ;;  %v5996_v13 = vld [vmem:[%s6599_s28 + $0xb0] sm:$0xff]  }
  0x90   : >> { %5458 = vmatprep.subr.bf16.mxu1 %v5981_v27  ;;  %v512_v56 = vrot.slane %v510_v47, 5  ;;  %v526_v57 = vrot.slane %v524_v48, 5  ;;  %v438_v5 = vld [vmem:[#allocation2 + $0x20] sm:$0xf]  ;;  %v6642_v8 = vld [vmem:[#allocation2 + $0x24] sm:$0x1]  ;;  %vm6674_vm12 = vmor %vm893_vm10, %vm894_vm11 }
  0x91   : >> { %5446 = vmatprep.mubr.bf16.mxu0 %v4782_v30  ;;  %v521_v55 = vor.u32 %v520_v51, %v517_v50  ;;  %v6644_v9 = vld [vmem:[#allocation2 + $0x2c] sm:$0x1]  ;;  %v529_v11 = vshrl.u32 %v438_v5, 16  ;;  %v532_v12 = vshll.u32 %v438_v5, 16  ;;  %v538_v14 = vshll.u32 %v6642_v8, 16  ;;  %s5190_s4 = sshll.u32 (%p430_p10), %s6355_s16, 9 }
  0x92   : >> { %5435 = vmatpush3.bf16.msra.mxu0 %v5980_v25  ;;  %v513_v61 = vsel %vm6595_vm9, %v508_v53, %v512_v56  ;;  %v543_v15 = vshrl.u32 %v439_v6, 16  ;;  %v546_v16 = vshll.u32 %v439_v6, 16  ;;  %v552_v17 = vshll.u32 %v6644_v9, 16  ;;  %v6649_v18 = vld [vmem:[#allocation2 + $0x30] sm:$0xf]  ;;  %v5998_v44 = vld [vmem:[%s6599_s28 + $0xa8] sm:$0xff]   ;;  %s7169_s24 = scalar_lea.hbm (%p430_p10), %s7220_s3, %s5190_s4 }
  0x93   : >> { %5459 = vmatpush3.bf16.msra.mxu1 %v5981_v27  ;;  %5436 = vmatprep.subr.bf16.mxu0 %v5982_v31  ;;  %v522_v58 = vrot.slane %v521_v55, 4  ;;  %v531_v20 = vrot.slane %v529_v11, 4  ;;  %v534_v21 = vrot.slane %v532_v12, 5  ;;  %v4796_v22 = vcombine.low %v438_v5, %v439_v6  ;;  %v6653_v23 = vld [vmem:[#allocation2 + $0x38] sm:$0xf]  ;;  %v5999_v48 = vld [vmem:[%s6599_s28 + $0xe8] sm:$0xff]  }
  0x94   : >> { %5460 = vmatprep.subr.bf16.mxu1 %v5983_v33  ;;  %v6655_v25 = vld [vmem:[#allocation2 + $0x34] sm:$0x1]  ;;  %v540_v26 = vrot.slane %v538_v14, 5  ;;  %v545_v27 = vrot.slane %v543_v15, 4  ;;  %v548_v28 = vrot.slane %v546_v16, 5  ;;  %v554_v29 = vrot.slane %v552_v17, 5 }
  0x95   : >> { %v527_v62 = vsel %vm6595_vm9, %v522_v58, %v526_v57  ;;  %v6657_v30 = vld [vmem:[#allocation2 + $0x3c] sm:$0x1]  ;;  %v535_v32 = vor.u32 %v534_v21, %v531_v20  ;;  %v557_v24 = vshrl.u32 %v6649_v18, 16  ;;  %v566_v34 = vshll.u32 %v6655_v25, 16  ;;  %v6000_v58 = vld [vmem:[%s6599_s28 + $0xa0] sm:$0xff]   ;;  %v6008_v21 = vld [vmem:[%s6599_s28 + $0x88] sm:$0xff]  }
  0x96   : >> { %5437 = vmatpush3.bf16.msra.mxu0 %v5982_v31  ;;  %v4783_v7 = vcombine.low %v513_v61, %v527_v62  ;;  %v5997_v31 = vld [vmem:[%s6599_s28 + $0xf0] sm:$0xff]   ;;  %v571_v36 = vshrl.u32 %v6653_v23, 16  ;;  %v580_v38 = vshll.u32 %v6657_v30, 16  ;;  %v7254_v56 = vmov 0  ;;  %v6001_v62 = vld [vmem:[%s6599_s28 + $0xe0] sm:$0xff]   ;;  %v6002_v14 = vld [vmem:[%s6599_s28 + $0x98] sm:$0xff]  }
  0x97   : >> { %5461 = vmatpush3.bf16.msra.mxu1 %v5983_v33  ;;  %5438 = vmatprep.subr.bf16.mxu0 %v5984_v35  ;;  %v560_v33 = vshll.u32 %v6649_v18, 16  ;;  %v559_v40 = vrot.slane %v557_v24, 4  ;;  %v568_v51 = vrot.slane %v566_v34, 5  ;;  %v7255_v56 = vsel %vm6674_vm12, 4294967295, %v7254_v56  ;;  %v869_v5 = vld [vmem:[#allocation2] sm:$0xe] }
  0x98   : >> { %5462 = vmatprep.subr.bf16.mxu1 %v5985_v37  ;;  %v573_v46 = vrot.slane %v571_v36, 4  ;;  %v582_v55 = vrot.slane %v580_v38, 5  ;;  %7256 = vst [vmem:[#allocation16_spill] sm:$0xff] %v7255_v56  ;;  %v902_v57 = vrot.slane %v6590_v2, 5  ;;  %v4797_v61 = vcombine.low %v6649_v18, %v6653_v23  ;;  %v870_v2 = vld [vmem:[#allocation2 + $0x8] sm:$0xe] }
  0x99   : >> { %v4807_v11 = vrot.slane %v870_v2, 9  ;;  %v6012_v12 = vld [vmem:[#allocation2 + $0x8] ss:$8 sps:$4 sm:$0xff]   ;;  %v6003_v17 = vld [vmem:[%s6599_s28 + $0xd8] sm:$0xff]   ;;  %v906_v0 = vrot.slane %v6622_v41, 5  ;;  %v910_v20 = vrot.slane %v6624_v42, 5 }
  0x9a   : >> { %5439 = vmatpush3.bf16.msra.mxu0 %v5984_v35  ;;  %v549_v35 = vor.u32 %v548_v28, %v545_v27  ;;  %v6009_v27 = vld [vmem:[%s6599_s28 + $0xc8] sm:$0xff]   ;;  %v872_v28 = vld [vmem:[#allocation2 + $0x18] sm:$0xe]  ;;  %v922_v38 = vrot.slane %v6655_v25, 5  ;;  %v1541_v2 = vld [vmem:[#allocation2 + $0x10] sm:$0xe] }
  0x9b   : >> { %5463 = vmatpush3.bf16.msra.mxu1 %v5985_v37  ;;  %5440 = vmatprep.subr.bf16.mxu0 %v5986_v39  ;;  %v574_v37 = vshll.u32 %v6653_v23, 16  ;;  %v903_v16 = vsel %vm6674_vm12, %v4807_v11, %v902_v57  ;;  %v914_v23 = vrot.slane %v6642_v8, 5  ;;  %v874_v41 = vld [vmem:[#allocation2 + $0x28] sm:$0xe]  ;;  %v4809_v42 = vrot.slane %v872_v28, 9  ;;  %s4619_s6 = sshll.u32 (%p430_p10), %s6581_s18, 4  ;;  %s7171_s6 = int_to_ptr.vmem [resolvable:$true] %s4619_s6 }
  0x9c   : >> { %5464 = vmatprep.subr.bf16.mxu1 %v5987_v43  ;;  %v550_v45 = vrot.slane %v549_v35, 4  ;;  %v875_v8 = vld [vmem:[#allocation2 + $0x30] sm:$0xe]  ;;  %v876_v34 = vld [vmem:[#allocation2 + $0x38] sm:$0xe]  ;;  %v6018_v11 = vld [vmem:[%s6599_s28 + $0x128] sm:$0xff]  }
  0x9d   : >> { %v576_v47 = vrot.slane %v574_v37, 5  ;;  %v911_v36 = vsel %vm6674_vm12, %v4809_v42, %v910_v20  ;;  %v6014_v37 = vld [vmem:[%s6599_s28 + $0x138] sm:$0xff]   ;;  %v6020_v25 = vld [vmem:[#allocation2 + $0x28] ss:$8 sps:$4 sm:$0xff]   ;;  %s4606_s16 = scalar_lea.sflag (%p430_p10), [#allocation5], %s6467_s7  ;;  %s6225_s22 = scalar_lea.vmem (%p430_p10), %s7171_s6, 512 }
  0x9e   : >> { %5441 = vmatpush3.bf16.msra.mxu0 %v5986_v39  ;;  %v536_v39 = vrot.slane %v535_v32, 4  ;;  %v6011_v32 = vld [vmem:[%s6599_s28 + $0xc0] sm:$0xff]   ;;  %v1258_v57 = vld [vmem:[#allocation2 + $0x10] sm:$0xf]  ;;  %p6226_p2 = scmp.ne.s32.totalorder (%p430_p10), %s7171_s6, %s6225_s22  ;;  %p7277_p7 = scmp.ne.s32.totalorder (%p430_p10), %s7237_s21, 0 }
  0x9f   : >> { %5465 = vmatpush3.bf16.msra.mxu1 %v5987_v43  ;;  %5442 = vmatprep.subr.bf16.mxu0 %v5988_v49  ;;  %v562_v43 = vrot.slane %v560_v33, 5  ;;  %v577_v53 = vor.u32 %v576_v47, %v573_v46  ;;  %v4811_v33 = vrot.slane %v874_v41, 9  ;;  %v6016_v47 = vld [vmem:[%s6599_s28 + $0x130] sm:$0xff]   ;;  %v6021_v20 = vld [vmem:[#allocation2 + $0x38] ss:$8 sps:$4 sm:$0xff]   ;;  %s6311_s25 = smov (%p430_p10), [#allocation9]  }
  0xa0   : >> { %5466 = vmatprep.subr.bf16.mxu1 %v5989_v52  ;;  %p6227_p12 = pnand (%p430_p10), %p6226_p2, %p7277_p7  ;;  %s6229_s26 = sshll.u32 (%p430_p10), %s6311_s25, 4  ;;  %s6230_s26 = int_to_ptr.vmem [resolvable:$false] %s6229_s26 }
  0xa1   : >> { %v563_v50 = vor.u32 %v562_v43, %v559_v40  ;;  %v926_v40 = vrot.slane %v6657_v30, 5  ;;  %v6013_v43 = vld [vmem:[#allocation2 + $0x18] ss:$8 sps:$4 sm:$0xff]   ;;  %s6231_s30 = scalar_lea.vmem (%p430_p10), %s6230_s26, 1024  ;;  %p6232_p0 = scmp.lt.s32.totalorder (%p430_p10), %s7171_s6, %s6230_s26 }
  0xa2   : >> { %5443 = vmatpush3.bf16.msra.mxu0 %v5988_v49  ;;  %v541_v49 = vsel %vm6595_vm9, %v536_v39, %v540_v26  ;;  %v918_v26 = vrot.slane %v6644_v9, 5  ;;  %v6015_v39 = vld [vmem:[%s6599_s28 + $0x178] sm:$0xff]   ;;  %p6228_p13 = pneg (%p430_p10), %p6227_p12  ;;  %p6233_p5 = scmp.lt.s32.totalorder (%p430_p10), %s6231_s30, %s6225_s22 }
  0xa3   : >> { %5467 = vmatpush3.bf16.msra.mxu1 %v5989_v52  ;;  %5444 = vmatprep.subr.bf16.mxu0 %v5990_v59  ;;  %v555_v52 = vsel %vm6595_vm9, %v550_v45, %v554_v29  ;;  %v873_v29 = vld [vmem:[#allocation2 + $0x20] sm:$0xe]  ;;  %v4813_v45 = vrot.slane %v876_v34, 9 }
  0xa4   : >> { %5468 = vmatprep.subr.bf16.mxu1 %v5991_v60  ;;  %v4810_v9 = vrot.slane %v873_v29, 9  ;;  %v6023_v34 = vld [vmem:[%s6599_s28 + $0x160] sm:$0xff]   ;;  %p6234_p3 = por (%p430_p10), %p6233_p5, %p6232_p0 }
  0xa6   : >> { %5445 = vmatpush3.bf16.msra.mxu0 %v5990_v59  ;;  %v4784_v59 = vcombine.low %v541_v49, %v555_v52  ;;  %v919_v49 = vsel %vm6674_vm12, %v4811_v33, %v918_v26  ;;  %v1262_v26 = vld [vmem:[#allocation2 + $0x20] sm:$0xf]  ;;  %p6235_p11 = pnand (%p430_p10), %p6234_p3, %p6228_p13 }
  0xa7   : >> { %5469 = vmatpush3.bf16.msra.mxu1 %v5991_v60  ;;  %5478 = vmatprep.subr.bf16.mxu0 %v5994_v3  ;;  %v564_v60 = vrot.slane %v563_v50, 4  ;;  %v6017_v50 = vld [vmem:[%s6599_s28 + $0x170] sm:$0xff]   ;;  %v1318_v33 = vshll.u32 %v1262_v26, 16 }
  0xa8   : >> { %5502 = vmatprep.subr.bf16.mxu1 %v5995_v4 }
  0xa9   : >> { %5447 = vmatmul.mubr.bf16.vlgmr.msra.gmra.mxu0 %v4783_v7  ;;  %v4806_v7 = vrot.slane %v869_v5, 9 }
  0xaa   : >> { %5471 = vmatmul.mubr.bf16.vlgmr.msra.gmra.mxu1 %v4795_v19  ;;  %5479 = vmatpush3.bf16.msra.mxu0 %v5994_v3  ;;  %v578_v3 = vrot.slane %v577_v53, 4  ;;  %v6006_v19 = vld [vmem:[%s6599_s28 + $0x90] sm:$0xff]   ;;  %v927_v53 = vsel %vm6674_vm12, %v4813_v45, %v926_v40  ;;  %v6025_v45 = vld [vmem:[%s6599_s28 + $0x158] sm:$0xff]  }
  0xab   : >> { %5503 = vmatpush3.bf16.msra.mxu1 %v5995_v4  ;;  %5480 = vmatprep.subr.bf16.mxu0 %v5996_v13  ;;  %v569_v4 = vsel %vm6595_vm9, %v564_v60, %v568_v51  ;;  %v899_v15 = vsel %vm6674_vm12, %v4806_v7, %v898_v63  ;;  %v6007_v63 = vld [vmem:[%s6599_s28 + $0xd0] sm:$0xff]   ;;  %v1256_v51 = vld [vmem:[#allocation2 + $0x8] sm:$0xf] }
  0xac   : >> { %5504 = vmatprep.subr.bf16.mxu1 %v5997_v31  ;;  %5474 = vmatprep.mubr.bf16.mxu1 %v4796_v22  ;;  %v583_v6 = vsel %vm6595_vm9, %v578_v3, %v582_v55  ;;  %v4831_v18 = vcombine.low %v899_v15, %v903_v16  ;;  %v871_v22 = vld [vmem:[#allocation2 + $0x10] sm:$0xe]  ;;  %v1257_v55 = vld [vmem:[#allocation2 + $0xc] sm:$0x1]  ;;  %v1276_v60 = vshll.u32 %v1256_v51, 16 }
  0xad   : >> { %5450 = vmatprep.mubr.bf16.mxu0 %v4784_v59  ;;  %v4808_v24 = vrot.slane %v871_v22, 9  ;;  %v1273_v59 = vshrl.u32 %v1256_v51, 16  ;;  %v1540_v3 = vld [vmem:[#allocation2 + $0x8] sm:$0xe]  ;;  %v1566_v7 = vrot.slane %v1257_v55, 5 }
  0xae   : >> { %5481 = vmatpush3.bf16.msra.mxu0 %v5996_v13  ;;  %v4785_v13 = vcombine.low %v569_v4, %v583_v6  ;;  %v1290_v4 = vshll.u32 %v1258_v57, 16  ;;  %v4901_v6 = vrot.slane %v1540_v3, 9  ;;  %v1260_v15 = vld [vmem:[#allocation2 + $0x18] sm:$0xf] }
  0xaf   : >> { %5505 = vmatpush3.bf16.msra.mxu1 %v5997_v31  ;;  %5482 = vmatprep.subr.bf16.mxu0 %v5998_v44  ;;  %v6010_v31 = vld [vmem:[%s6599_s28 + $0x80] sm:$0xff]   ;;  %v907_v35 = vsel %vm6674_vm12, %v4808_v24, %v906_v0  ;;  %v4902_v0 = vrot.slane %v1541_v2, 9  ;;  %v1304_v41 = vshll.u32 %v1260_v15, 16 }
  0xb0   : >> { %5506 = vmatprep.subr.bf16.mxu1 %v5999_v48  ;;  %v4832_v46 = vcombine.low %v907_v35, %v911_v36  ;;  %v1567_v22 = vsel %vm6674_vm12, %v4901_v6, %v1566_v7  ;;  %v6022_v24 = vld [vmem:[%s6599_s28 + $0x120] sm:$0xff]   ;;  %v1268_v6 = vld [vmem:[#allocation2 + $0x38] sm:$0xf]  ;;  %v6760_v7 = vld [vmem:[#allocation2 + $0x3c] sm:$0x1] }
  0xb1   : >> { %5451 = vmatmul.mubr.bf16.gmra.mxu0 %v4785_v13  ;;  %v1278_v13 = vrot.slane %v1276_v60, 5  ;;  %v1266_v60 = vld [vmem:[#allocation2 + $0x30] sm:$0xf] }
  0xb2   : >> { %5483 = vmatpush3.bf16.msra.mxu0 %v5998_v44  ;;  %5475 = vmatmul.mubr.bf16.gmra.mxu1 %v4797_v61  ;;  %v4812_v44 = vrot.slane %v875_v8, 9  ;;  %v1282_v61 = vshll.u32 %v1257_v55, 16  ;;  %v1343_v2 = vshrl.u32 %v1266_v60, 16 }
  0xb3   : >> { %5507 = vmatpush3.bf16.msra.mxu1 %v5999_v48  ;;  %5484 = vmatprep.subr.bf16.mxu0 %v6000_v58  ;;  %v915_v48 = vsel %vm6674_vm12, %v4810_v9, %v914_v23  ;;  %v1315_v9 = vshrl.u32 %v1262_v26, 16 }
  0xb4   : >> { %5508 = vmatprep.subr.bf16.mxu1 %v6001_v62  ;;  %5518 = vmatprep.mubr.bf16.mxu1 %v6012_v12  ;;  %v4833_v30 = vcombine.low %v915_v48, %v919_v49  ;;  %v923_v52 = vsel %vm6674_vm12, %v4812_v44, %v922_v38  ;;  %v1275_v12 = vrot.slane %v1273_v59, 4  ;;  %v1306_v38 = vrot.slane %v1304_v41, 5  ;;  %v6740_v44 = vld [vmem:[#allocation2 + $0x18] sm:$0xe]  ;;  %v6027_v59 = vld [vmem:[%s6599_s28 + $0x150] sm:$0xff]   ;;  %v6029_v41 = vld [vmem:[%s6599_s28 + $0x148] sm:$0xff]  }
  0xb5   : >> { %5494 = vmatprep.mubr.bf16.mxu0 %v4831_v18  ;;  %v4834_v16 = vcombine.low %v923_v52, %v927_v53  ;;  %v1284_v18 = vrot.slane %v1282_v61, 5  ;;  %v1317_v49 = vrot.slane %v1315_v9, 4  ;;  %v6026_v52 = vld [vmem:[%s6599_s28 + $0x110] sm:$0xff]   ;;  %v6030_v9 = vld [vmem:[%s6599_s28 + $0x100] sm:$0xff]  }
  0xb6   : >> { %5485 = vmatpush3.bf16.msra.mxu0 %v6000_v58  ;;  %v1259_v58 = vld [vmem:[#allocation2 + $0x14] sm:$0x1] }
  0xb7   : >> { %5509 = vmatpush3.bf16.msra.mxu1 %v6001_v62  ;;  %5486 = vmatprep.subr.bf16.mxu0 %v6002_v14  ;;  %v1287_v62 = vshrl.u32 %v1258_v57, 16  ;;  %v1296_v5 = vshll.u32 %v1259_v58, 16  ;;  %v1570_v23 = vrot.slane %v1259_v58, 5  ;;  %v1264_v57 = vld [vmem:[#allocation2 + $0x28] sm:$0xf] }
  0xb8   : >> { %5510 = vmatprep.subr.bf16.mxu1 %v6003_v17  ;;  %v6754_v58 = vld [vmem:[#allocation2 + $0x2c] sm:$0x1]  ;;  %v6757_v61 = vld [vmem:[#allocation2 + $0x34] sm:$0x1]  ;;  %v1332_v3 = vshll.u32 %v1264_v57, 16 }
  0xb9   : >> { %v1298_v29 = vrot.slane %v1296_v5, 5  ;;  %v1571_v8 = vsel %vm6674_vm12, %v4902_v0, %v1570_v23  ;;  %v1357_v0 = vshrl.u32 %v1268_v6, 16  ;;  %v1360_v23 = vshll.u32 %v1268_v6, 16  ;;  %v6033_v6 = vld [vmem:[%s6599_s28 + $0x1f8] sm:$0xff]  }
  0xba   : >> { %5487 = vmatpush3.bf16.msra.mxu0 %v6002_v14  ;;  %v1289_v14 = vrot.slane %v1287_v62, 4  ;;  %v4926_v36 = vcombine.low %v1567_v22, %v1571_v8  ;;  %v1329_v62 = vshrl.u32 %v1264_v57, 16  ;;  %v6767_v22 = vld [vmem:[#allocation2 + $0x44] sm:$0x1] }
  0xbb   : >> { %5511 = vmatpush3.bf16.msra.mxu1 %v6003_v17  ;;  %5488 = vmatprep.subr.bf16.mxu0 %v6006_v19  ;;  %v6019_v17 = vld [vmem:[%s6599_s28 + $0x168] sm:$0xff]   ;;  %v1359_v26 = vrot.slane %v1357_v0, 4  ;;  %v1362_v8 = vrot.slane %v1360_v23, 5 }
  0xbc   : >> { %5512 = vmatprep.subr.bf16.mxu1 %v6007_v63  ;;  %v6037_v0 = vld [vmem:[%s6599_s28 + $0x1e8] sm:$0xff]  }
  0xbe   : >> { %5489 = vmatpush3.bf16.msra.mxu0 %v6006_v19  ;;  %v1292_v19 = vrot.slane %v1290_v4, 5 }
  0xbf   : >> { %5513 = vmatpush3.bf16.msra.mxu1 %v6007_v63  ;;  %5490 = vmatprep.subr.bf16.mxu0 %v6008_v21  ;;  %v6725_v63 = vld [vmem:[#allocation2 + $0x1c] sm:$0x1] }
  0xc0   : >> { %5514 = vmatprep.subr.bf16.mxu1 %v6009_v27  ;;  %v1293_v28 = vor.u32 %v1292_v19, %v1289_v14  ;;  %v1574_v55 = vrot.slane %v6725_v63, 5  ;;  %v1346_v14 = vshll.u32 %v1266_v60, 16  ;;  %v1352_v19 = vshll.u32 %v6757_v61, 16 }
  0xc1   : >> { %v1586_v60 = vrot.slane %v6757_v61, 5 }
  0xc2   : >> { %5491 = vmatpush3.bf16.msra.mxu0 %v6008_v21  ;;  %v1279_v21 = vor.u32 %v1278_v13, %v1275_v12  ;;  %v1294_v35 = vrot.slane %v1293_v28, 4  ;;  %v1331_v12 = vrot.slane %v1329_v62, 4  ;;  %v1334_v13 = vrot.slane %v1332_v3, 5  ;;  %v1547_v62 = vld [vmem:[#allocation2 + $0x40] sm:$0xe]  ;;  %v6032_v3 = vld [vmem:[%s6599_s28 + $0x1b8] sm:$0xff]  }
  0xc3   : >> { %5515 = vmatpush3.bf16.msra.mxu1 %v6009_v27  ;;  %5492 = vmatprep.subr.bf16.mxu0 %v6010_v31  ;;  %v1301_v27 = vshrl.u32 %v1260_v15, 16  ;;  %v1270_v15 = vld [vmem:[#allocation2 + $0x40] sm:$0xf] }
  0xc4   : >> { %5516 = vmatprep.subr.bf16.mxu1 %v6011_v32  ;;  %v1280_v42 = vrot.slane %v1279_v21, 4  ;;  %v1348_v21 = vrot.slane %v1346_v14, 5  ;;  %v1371_v28 = vshrl.u32 %v1270_v15, 16  ;;  %v6034_v14 = vld [vmem:[%s6599_s28 + $0x1b0] sm:$0xff]  }
  0xc6   : >> { %5493 = vmatpush3.bf16.msra.mxu0 %v6010_v31  ;;  %v6729_v31 = vld [vmem:[#allocation2 + $0x24] sm:$0x1]  ;;  %v1285_v40 = vsel %vm6595_vm9, %v1280_v42, %v1284_v18  ;;  %v1345_v18 = vrot.slane %v1343_v2, 4 }
  0xc7   : >> { %5517 = vmatpush3.bf16.msra.mxu1 %v6011_v32  ;;  %5526 = vmatprep.subr.bf16.mxu0 %v6014_v37  ;;  %v1310_v32 = vshll.u32 %v6725_v63, 16 }
  0xc8   : >> { %5550 = vmatprep.subr.bf16.mxu1 %v6015_v39  ;;  %v1349_v42 = vor.u32 %v1348_v21, %v1345_v18  ;;  %v6817_v21 = vld [vmem:[#allocation2 + $0x14] sm:$0x1] }
  0xc9   : >> { %5495 = vmatmul.mubr.bf16.vlgmr.msra.gmra.mxu0 %v4832_v46  ;;  %v1299_v46 = vsel %vm6595_vm9, %v1294_v35, %v1298_v29  ;;  %v6747_v51 = vrot.slane %v1310_v32, 5  ;;  %v1374_v29 = vshll.u32 %v1270_v15, 16 }
  0xca   : >> { %5519 = vmatmul.mubr.bf16.vlgmr.msra.gmra.mxu1 %v6013_v43  ;;  %5527 = vmatpush3.bf16.msra.mxu0 %v6014_v37  ;;  %v1303_v37 = vrot.slane %v1301_v27, 4  ;;  %v1324_v43 = vshll.u32 %v6729_v31, 16  ;;  %v4889_v48 = vcombine.low %v1285_v40, %v1299_v46  ;;  %v1366_v27 = vshll.u32 %v6760_v7, 16  ;;  %v1544_v40 = vld [vmem:[#allocation2 + $0x28] sm:$0xe] }
  0xcb   : >> { %5551 = vmatpush3.bf16.msra.mxu1 %v6015_v39  ;;  %5528 = vmatprep.subr.bf16.mxu0 %v6016_v47  ;;  %v6024_v39 = vld [vmem:[%s6599_s28 + $0x118] sm:$0xff]   ;;  %v1376_v35 = vrot.slane %v1374_v29, 5 }
  0xcc   : >> { %5552 = vmatprep.subr.bf16.mxu1 %v6017_v50  ;;  %5498 = vmatprep.mubr.bf16.mxu0 %v4833_v30  ;;  %v4903_v30 = vrot.slane %v6740_v44, 9  ;;  %v6751_v53 = vrot.slane %v1324_v43, 5  ;;  %v1545_v43 = vld [vmem:[#allocation2 + $0x30] sm:$0xe]  ;;  %v6775_v46 = vrot.slane %v1366_v27, 5 }
  0xcd   : >> { %5522 = vmatprep.mubr.bf16.mxu1 %v6020_v25  ;;  %v1307_v25 = vor.u32 %v1306_v38, %v1303_v37  ;;  %v1354_v38 = vrot.slane %v1352_v19, 5  ;;  %v4906_v57 = vrot.slane %v1545_v43, 9  ;;  %v6823_v27 = vld [vmem:[#allocation2 + $0x1c] sm:$0x1] }
  0xce   : >> { %5529 = vmatpush3.bf16.msra.mxu0 %v6016_v47  ;;  %v6745_v47 = vld [vmem:[#allocation2 + $0x20] sm:$0xe]  ;;  %v1575_v61 = vsel %vm6674_vm12, %v4903_v30, %v1574_v55 }
  0xcf   : >> { %5553 = vmatpush3.bf16.msra.mxu1 %v6017_v50  ;;  %5530 = vmatprep.subr.bf16.mxu0 %v6018_v11  ;;  %v1320_v50 = vrot.slane %v1318_v33, 5  ;;  %v4904_v5 = vrot.slane %v6745_v47, 9  ;;  %v1587_v55 = vsel %vm6674_vm12, %v4906_v57, %v1586_v60 }
  0xd0   : >> { %5554 = vmatprep.subr.bf16.mxu1 %v6019_v17 }
  0xd1   : >> { %5499 = vmatmul.mubr.bf16.gmra.mxu0 %v4834_v16  ;;  %v1321_v4 = vor.u32 %v1320_v50, %v1317_v49  ;;  %v6028_v16 = vld [vmem:[%s6599_s28 + $0x108] sm:$0xff]   ;;  %v1582_v49 = vrot.slane %v6754_v58, 5  ;;  %v1546_v50 = vld [vmem:[#allocation2 + $0x38] sm:$0xe] }
  0xd2   : >> { %5531 = vmatpush3.bf16.msra.mxu0 %v6018_v11  ;;  %5523 = vmatmul.mubr.bf16.gmra.mxu1 %v6021_v20  ;;  %v6762_v11 = vrot.slane %v1307_v25, 4  ;;  %v1335_v20 = vor.u32 %v1334_v13, %v1331_v12  ;;  %v1590_v13 = vrot.slane %v6760_v7, 5 }
  0xd3   : >> { %5555 = vmatpush3.bf16.msra.mxu1 %v6019_v17  ;;  %5532 = vmatprep.subr.bf16.mxu0 %v6022_v24  ;;  %v1338_v17 = vshll.u32 %v6754_v58, 16  ;;  %v1322_v32 = vrot.slane %v1321_v4, 4 }
  0xd4   : >> { %5556 = vmatprep.subr.bf16.mxu1 %v6023_v34  ;;  %5566 = vmatprep.mubr.bf16.mxu1 %v4926_v36  ;;  %v1380_v36 = vshll.u32 %v6767_v22, 16  ;;  %v1336_v37 = vrot.slane %v1335_v20, 4  ;;  %v1313_v2 = vsel %vm6595_vm9, %v6762_v11, %v6747_v51  ;;  %v1594_v11 = vrot.slane %v6767_v22, 5  ;;  %v1925_v20 = vld [vmem:[#allocation2 + $0x10] sm:$0xf] }
  0xd5   : >> { %5542 = vmatprep.mubr.bf16.mxu0 %v4889_v48  ;;  %v1340_v33 = vrot.slane %v1338_v17, 5  ;;  %v1327_v58 = vsel %vm6595_vm9, %v1322_v32, %v6751_v53  ;;  %v4908_v53 = vrot.slane %v1547_v62, 9  ;;  %v1945_v29 = vshll.u32 %v1925_v20, 16  ;;  %v6041_v62 = vld [vmem:[%s6599_s28 + $0x1d8] sm:$0xff]  }
  0xd6   : >> { %5533 = vmatpush3.bf16.msra.mxu0 %v6022_v24  ;;  %v1578_v24 = vrot.slane %v6729_v31, 5  ;;  %v1350_v31 = vrot.slane %v1349_v42, 4  ;;  %v1382_v25 = vrot.slane %v1380_v36, 5  ;;  %v4890_v7 = vcombine.low %v1313_v2, %v1327_v58  ;;  %v6835_v2 = vld [vmem:[#allocation2 + $0x2c] sm:$0x1] }
  0xd7   : >> { %5557 = vmatpush3.bf16.msra.mxu1 %v6023_v34  ;;  %5534 = vmatprep.subr.bf16.mxu0 %v6024_v39  ;;  %v1373_v34 = vrot.slane %v1371_v28, 4  ;;  %v1341_v63 = vsel %vm6595_vm9, %v1336_v37, %v1340_v33  ;;  %v1595_v23 = vsel %vm6674_vm12, %v4908_v53, %v1594_v11  ;;  %v1942_v28 = vshrl.u32 %v1925_v20, 16  ;;  %v1929_v37 = vld [vmem:[#allocation2 + $0x20] sm:$0xf]  ;;  %v6042_v11 = vld [vmem:[%s6599_s28 + $0x190] sm:$0xff]   ;;  %v6044_v20 = vld [vmem:[%s6599_s28 + $0x188] sm:$0xff]  }
  0xd8   : >> { %5558 = vmatprep.subr.bf16.mxu1 %v6025_v45  ;;  %v1579_v51 = vsel %vm6674_vm12, %v4904_v5, %v1578_v24  ;;  %v1355_v44 = vsel %vm6595_vm9, %v1350_v31, %v1354_v38  ;;  %v6035_v5 = vld [vmem:[%s6599_s28 + $0x1f0] sm:$0xff]   ;;  %v1965_v42 = vshll.u32 %v6823_v27, 16  ;;  %v1947_v33 = vrot.slane %v1945_v29, 5  ;;  %v6038_v38 = vld [vmem:[%s6599_s28 + $0x1a0] sm:$0xff]  }
  0xd9   : >> { %v1377_v48 = vor.u32 %v1376_v35, %v1373_v34  ;;  %v4927_v47 = vcombine.low %v1575_v61, %v1579_v51  ;;  %v4891_v15 = vcombine.low %v1341_v63, %v1355_v44  ;;  %v6039_v31 = vld [vmem:[%s6599_s28 + $0x1e0] sm:$0xff]   ;;  %v1933_v63 = vld [vmem:[#allocation2 + $0x30] sm:$0xf]  ;;  %v6843_v44 = vld [vmem:[#allocation2 + $0x34] sm:$0x1] }
  0xda   : >> { %5535 = vmatpush3.bf16.msra.mxu0 %v6024_v39  ;;  %v1363_v39 = vor.u32 %v1362_v8, %v1359_v26  ;;  %v1927_v26 = vld [vmem:[#allocation2 + $0x18] sm:$0xf] }
  0xdb   : >> { %5559 = vmatpush3.bf16.msra.mxu1 %v6025_v45  ;;  %5536 = vmatprep.subr.bf16.mxu0 %v6026_v52  ;;  %v6031_v45 = vld [vmem:[%s6599_s28 + $0x140] sm:$0xff]   ;;  %v1378_v12 = vrot.slane %v1377_v48, 4  ;;  %v1956_v32 = vshrl.u32 %v1927_v26, 16  ;;  %v1959_v24 = vshll.u32 %v1927_v26, 16  ;;  %v1967_v48 = vrot.slane %v1965_v42, 5 }
  0xdc   : >> { %5560 = vmatprep.subr.bf16.mxu1 %v6027_v59  ;;  %v1364_v4 = vrot.slane %v1363_v39, 4  ;;  %v6048_v39 = vld [vmem:[#allocation2 + $0x10] ss:$8 sps:$4 sm:$0xff]   ;;  %v2007_v26 = vshll.u32 %v6843_v44, 16 }
  0xdd   : >> { %v1383_v19 = vsel %vm6595_vm9, %v1378_v12, %v1382_v25  ;;  %v1958_v35 = vrot.slane %v1956_v32, 4  ;;  %v1961_v36 = vrot.slane %v1959_v24, 5  ;;  %v6040_v25 = vld [vmem:[%s6599_s28 + $0x198] sm:$0xff]   ;;  %v1939_v24 = vld [vmem:[#allocation2 + $0x48] sm:$0xf] }
  0xde   : >> { %5537 = vmatpush3.bf16.msra.mxu0 %v6026_v52  ;;  %v4905_v52 = vrot.slane %v1544_v40, 9  ;;  %v1369_v18 = vsel %vm6595_vm9, %v1364_v4, %v6775_v46  ;;  %v6831_v4 = vld [vmem:[#allocation2 + $0x24] sm:$0x1] }
  0xdf   : >> { %5561 = vmatpush3.bf16.msra.mxu1 %v6027_v59  ;;  %5538 = vmatprep.subr.bf16.mxu0 %v6028_v16  ;;  %v4907_v59 = vrot.slane %v1546_v50, 9  ;;  %v4892_v8 = vcombine.low %v1369_v18, %v1383_v19  ;;  %v1962_v46 = vor.u32 %v1961_v36, %v1958_v35  ;;  %v1973_v50 = vshll.u32 %v1929_v37, 16  ;;  %v6046_v36 = vld [vmem:[%s6599_s28 + $0x180] sm:$0xff]  }
  0xe0   : >> { %5562 = vmatprep.subr.bf16.mxu1 %v6029_v41  ;;  %v1583_v30 = vsel %vm6674_vm12, %v4905_v52, %v1582_v49  ;;  %v1970_v49 = vshrl.u32 %v1929_v37, 16  ;;  %v1979_v53 = vshll.u32 %v6831_v4, 16 }
  0xe1   : >> { %v4928_v17 = vcombine.low %v1583_v30, %v1587_v55  ;;  %v1591_v22 = vsel %vm6674_vm12, %v4907_v59, %v1590_v13  ;;  %v1935_v55 = vld [vmem:[#allocation2 + $0x38] sm:$0xf] }
  0xe2   : >> { %5539 = vmatpush3.bf16.msra.mxu0 %v6028_v16  ;;  %v6036_v16 = vld [vmem:[%s6599_s28 + $0x1a8] sm:$0xff]   ;;  %v4929_v34 = vcombine.low %v1591_v22, %v1595_v23  ;;  %v1972_v58 = vrot.slane %v1970_v49, 4  ;;  %v2012_v18 = vshrl.u32 %v1935_v55, 16  ;;  %v2015_v19 = vshll.u32 %v1935_v55, 16 }
  0xe3   : >> { %5563 = vmatpush3.bf16.msra.mxu1 %v6029_v41  ;;  %5540 = vmatprep.subr.bf16.mxu0 %v6030_v9  ;;  %v1951_v41 = vshll.u32 %v6817_v21, 16 }
  0xe4   : >> { %5564 = vmatprep.subr.bf16.mxu1 %v6031_v45  ;;  %v2017_v32 = vrot.slane %v2015_v19, 5 }
  0xe5   : >> { %v1953_v43 = vrot.slane %v1951_v41, 5  ;;  %v2014_v41 = vrot.slane %v2012_v18, 4 }
  0xe6   : >> { %5541 = vmatpush3.bf16.msra.mxu0 %v6030_v9  ;;  %v1944_v9 = vrot.slane %v1942_v28, 4 }
  0xe7   : >> { %5565 = vmatpush3.bf16.msra.mxu1 %v6031_v45  ;;  %5574 = vmatprep.subr.bf16.mxu0 %v6032_v3  ;;  %v1931_v45 = vld [vmem:[#allocation2 + $0x28] sm:$0xf]  ;;  %v2018_v37 = vor.u32 %v2017_v32, %v2014_v41 }
  0xe8   : >> { %5598 = vmatprep.subr.bf16.mxu1 %v6033_v6  ;;  %v1948_v40 = vor.u32 %v1947_v33, %v1944_v9  ;;  %v1984_v57 = vshrl.u32 %v1931_v45, 16  ;;  %v1987_v60 = vshll.u32 %v1931_v45, 16  ;;  %v2009_v45 = vrot.slane %v2007_v26, 5  ;;  %v6054_v41 = vld [vmem:[%s6599_s28 + $0x228] sm:$0xff]  }
  0xe9   : >> { %5543 = vmatmul.mubr.bf16.vlgmr.msra.gmra.mxu0 %v4890_v7  ;;  %v6043_v7 = vld [vmem:[%s6599_s28 + $0x1d0] sm:$0xff]   ;;  %v2251_v26 = vrot.slane %v6843_v44, 5 }
  0xea   : >> { %5567 = vmatmul.mubr.bf16.vlgmr.msra.gmra.mxu1 %v4927_v47  ;;  %5575 = vmatpush3.bf16.msra.mxu0 %v6032_v3  ;;  %v1949_v52 = vrot.slane %v1948_v40, 4  ;;  %v1963_v3 = vrot.slane %v1962_v46, 4  ;;  %v1986_v13 = vrot.slane %v1984_v57, 4  ;;  %v1989_v61 = vrot.slane %v1987_v60, 5  ;;  %v6855_v46 = vld [vmem:[#allocation2 + $0x4c] sm:$0x1] }
  0xeb   : >> { %5599 = vmatpush3.bf16.msra.mxu1 %v6033_v6  ;;  %5576 = vmatprep.subr.bf16.mxu0 %v6034_v14  ;;  %v1975_v6 = vrot.slane %v1973_v50, 5  ;;  %v2043_v40 = vshll.u32 %v1939_v24, 16  ;;  %v2019_v57 = vrot.slane %v2018_v37, 4  ;;  %v6058_v37 = vld [vmem:[%s6599_s28 + $0x208] sm:$0xff]  }
  0xec   : >> { %5600 = vmatprep.subr.bf16.mxu1 %v6035_v5  ;;  %5546 = vmatprep.mubr.bf16.mxu0 %v4891_v15  ;;  %v1954_v59 = vsel %vm6595_vm9, %v1949_v52, %v1953_v43  ;;  %v1968_v12 = vsel %vm6595_vm9, %v1963_v3, %v1967_v48  ;;  %v1990_v30 = vor.u32 %v1989_v61, %v1986_v13  ;;  %v1998_v15 = vshrl.u32 %v1933_v63, 16  ;;  %v6047_v43 = vld [vmem:[%s6599_s28 + $0x1c0] sm:$0xff]   ;;  %v6051_v61 = vld [vmem:[%s6599_s28 + $0x230] sm:$0xff]  }
  0xed   : >> { %5570 = vmatprep.mubr.bf16.mxu1 %v4928_v17  ;;  %v4984_v51 = vcombine.low %v1954_v59, %v1968_v12  ;;  %v1976_v47 = vor.u32 %v1975_v6, %v1972_v58  ;;  %v1981_v17 = vrot.slane %v1979_v53, 5  ;;  %v2049_v3 = vshll.u32 %v6855_v46, 16  ;;  %v6050_v58 = vld [vmem:[%s6599_s28 + $0x238] sm:$0xff]   ;;  %v6049_v13 = vld [vmem:[#allocation2 + $0x20] ss:$8 sps:$4 sm:$0xff]  }
  0xee   : >> { %5577 = vmatpush3.bf16.msra.mxu0 %v6034_v14  ;;  %v1993_v14 = vshll.u32 %v6835_v2, 16  ;;  %v2000_v22 = vrot.slane %v1998_v15, 4  ;;  %v1991_v33 = vrot.slane %v1990_v30, 4  ;;  %v2213_v15 = vld [vmem:[#allocation2 + $0x30] sm:$0xe] }
  0xef   : >> { %5601 = vmatpush3.bf16.msra.mxu1 %v6035_v5  ;;  %5578 = vmatprep.subr.bf16.mxu0 %v6036_v16  ;;  %v6845_v5 = vld [vmem:[#allocation2 + $0x3c] sm:$0x1]  ;;  %v1977_v9 = vrot.slane %v1976_v47, 4  ;;  %v2210_v47 = vld [vmem:[#allocation2 + $0x18] sm:$0xe] }
  0xf0   : >> { %5602 = vmatprep.subr.bf16.mxu1 %v6037_v0  ;;  %v2021_v28 = vshll.u32 %v6845_v5, 16  ;;  %v1995_v29 = vrot.slane %v1993_v14, 5  ;;  %v2051_v14 = vrot.slane %v2049_v3, 5 }
  0xf1   : >> { %5547 = vmatmul.mubr.bf16.gmra.mxu0 %v4892_v8  ;;  %v6045_v8 = vld [vmem:[%s6599_s28 + $0x1c8] sm:$0xff]   ;;  %v1982_v60 = vsel %vm6595_vm9, %v1977_v9, %v1981_v17  ;;  %v6052_v17 = vld [vmem:[#allocation2 + $0x30] ss:$8 sps:$4 sm:$0xff]   ;;  %v6055_v9 = vld [vmem:[%s6599_s28 + $0x220] sm:$0xff]  }
  0xf2   : >> { %5579 = vmatpush3.bf16.msra.mxu0 %v6036_v16  ;;  %5571 = vmatmul.mubr.bf16.gmra.mxu1 %v4929_v34  ;;  %v2001_v16 = vshll.u32 %v1933_v63, 16  ;;  %v1996_v59 = vsel %vm6595_vm9, %v1991_v33, %v1995_v29  ;;  %v2209_v63 = vld [vmem:[#allocation2 + $0x10] sm:$0xe]  ;;  %v2255_v29 = vrot.slane %v6845_v5, 5 }
  0xf3   : >> { %5603 = vmatpush3.bf16.msra.mxu1 %v6037_v0  ;;  %5580 = vmatprep.subr.bf16.mxu0 %v6038_v38  ;;  %v1937_v0 = vld [vmem:[#allocation2 + $0x40] sm:$0xf]  ;;  %v4996_v19 = vrot.slane %v2209_v63, 9 }
  0xf4   : >> { %5604 = vmatprep.subr.bf16.mxu1 %v6039_v31  ;;  %5590 = vmatprep.mubr.bf16.mxu0 %v6048_v39  ;;  %v2003_v23 = vrot.slane %v2001_v16, 5  ;;  %v2026_v42 = vshrl.u32 %v1937_v0, 16  ;;  %v2029_v35 = vshll.u32 %v1937_v0, 16  ;;  %v2040_v39 = vshrl.u32 %v1939_v24, 16  ;;  %v2214_v16 = vld [vmem:[#allocation2 + $0x38] sm:$0xe] }
  0xf5   : >> { %5614 = vmatprep.mubr.bf16.mxu1 %v4984_v51  ;;  %v2235_v0 = vrot.slane %v6817_v21, 5 }
  0xf6   : >> { %5581 = vmatpush3.bf16.msra.mxu0 %v6038_v38  ;;  %v2004_v34 = vor.u32 %v2003_v23, %v2000_v22  ;;  %v6852_v38 = vld [vmem:[#allocation2 + $0x44] sm:$0x1]  ;;  %v2028_v48 = vrot.slane %v2026_v42, 4  ;;  %v2031_v49 = vrot.slane %v2029_v35, 5  ;;  %v2042_v50 = vrot.slane %v2040_v39, 4  ;;  %v6056_v35 = vld [vmem:[%s6599_s28 + $0x218] sm:$0xff]  }
  0xf7   : >> { %5605 = vmatpush3.bf16.msra.mxu1 %v6039_v31  ;;  %5582 = vmatprep.subr.bf16.mxu0 %v6040_v25  ;;  %v2023_v31 = vrot.slane %v2021_v28, 5  ;;  %v2239_v22 = vrot.slane %v6823_v27, 5  ;;  %v5000_v23 = vrot.slane %v2213_v15, 9  ;;  %v5001_v28 = vrot.slane %v2214_v16, 9  ;;  %v6053_v27 = vld [vmem:[#allocation2 + $0x40] ss:$8 sps:$4 sm:$0xff]  }
  0xf8   : >> { %5606 = vmatprep.subr.bf16.mxu1 %v6041_v62  ;;  %v2005_v52 = vrot.slane %v2004_v34, 4  ;;  %v2032_v6 = vor.u32 %v2031_v49, %v2028_v48  ;;  %v2236_v44 = vsel %vm6674_vm12, %v4996_v19, %v2235_v0  ;;  %v2211_v39 = vld [vmem:[#allocation2 + $0x20] sm:$0xe]  ;;  %v2243_v48 = vrot.slane %v6831_v4, 5 }
  0xf9   : >> { %v2024_v53 = vsel %vm6595_vm9, %v2019_v57, %v2023_v31  ;;  %v2252_v42 = vsel %vm6674_vm12, %v5000_v23, %v2251_v26  ;;  %v4998_v31 = vrot.slane %v2211_v39, 9  ;;  %v6059_v57 = vld [vmem:[%s6599_s28 + $0x200] sm:$0xff]  }
  0xfa   : >> { %5583 = vmatpush3.bf16.msra.mxu0 %v6040_v25  ;;  %v2045_v25 = vrot.slane %v2043_v40, 5  ;;  %v2010_v51 = vsel %vm6595_vm9, %v2005_v52, %v2009_v45  ;;  %v2033_v30 = vrot.slane %v2032_v6, 4  ;;  %v2212_v40 = vld [vmem:[#allocation2 + $0x28] sm:$0xe]  ;;  %v2263_v52 = vrot.slane %v6855_v46, 5 }
  0xfb   : >> { %5607 = vmatpush3.bf16.msra.mxu1 %v6041_v62  ;;  %5584 = vmatprep.subr.bf16.mxu0 %v6042_v11  ;;  %v2035_v62 = vshll.u32 %v6852_v38, 16  ;;  %v4986_v18 = vcombine.low %v2010_v51, %v2024_v53  ;;  %v2216_v45 = vld [vmem:[#allocation2 + $0x48] sm:$0xe]  ;;  %v4999_v49 = vrot.slane %v2212_v40, 9  ;;  %v2244_v3 = vsel %vm6674_vm12, %v4998_v31, %v2243_v48 }
  0xfc   : >> { %5608 = vmatprep.subr.bf16.mxu1 %v6043_v7  ;;  %v2046_v12 = vor.u32 %v2045_v25, %v2042_v50  ;;  %v2247_v50 = vrot.slane %v6835_v2, 5  ;;  %v2259_v25 = vrot.slane %v6852_v38, 5 }
  0xfe   : >> { %5585 = vmatpush3.bf16.msra.mxu0 %v6042_v11  ;;  %v4985_v11 = vcombine.low %v1982_v60, %v1996_v59  ;;  %v2047_v55 = vrot.slane %v2046_v12, 4  ;;  %v2248_v4 = vsel %vm6674_vm12, %v4999_v49, %v2247_v50 }
  0xff   : >> { %5609 = vmatpush3.bf16.msra.mxu1 %v6043_v7  ;;  %5586 = vmatprep.subr.bf16.mxu0 %v6044_v20  ;;  %v2037_v7 = vrot.slane %v2035_v62, 5  ;;  %v5003_v62 = vrot.slane %v2216_v45, 9  ;;  %v5022_v46 = vcombine.low %v2244_v3, %v2248_v4 }
 0x100   : >> { %5610 = vmatprep.subr.bf16.mxu1 %v6045_v8  ;;  %v2052_v21 = vsel %vm6595_vm9, %v2047_v55, %v2051_v14 }
 0x101   : >> { %v2038_v32 = vsel %vm6595_vm9, %v2033_v30, %v2037_v7  ;;  %v2264_v38 = vsel %vm6674_vm12, %v5003_v62, %v2263_v52 }
 0x102   : >> { %5587 = vmatpush3.bf16.msra.mxu0 %v6044_v20  ;;  %v4997_v20 = vrot.slane %v2210_v47, 9  ;;  %v4987_v24 = vcombine.low %v2038_v32, %v2052_v21 }
 0x103   : >> { %5611 = vmatpush3.bf16.msra.mxu1 %v6045_v8  ;;  %5588 = vmatprep.subr.bf16.mxu0 %v6046_v36  ;;  %v2256_v8 = vsel %vm6674_vm12, %v5001_v28, %v2255_v29 }
 0x104   : >> { %5612 = vmatprep.subr.bf16.mxu1 %v6047_v43  ;;  %v2240_v5 = vsel %vm6674_vm12, %v4997_v20, %v2239_v22  ;;  %v5023_v34 = vcombine.low %v2252_v42, %v2256_v8 }
 0x105   : >> { %v5021_v33 = vcombine.low %v2236_v44, %v2240_v5 }
 0x106   : >> { %5589 = vmatpush3.bf16.msra.mxu0 %v6046_v36  ;;  %v6057_v36 = vld [vmem:[%s6599_s28 + $0x210] sm:$0xff]  }
 0x107   : >> { %5613 = vmatpush3.bf16.msra.mxu1 %v6047_v43  ;;  %5622 = vmatprep.subr.bf16.mxu0 %v6050_v58  ;;  %v2215_v43 = vld [vmem:[#allocation2 + $0x40] sm:$0xe] }
 0x108   : >> { %5862 = vmatprep.subr.bf16.mxu1 %v6050_v58  ;;  %v5002_v60 = vrot.slane %v2215_v43, 9 }
 0x109   : >> { %5591 = vmatmul.mubr.bf16.vlgmr.msra.gmra.mxu0 %v6049_v13 }
 0x10a   : >> { %5615 = vmatmul.mubr.bf16.vlgmr.msra.gmra.mxu1 %v4985_v11  ;;  %5623 = vmatpush3.bf16.msra.mxu0 %v6050_v58  ;;  %v2260_v2 = vsel %vm6674_vm12, %v5002_v60, %v2259_v25 }
 0x10b   : >> { %5870 = vmatpush3.bf16.msra.mxu1 %v6050_v58  ;;  %5624 = vmatprep.subr.bf16.mxu0 %v6051_v61  ;;  %v5024_v59 = vcombine.low %v2260_v2, %v2264_v38 }
 0x10c   : >> { %5863 = vmatprep.subr.bf16.mxu1 %v6051_v61  ;;  %5594 = vmatprep.mubr.bf16.mxu0 %v6052_v17 }
 0x10d   : >> { %5618 = vmatprep.mubr.bf16.mxu1 %v4986_v18 }
 0x10e   : >> { %5625 = vmatpush3.bf16.msra.mxu0 %v6051_v61 }
 0x10f   : >> { %5871 = vmatpush3.bf16.msra.mxu1 %v6051_v61  ;;  %5626 = vmatprep.subr.bf16.mxu0 %v6054_v41 }
 0x110   : >> { %5864 = vmatprep.subr.bf16.mxu1 %v6054_v41 }
 0x111   : >> { %5595 = vmatmul.mubr.bf16.gmra.mxu0 %v6053_v27 }
 0x112   : >> { %5627 = vmatpush3.bf16.msra.mxu0 %v6054_v41  ;;  %5619 = vmatmul.mubr.bf16.gmra.mxu1 %v4987_v24 }
 0x113   : >> { %5872 = vmatpush3.bf16.msra.mxu1 %v6054_v41  ;;  %5628 = vmatprep.subr.bf16.mxu0 %v6055_v9 }
 0x114   : >> { %5865 = vmatprep.subr.bf16.mxu1 %v6055_v9  ;;  %5638 = vmatprep.mubr.bf16.mxu0 %v5021_v33 }
 0x115   : >> { %5642 = vmatprep.mubr.bf16.mxu1 %v5023_v34 }
 0x116   : >> { %5629 = vmatpush3.bf16.msra.mxu0 %v6055_v9 }
 0x117   : >> { %5873 = vmatpush3.bf16.msra.mxu1 %v6055_v9  ;;  %5630 = vmatprep.subr.bf16.mxu0 %v6056_v35 }
 0x118   : >> { %5866 = vmatprep.subr.bf16.mxu1 %v6056_v35 }
 0x11a   : >> { %5631 = vmatpush3.bf16.msra.mxu0 %v6056_v35 }
 0x11b   : >> { %5874 = vmatpush3.bf16.msra.mxu1 %v6056_v35  ;;  %5632 = vmatprep.subr.bf16.mxu0 %v6057_v36 }
 0x11c   : >> { %5867 = vmatprep.subr.bf16.mxu1 %v6057_v36 }
 0x11e   : >> { %5633 = vmatpush3.bf16.msra.mxu0 %v6057_v36 }
 0x11f   : >> { %5875 = vmatpush3.bf16.msra.mxu1 %v6057_v36  ;;  %5634 = vmatprep.subr.bf16.mxu0 %v6058_v37 }
 0x120   : >> { %5868 = vmatprep.subr.bf16.mxu1 %v6058_v37 }
 0x122   : >> { %5635 = vmatpush3.bf16.msra.mxu0 %v6058_v37 }
 0x123   : >> { %5876 = vmatpush3.bf16.msra.mxu1 %v6058_v37  ;;  %5636 = vmatprep.subr.bf16.mxu0 %v6059_v57 }
 0x124   : >> { %5869 = vmatprep.subr.bf16.mxu1 %v6059_v57 }
 0x126   : >> { %5637 = vmatpush3.bf16.msra.mxu0 %v6059_v57 }
 0x127   : >> { %5877 = vmatpush3.bf16.msra.mxu1 %v6059_v57 }
 0x129   : >> { %5639 = vmatmul.mubr.bf16.vlgmr.msra.gmra.mxu0 %v5022_v46 }
 0x12a   : >> { %5643 = vmatmul.mubr.bf16.vlgmr.msra.gmra.mxu1 %v5024_v59 }
 0x169   : >> { %v5448_v58 = vpop.f32.mrf.mxu0 }
 0x16a   : >> { %v5472_v12 = vpop.f32.mrf.mxu1 }
 0x16b   : >> { %v701_v6 = vpop.f32.mrf.mxu0  ;;  %v847_v62 = vadd.f32 %v5472_v12, %v5448_v58 }
 0x16c   : >> { %v838_v61 = vpop.f32.mrf.mxu1 }
 0x16d   : >> { %v5449_v13 = vpop.f32.mrf.mxu0  ;;  %v839_v38 = vadd.f32 %v838_v61, %v701_v6 }
 0x16e   : >> { %v5473_v11 = vpop.f32.mrf.mxu1 }
 0x16f   : >> { %v704_v51 = vpop.f32.mrf.mxu0  ;;  %v850_v10 = vadd.f32 %v5473_v11, %v5449_v13 }
 0x170   : >> { %v841_v14 = vpop.f32.mrf.mxu1 }
 0x171   : >> { %v5452_v53 = vpop.f32.mrf.mxu0  ;;  %v842_v58 = vadd.f32 %v841_v14, %v704_v51 }
 0x172   : >> { %v5476_v63 = vpop.f32.mrf.mxu1 }
 0x173   : >> { %v717_v7 = vpop.f32.mrf.mxu0  ;;  %v863_v4 = vadd.f32 %v5476_v63, %v5452_v53 }
 0x174   : >> { %v854_v30 = vpop.f32.mrf.mxu1 }
 0x175   : >> { %v5453_v47 = vpop.f32.mrf.mxu0  ;;  %v855_v59 = vadd.f32 %v854_v30, %v717_v7 }
 0x176   : >> { %v5477_v16 = vpop.f32.mrf.mxu1 }
 0x177   : >> { %v720_v55 = vpop.f32.mrf.mxu0 }
 0x178   : >> { %v857_v18 = vpop.f32.mrf.mxu1 }
 0x179   : >> { %v858_v6 = vadd.f32 %v857_v18, %v720_v55 }
 0x189   : >> { %v5496_v15 = vpop.f32.mrf.mxu0 }
 0x18a   : >> { %v5520_v19 = vpop.f32.mrf.mxu1  ;;  %v1078_v46 = vadd.f32 %v5496_v15, %v847_v62 }
 0x18b   : >> { %v1045_v17 = vpop.f32.mrf.mxu0 }
 0x18c   : >> { %v1217_v20 = vpop.f32.mrf.mxu1  ;;  %v1076_v1 = vadd.f32 %v1045_v17, %v839_v38 }
 0x18d   : >> { %v5497_v0 = vpop.f32.mrf.mxu0 }
 0x18e   : >> { %v5521_v23 = vpop.f32.mrf.mxu1  ;;  %v1079_v53 = vadd.f32 %v5497_v0, %v850_v10  ;;  %v1248_v62 = vadd.f32 %v1217_v20, %v1076_v1 }
 0x18f   : >> { %v1048_v22 = vpop.f32.mrf.mxu0 }
 0x190   : >> { %v1220_v28 = vpop.f32.mrf.mxu1  ;;  %v1077_v7 = vadd.f32 %v1048_v22, %v842_v58  ;;  %v1251_v17 = vadd.f32 %v5521_v23, %v1079_v53 }
 0x191   : >> { %v5500_v26 = vpop.f32.mrf.mxu0 }
 0x192   : >> { %v5524_v41 = vpop.f32.mrf.mxu1  ;;  %v1082_v56 = vadd.f32 %v5500_v26, %v863_v4 }
 0x193   : >> { %v1061_v29 = vpop.f32.mrf.mxu0 }
 0x194   : >> { %v1233_v21 = vpop.f32.mrf.mxu1  ;;  %v1254_v61 = vadd.f32 %v5524_v41, %v1082_v56 }
 0x195   : >> { %v5501_v32 = vpop.f32.mrf.mxu0 }
 0x196   : >> { %v5525_v44 = vpop.f32.mrf.mxu1 }
 0x197   : >> { %v1064_v27 = vpop.f32.mrf.mxu0 }
 0x198   : >> { %v1236_v24 = vpop.f32.mrf.mxu1  ;;  %v1081_v26 = vadd.f32 %v1064_v27, %v858_v6 }
 0x19a   : >> { %v1253_v10 = vadd.f32 %v1236_v24, %v1081_v26 }
 0x1a9   : >> { %v5544_v5 = vpop.f32.mrf.mxu0 }
 0x1aa   : >> { %v5568_v8 = vpop.f32.mrf.mxu1 }
 0x1ab   : >> { %v1501_v42 = vpop.f32.mrf.mxu0 }
 0x1ac   : >> { %v1713_v33 = vpop.f32.mrf.mxu1  ;;  %v1532_v38 = vadd.f32 %v1501_v42, %v1248_v62 }
 0x1ad   : >> { %v5545_v9 = vpop.f32.mrf.mxu0 }
 0x1ae   : >> { %v5569_v35 = vpop.f32.mrf.mxu1  ;;  %v1535_v14 = vadd.f32 %v5545_v9, %v1251_v17  ;;  %v1744_v18 = vadd.f32 %v1713_v33, %v1532_v38 }
 0x1af   : >> { %v1504_v34 = vpop.f32.mrf.mxu0 }
 0x1b0   : >> { %v6903_v37 = vpop.f32.mrf.mxu1  ;;  %v1747_v23 = vadd.f32 %v5569_v35, %v1535_v14 }
 0x1b1   : >> { %v5548_v36 = vpop.f32.mrf.mxu0  ;;  %7257 = vst [vmem:[#allocation17_spill] sm:$0xff] %v6903_v37  ;;  %v866_v37 = vadd.f32 %v5477_v16, %v5453_v47 }
 0x1b2   : >> { %v5572_v39 = vpop.f32.mrf.mxu1  ;;  %v1538_v11 = vadd.f32 %v5548_v36, %v1254_v61 }
 0x1b3   : >> { %v1517_v40 = vpop.f32.mrf.mxu0  ;;  %v1083_v15 = vadd.f32 %v5501_v32, %v866_v37 }
 0x1b4   : >> { %v1729_v43 = vpop.f32.mrf.mxu1 }
 0x1b5   : >> { %v5549_v45 = vpop.f32.mrf.mxu0  ;;  %v1255_v47 = vadd.f32 %v5525_v44, %v1083_v15 }
 0x1b6   : >> { %v5573_v31 = vpop.f32.mrf.mxu1 }
 0x1b7   : >> { %v1520_v48 = vpop.f32.mrf.mxu0  ;;  %v1539_v55 = vadd.f32 %v5549_v45, %v1255_v47 }
 0x1b8   : >> { %v1732_v50 = vpop.f32.mrf.mxu1  ;;  %v1537_v41 = vadd.f32 %v1520_v48, %v1253_v10 }
 0x1b9   : >> { %v1751_v27 = vadd.f32 %v5573_v31, %v1539_v55 }
 0x1ba   : >> { %v1749_v36 = vadd.f32 %v1732_v50, %v1537_v41 }
 0x1c9   : >> { %v5592_v49 = vpop.f32.mrf.mxu0 }
 0x1ca   : >> { %v5616_v25 = vpop.f32.mrf.mxu1 }
 0x1cb   : >> { %v1886_v52 = vpop.f32.mrf.mxu0 }
 0x1cc   : >> { %v6905_v57 = vpop.f32.mrf.mxu1 }
 0x1cd   : >> { %7258 = vst [vmem:[#allocation18_spill] sm:$0xff] %v6905_v57  ;;  %v5593_v60 = vpop.f32.mrf.mxu0  ;;  %v1080_v57 = vadd.f32 %v1061_v29, %v855_v59  ;;  %v1249_v29 = vadd.f32 %v1220_v28, %v1077_v7  ;;  %v7261_v28 = vld [vmem:[#allocation17_spill] sm:$0xff] }
 0x1ce   : >> { %v6907_v3 = vpop.f32.mrf.mxu1  ;;  %v1920_v24 = vadd.f32 %v5593_v60, %v1747_v23 }
 0x1cf   : >> { %7259 = vst [vmem:[#allocation19_spill] sm:$0xff] %v6907_v3  ;;  %v1889_v2 = vpop.f32.mrf.mxu0  ;;  %v1250_v3 = vadd.f32 %v5520_v19, %v1078_v46  ;;  %v1252_v4 = vadd.f32 %v1233_v21, %v1080_v57  ;;  %v1750_v19 = vadd.f32 %v5572_v39, %v1538_v11  ;;  %v1533_v1 = vadd.f32 %v1504_v34, %v1249_v29  ;;  %v6913_v39 = vld [vmem:[%s2421_s29] ss:$0 sm:$0xff] }
 0x1d0   : >> { %v6909_v54 = vpop.f32.mrf.mxu1  ;;  %v1917_v21 = vadd.f32 %v1886_v52, %v1744_v18  ;;  %v2568_v18 = vld [vmem:[#allocation2 + $0x18] sm:$0xf] }
 0x1d1   : >> { %7260 = vst [vmem:[#allocation20_spill] sm:$0xff] %v6909_v54  ;;  %v5596_v12 = vpop.f32.mrf.mxu0  ;;  %v1534_v30 = vadd.f32 %v5544_v5, %v1250_v3  ;;  %v1536_v16 = vadd.f32 %v1517_v40, %v1252_v4  ;;  %v1745_v42 = vadd.f32 %v7261_v28, %v1533_v1 }
 0x1d2   : >> { %v5620_v63 = vpop.f32.mrf.mxu1  ;;  %v1923_v32 = vadd.f32 %v5596_v12, %v1750_v19 }
 0x1d3   : >> { %v1902_v13 = vpop.f32.mrf.mxu0  ;;  %v1746_v51 = vadd.f32 %v5568_v8, %v1534_v30  ;;  %v1748_v22 = vadd.f32 %v1729_v43, %v1536_v16  ;;  %v1918_v45 = vadd.f32 %v1889_v2, %v1745_v42 }
 0x1d4   : >> { %v2186_v54 = vpop.f32.mrf.mxu1  ;;  %v2207_v37 = vadd.f32 %v5620_v63, %v1923_v32  ;;  %v7262_v40 = vld [vmem:[#allocation18_spill] sm:$0xff]  ;;  %v2571_v32 = vld [vmem:[#allocation2 + $0x1c] sm:$0x1] }
 0x1d5   : >> { %v5597_v56 = vpop.f32.mrf.mxu0  ;;  %v1919_v0 = vadd.f32 %v5592_v49, %v1746_v51  ;;  %v1921_v44 = vadd.f32 %v1902_v13, %v1748_v22  ;;  %v2201_v43 = vadd.f32 %v7262_v40, %v1917_v21 }
 0x1d6   : >> { %v5621_v20 = vpop.f32.mrf.mxu1  ;;  %v1924_v33 = vadd.f32 %v5597_v56, %v1751_v27  ;;  %v7263_v3 = vld [vmem:[#allocation19_spill] sm:$0xff] }
 0x1d7   : >> { %v1905_v5 = vpop.f32.mrf.mxu0  ;;  %v2203_v8 = vadd.f32 %v5616_v25, %v1919_v0  ;;  %v2205_v31 = vadd.f32 %v2186_v54, %v1921_v44  ;;  %v2204_v25 = vadd.f32 %v7263_v3, %v1920_v24 }
 0x1d8   : >> { %v2189_v9 = vpop.f32.mrf.mxu1  ;;  %v1922_v49 = vadd.f32 %v1905_v5, %v1749_v36  ;;  %v2208_v59 = vadd.f32 %v5621_v20, %v1924_v33  ;;  %v7264_v63 = vld [vmem:[#allocation20_spill] sm:$0xff]  ;;  %v2595_v36 = vld [vmem:[#allocation2 + $0x3c] sm:$0x1] }
 0x1d9   : >> { %v2202_v6 = vadd.f32 %v7264_v63, %v1918_v45  ;;  %v2592_v5 = vld [vmem:[#allocation2 + $0x38] sm:$0xf] }
 0x1da   : >> { %v2206_v62 = vadd.f32 %v2189_v9, %v1922_v49  ;;  %v6070_v49 = vld [vmem:[#allocation6 + $0x18d8] sm:$0xff] (%p430_p10)  }
 0x1e9   : >> { %v5640_v34 = vpop.f32.mrf.mxu0 }
 0x1ea   : >> { %v2415_v35 = vadd.f32 %v5640_v34, %v2203_v8  ;;  %v5644_v48 = vpop.f32.mrf.mxu1 }
 0x1eb   : >> { %v2419_v52 = vadd.f32 %v5644_v48, %v2207_v37  ;;  %v2382_v57 = vpop.f32.mrf.mxu0  ;;  %v6069_v48 = vld [vmem:[#allocation6 + $0x1918] sm:$0xff] (%p430_p10)  }
 0x1ec   : >> { %v2431_v60 = vadd.f32 %v6913_v39, %v2415_v35  ;;  %v2413_v50 = vadd.f32 %v2382_v57, %v2201_v43  ;;  %v2398_v46 = vpop.f32.mrf.mxu1  ;;  %v2559_v43 = vld [vmem:[#allocation2 + $0xc] sm:$0x1] }
 0x1ed   : >> { %v2435_v12 = vadd.f32 %v6913_v39, %v2419_v52  ;;  %v2417_v58 = vadd.f32 %v2398_v46, %v2205_v31  ;;  %v5641_v53 = vpop.f32.mrf.mxu0 }
 0x1ee   : >> { %v2439_v2 = vmax.f32 %v2431_v60, 0.0  ;;  %v2429_v61 = vadd.f32 %v6913_v39, %v2413_v50  ;;  %v2416_v54 = vadd.f32 %v5641_v53, %v2204_v25  ;;  %v5645_v15 = vpop.f32.mrf.mxu1  ;;  %v2580_v25 = vld [vmem:[#allocation2 + $0x28] sm:$0xf]  ;;  %v2583_v60 = vld [vmem:[#allocation2 + $0x2c] sm:$0x1] }
 0x1ef   : >> { %v2443_v7 = vmax.f32 %v2435_v12, 0.0  ;;  %v2433_v30 = vadd.f32 %v6913_v39, %v2417_v58  ;;  %v2420_v4 = vadd.f32 %v5645_v15, %v2208_v59  ;;  %v2385_v26 = vpop.f32.mrf.mxu0  ;;  %v6060_v58 = vld [vmem:[#allocation2 + $0x8] sm:$0xf]  ;;  %v2574_v15 = vld [vmem:[#allocation2 + $0x20] sm:$0xf] }
 0x1f0   : >> { %v5184_v11 = vpack.c.bf16 %v2439_v2, %v2439_v2  ;;  %v2437_v13 = vmax.f32 %v2429_v61, 0.0  ;;  %v2432_v17 = vadd.f32 %v6913_v39, %v2416_v54  ;;  %v2414_v38 = vadd.f32 %v2385_v26, %v2202_v6  ;;  %v2401_v47 = vpop.f32.mrf.mxu1 }
 0x1f1   : >> { %v5188_v16 = vpack.c.bf16 %v2443_v7, %v2443_v7  ;;  %v2441_v29 = vmax.f32 %v2433_v30, 0.0  ;;  %v2436_v51 = vadd.f32 %v6913_v39, %v2420_v4  ;;  %v2418_v14 = vadd.f32 %v2401_v47, %v2206_v62  ;;  %v2577_v62 = vld [vmem:[#allocation2 + $0x24] sm:$0x1] }
 0x1f2   : >> { %v2494_v10 = vshrl.u32 %v5184_v11, 16  ;;  %v2497_v19 = vshll.u32 %v5184_v11, 16  ;;  %v5182_v55 = vpack.c.bf16 %v2437_v13, %v2437_v13  ;;  %v2440_v56 = vmax.f32 %v2432_v17, 0.0  ;;  %v2598_v17 = vld [vmem:[#allocation2 + $0x40] sm:$0xf] }
 0x1f3   : >> { %v2526_v1 = vshrl.u32 %v5188_v16, 16  ;;  %v2529_v0 = vshll.u32 %v5188_v16, 16  ;;  %v5186_v20 = vpack.c.bf16 %v2441_v29, %v2441_v29  ;;  %v2444_v22 = vmax.f32 %v2436_v51, 0.0  ;;  %v2601_v47 = vld [vmem:[#allocation2 + $0x44] sm:$0x1] }
 0x1f4   : >> { %v2496_v41 = vrot.slane %v2494_v10, 7  ;;  %v2478_v23 = vshrl.u32 %v5182_v55, 16  ;;  %v2481_v21 = vshll.u32 %v5182_v55, 16  ;;  %v5185_v27 = vpack.c.bf16 %v2440_v56, %v2440_v56 }
 0x1f5   : >> { %v2528_v44 = vrot.slane %v2526_v1, 7  ;;  %v2510_v28 = vshrl.u32 %v5186_v20, 16  ;;  %v2513_v42 = vshll.u32 %v5186_v20, 16  ;;  %v5189_v8 = vpack.c.bf16 %v2444_v22, %v2444_v22  ;;  %v2562_v22 = vld [vmem:[#allocation2 + $0x10] sm:$0xf] }
 0x1f6   : >> { %v2499_v24 = vor.u32 %v2497_v19, %v2496_v41  ;;  %v2500_v9 = vrot.slane %v2496_v41, 4  ;;  %v2480_v37 = vrot.slane %v2478_v23, 7  ;;  %v2502_v33 = vshrl.u32 %v5185_v27, 16  ;;  %v2565_v41 = vld [vmem:[#allocation2 + $0x14] sm:$0x1] }
 0x1f7   : >> { %v2531_v34 = vor.u32 %v2529_v0, %v2528_v44  ;;  %v2532_v40 = vrot.slane %v2528_v44, 4  ;;  %v2512_v45 = vrot.slane %v2510_v28, 7  ;;  %v2505_v35 = vshll.u32 %v5185_v27, 16  ;;  %v2586_v44 = vld [vmem:[#allocation2 + $0x30] sm:$0xf] }
 0x1f8   : >> { %v2569_v31 = vsel %vm6538_vm6, %v2499_v24, %v2568_v18  ;;  %v2572_v52 = vsel %vm6484_vm2, %v2500_v9, %v2571_v32  ;;  %v2483_v57 = vor.u32 %v2481_v21, %v2480_v37  ;;  %v2484_v3 = vrot.slane %v2480_v37, 4  ;;  %v6061_v37 = vld [vmem:[#allocation6 + $0x1938] sm:$0xff] (%p430_p10)  }
 0x1f9   : >> { %2570 = vst [vmem:[#allocation2 + $0x18] sm:$0xf] %v2569_v31  ;;  %2573 = vst [vmem:[#allocation2 + $0x1c] sm:$0x1] %v2572_v52  ;;  %v2593_v50 = vsel %vm6538_vm6, %v2531_v34, %v2592_v5  ;;  %v2596_v46 = vsel %vm6484_vm2, %v2532_v40, %v2595_v36  ;;  %v2515_v59 = vor.u32 %v2513_v42, %v2512_v45  ;;  %v2516_v12 = vrot.slane %v2512_v45, 4  ;;  %v6063_v34 = vld [vmem:[#allocation6 + $0x1930] sm:$0xff] (%p430_p10)  }
 0x1fa   : >> { %2594 = vst [vmem:[#allocation2 + $0x38] sm:$0xf] %v2593_v50  ;;  %2597 = vst [vmem:[#allocation2 + $0x3c] sm:$0x1] %v2596_v46  ;;  %v2557_v53 = vsel %vm6538_vm6, %v2483_v57, %v6060_v58  ;;  %v2560_v63 = vsel %vm6484_vm2, %v2484_v3, %v2559_v43  ;;  %v2504_v6 = vrot.slane %v2502_v33, 7  ;;  %v2534_v2 = vshrl.u32 %v5189_v8, 16  ;;  %5646 = vmatprep.subr.bf16.mxu0 (%p430_p10), %v6061_v37 }
 0x1fb   : >> { %2558 = vst [vmem:[#allocation2 + $0x8] sm:$0xf] %v2557_v53  ;;  %2561 = vst [vmem:[#allocation2 + $0xc] sm:$0x1] %v2560_v63  ;;  %v2581_v61 = vsel %vm6538_vm6, %v2515_v59, %v2580_v25  ;;  %v2584_v54 = vsel %vm6484_vm2, %v2516_v12, %v2583_v60  ;;  %v2537_v7 = vshll.u32 %v5189_v8, 16  ;;  %v2430_v30 = vadd.f32 %v6913_v39, %v2414_v38  ;;  %v6062_v33 = vld [vmem:[#allocation6 + $0x18f8] sm:$0xff] (%p430_p10)  }
 0x1fc   : >> { %2582 = vst [vmem:[#allocation2 + $0x28] sm:$0xf] %v2581_v61  ;;  %2585 = vst [vmem:[#allocation2 + $0x2c] sm:$0x1] %v2584_v54  ;;  %v2507_v4 = vor.u32 %v2505_v35, %v2504_v6  ;;  %v2508_v26 = vrot.slane %v2504_v6, 4  ;;  %v2536_v11 = vrot.slane %v2534_v2, 7  ;;  %v2434_v13 = vadd.f32 %v6913_v39, %v2418_v14  ;;  %5670 = vmatprep.subr.bf16.mxu1 (%p430_p10), %v6062_v33 }
 0x1fd   : >> { %v2438_v16 = vmax.f32 %v2430_v30, 0.0  ;;  %v2589_v5 = vld [vmem:[#allocation2 + $0x34] sm:$0x1]  ;;  %5647 = vmatpush3.bf16.msra.mxu0 (%p430_p10), %v6061_v37  ;;  %v6064_v40 = vld [vmem:[#allocation6 + $0x18f0] sm:$0xff] (%p430_p10)   ;;  %5671 = vmatpush3.bf16.msra.mxu1 (%p430_p10), %v6062_v33  ;;  %v6065_v43 = vld [vmem:[#allocation6 + $0x1928] sm:$0xff] (%p430_p10)  }
 0x1fe   : >> { %v2575_v29 = vsel %vm6538_vm6, %v2507_v4, %v2574_v15  ;;  %v2578_v51 = vsel %vm6484_vm2, %v2508_v26, %v2577_v62  ;;  %v2539_v10 = vor.u32 %v2537_v7, %v2536_v11  ;;  %v2540_v19 = vrot.slane %v2536_v11, 4  ;;  %5648 = vmatprep.subr.bf16.mxu0 (%p430_p10), %v6063_v34  ;;  %5672 = vmatprep.subr.bf16.mxu1 (%p430_p10), %v6064_v40  ;;  %v6066_v45 = vld [vmem:[#allocation6 + $0x18e8] sm:$0xff] (%p430_p10)   ;;  %v6067_v35 = vld [vmem:[#allocation6 + $0x1920] sm:$0xff] (%p430_p10)   ;;  %v6071_v52 = vld [vmem:[#allocation6 + $0x1910] sm:$0xff] (%p430_p10)  }
 0x1ff   : >> { %2576 = vst [vmem:[#allocation2 + $0x20] sm:$0xf] %v2575_v29  ;;  %2579 = vst [vmem:[#allocation2 + $0x24] sm:$0x1] %v2578_v51  ;;  %v5183_v38 = vpack.c.bf16 %v2438_v16, %v2438_v16  ;;  %v2442_v55 = vmax.f32 %v2434_v13, 0.0  ;;  %v6068_v31 = vld [vmem:[#allocation6 + $0x18e0] sm:$0xff] (%p430_p10)  }
 0x200   : >> { %v2599_v56 = vsel %vm6538_vm6, %v2539_v10, %v2598_v17  ;;  %v2602_v39 = vsel %vm6484_vm2, %v2540_v19, %v2601_v47  ;;  %v6072_v57 = vld [vmem:[#allocation6 + $0x18d0] sm:$0xff] (%p430_p10)   ;;  %v6073_v53 = vld [vmem:[#allocation6 + $0x1908] sm:$0xff] (%p430_p10)  }
 0x201   : >> { %2600 = vst [vmem:[#allocation2 + $0x40] sm:$0xf] %v2599_v56  ;;  %2603 = vst [vmem:[#allocation2 + $0x44] sm:$0x1] %v2602_v39  ;;  %v2486_v14 = vshrl.u32 %v5183_v38, 16  ;;  %v5187_v18 = vpack.c.bf16 %v2442_v55, %v2442_v55  ;;  %v2489_v0 = vshll.u32 %v5183_v38, 16  ;;  %5649 = vmatpush3.bf16.msra.mxu0 (%p430_p10), %v6063_v34  ;;  %5673 = vmatpush3.bf16.msra.mxu1 (%p430_p10), %v6064_v40 }
 0x202   : > { %5650 = vmatprep.subr.bf16.mxu0 (%p430_p10), %v6065_v43  ;;  %5674 = vmatprep.subr.bf16.mxu1 (%p430_p10), %v6066_v45  ;;  %v2604_v3 = vld [vmem:[#allocation2] sm:$0xf] (%p430_p10)  ;;  %v2605_v25 = vld [vmem:[#allocation2 + $0x8] sm:$0xf] (%p430_p10)  ;;  %v6961_v60 = vld [vmem:[#allocation2 + $0x4] sm:$0x1] (%p430_p10) }
 0x203   : >> { %v2488_v1 = vrot.slane %v2486_v14, 7  ;;  %v2518_v20 = vshrl.u32 %v5187_v18, 16  ;;  %v2521_v27 = vshll.u32 %v5187_v18, 16  ;;  %v6963_v50 = vld [vmem:[#allocation2 + $0xc] sm:$0x1] (%p430_p10)  ;;  %v2641_v46 = vshrl.u32 (%p430_p10), %v2604_v3, 16 }
 0x204   : > { %v2644_v59 = vshll.u32 (%p430_p10), %v2604_v3, 16  ;;  %v2650_v12 = vshll.u32 (%p430_p10), %v6961_v60, 16  ;;  %v2655_v58 = vshrl.u32 (%p430_p10), %v2605_v25, 16  ;;  %v2658_v63 = vshll.u32 (%p430_p10), %v2605_v25, 16  ;;  %v2607_v7 = vld [vmem:[#allocation2 + $0x18] sm:$0xf] (%p430_p10) }
 0x205   : >> { %v2491_v32 = vor.u32 %v2489_v0, %v2488_v1  ;;  %v2492_v23 = vrot.slane %v2488_v1, 4  ;;  %v2520_v21 = vrot.slane %v2518_v20, 7  ;;  %5651 = vmatpush3.bf16.msra.mxu0 (%p430_p10), %v6065_v43  ;;  %5675 = vmatpush3.bf16.msra.mxu1 (%p430_p10), %v6066_v45  ;;  %v2664_v6 = vshll.u32 (%p430_p10), %v6963_v50, 16  ;;  %v6971_v13 = vld [vmem:[#allocation2 + $0x1c] sm:$0x1] (%p430_p10)  ;;  %v6075_v18 = vld [vmem:[#allocation6 + $0x1900] sm:$0xff] (%p430_p10)  }
 0x206   : > { %432 = sbr.rel (!%p430_p10) target bundleno = 131 (0x83), region = 116  ;;  %5652 = vmatprep.subr.bf16.mxu0 (%p430_p10), %v6067_v35  ;;  %5676 = vmatprep.subr.bf16.mxu1 (%p430_p10), %v6068_v31  ;;  %v2643_v61 = vrot.slane (%p430_p10), %v2641_v46, 4  ;;  %v2646_v54 = vrot.slane (%p430_p10), %v2644_v59, 5  ;;  %v2652_v15 = vrot.slane (%p430_p10), %v2650_v12, 5  ;;  %v2657_v62 = vrot.slane (%p430_p10), %v2655_v58, 4  ;;  %v6074_v17 = vld [vmem:[#allocation6 + $0x18c8] sm:$0xff] (%p430_p10)  }
 0x207   : >> { %v2563_v28 = vsel %vm6538_vm6, %v2491_v32, %v2562_v22  ;;  %v2566_v42 = vsel %vm6484_vm2, %v2492_v23, %v2565_v41  ;;  %v2523_v8 = vor.u32 %v2521_v27, %v2520_v21  ;;  %v2524_v24 = vrot.slane %v2520_v21, 4  ;;  %v6076_v22 = vld [vmem:[#allocation6 + $0x18c0] sm:$0xff] (%p430_p10)   ;;  %v6081_v40 = vld [vmem:[#allocation6 + $0x1970] sm:$0xff] (%p430_p10)   ;;  %v6083_v45 = vld [vmem:[#allocation6 + $0x1968] sm:$0xff] (%p430_p10)  }
 0x208   : >> { %2564 = vst [vmem:[#allocation2 + $0x10] sm:$0xf] %v2563_v28  ;;  %2567 = vst [vmem:[#allocation2 + $0x14] sm:$0x1] %v2566_v42  ;;  %v2660_v30 = vrot.slane (%p430_p10), %v2658_v63, 5  ;;  %v2666_v4 = vrot.slane (%p430_p10), %v2664_v6, 5  ;;  %v5054_v26 = vcombine.low (%p430_p10), %v2604_v3, %v2605_v25  ;;  %v2647_v47 = vor.u32 (%p430_p10), %v2646_v54, %v2643_v61 }
 0x209   : >> { %v2587_v9 = vsel %vm6538_vm6, %v2523_v8, %v2586_v44  ;;  %v2590_v36 = vsel %vm6484_vm2, %v2524_v24, %v2589_v5  ;;  %5653 = vmatpush3.bf16.msra.mxu0 (%p430_p10), %v6067_v35  ;;  %5677 = vmatpush3.bf16.msra.mxu1 (%p430_p10), %v6068_v31  ;;  %v2683_v19 = vshrl.u32 (%p430_p10), %v2607_v7, 16  ;;  %v2686_v38 = vshll.u32 (%p430_p10), %v2607_v7, 16  ;;  %v6079_v24 = vld [vmem:[#allocation6 + $0x1978] sm:$0xff] (%p430_p10)   ;;  %v6082_v43 = vld [vmem:[#allocation6 + $0x19b0] sm:$0xff] (%p430_p10)  }
 0x20a   : >> { %2588 = vst [vmem:[#allocation2 + $0x30] sm:$0xf] %v2587_v9  ;;  %2591 = vst [vmem:[#allocation2 + $0x34] sm:$0x1] %v2590_v36  ;;  %5654 = vmatprep.subr.bf16.mxu0 (%p430_p10), %v6069_v48  ;;  %5678 = vmatprep.subr.bf16.mxu1 (%p430_p10), %v6070_v49  ;;  %v2661_v10 = vor.u32 (%p430_p10), %v2660_v30, %v2657_v62  ;;  %v2692_v55 = vshll.u32 (%p430_p10), %v6971_v13, 16  ;;  %v2648_v56 = vrot.slane (%p430_p10), %v2647_v47, 4 }
 0x20b   : > { %5686 = vmatprep.mubr.bf16.mxu1 %v5054_v26  ;;  %v2685_v0 = vrot.slane %v2683_v19, 4  ;;  %v2688_v20 = vrot.slane %v2686_v38, 5  ;;  %v6080_v36 = vld [vmem:[#allocation6 + $0x19b8] sm:$0xff]   ;;  %v2608_v35 = vld [vmem:[#allocation2 + $0x20] sm:$0xf]  ;;  %v6086_v38 = vld [vmem:[#allocation6 + $0x19a0] sm:$0xff]  }
 0x20c   : > { %v2662_v1 = vrot.slane %v2661_v10, 4  ;;  %v2653_v32 = vsel %vm6595_vm9, %v2648_v56, %v2652_v15  ;;  %v2694_v5 = vrot.slane %v2692_v55, 5  ;;  %v2609_v31 = vld [vmem:[#allocation2 + $0x28] sm:$0xf]  ;;  %v2700_v3 = vshll.u32 %v2608_v35, 16 }
 0x20d   : > { %5655 = vmatpush3.bf16.msra.mxu0 %v6069_v48  ;;  %5679 = vmatpush3.bf16.msra.mxu1 %v6070_v49  ;;  %v2689_v44 = vor.u32 %v2688_v20, %v2685_v0  ;;  %v6084_v48 = vld [vmem:[#allocation6 + $0x19a8] sm:$0xff]   ;;  %v6986_v49 = vld [vmem:[#allocation2 + $0x24] sm:$0x1]  ;;  %v5056_v25 = vcombine.low %v2608_v35, %v2609_v31  ;;  %v2711_v59 = vshrl.u32 %v2609_v31, 16  ;;  %v2714_v12 = vshll.u32 %v2609_v31, 16 }
 0x20e   : > { %5656 = vmatprep.subr.bf16.mxu0 %v6071_v52  ;;  %5680 = vmatprep.subr.bf16.mxu1 %v6072_v57  ;;  %v2667_v27 = vsel %vm6595_vm9, %v2662_v1, %v2666_v4  ;;  %v2706_v46 = vshll.u32 %v6986_v49, 16  ;;  %v2702_v6 = vrot.slane %v2700_v3, 5  ;;  %v6994_v30 = vld [vmem:[#allocation2 + $0x3c] sm:$0x1] }
 0x20f   : > { %v6967_v2 = vld [vmem:[#allocation2 + $0x10] sm:$0xf]  ;;  %v6969_v11 = vld [vmem:[#allocation2 + $0x14] sm:$0x1]  ;;  %v5042_v28 = vcombine.low %v2653_v32, %v2667_v27  ;;  %v2690_v8 = vrot.slane %v2689_v44, 4  ;;  %v2713_v15 = vrot.slane %v2711_v59, 4 }
 0x210   : > { %v2669_v16 = vshrl.u32 %v6967_v2, 16  ;;  %v2672_v29 = vshll.u32 %v6967_v2, 16  ;;  %v2678_v51 = vshll.u32 %v6969_v11, 16  ;;  %v5055_v34 = vcombine.low %v6967_v2, %v2607_v7  ;;  %v2611_v2 = vld [vmem:[#allocation2 + $0x38] sm:$0xf] }
 0x211   : > { %5657 = vmatpush3.bf16.msra.mxu0 %v6071_v52  ;;  %5681 = vmatpush3.bf16.msra.mxu1 %v6072_v57  ;;  %v2695_v37 = vsel %vm6595_vm9, %v2690_v8, %v2694_v5  ;;  %v6988_v52 = vld [vmem:[#allocation2 + $0x2c] sm:$0x1]  ;;  %v2697_v57 = vshrl.u32 %v2608_v35, 16  ;;  %v6992_v61 = vld [vmem:[#allocation2 + $0x34] sm:$0x1]  ;;  %v2708_v54 = vrot.slane %v2706_v46, 5 }
 0x212   : > { %v2671_v39 = vrot.slane %v2669_v16, 4  ;;  %v2674_v14 = vrot.slane %v2672_v29, 5  ;;  %5658 = vmatprep.subr.bf16.mxu0 %v6073_v53  ;;  %5682 = vmatprep.subr.bf16.mxu1 %v6074_v17  ;;  %v2680_v21 = vrot.slane %v2678_v51, 5  ;;  %v2720_v58 = vshll.u32 %v6988_v52, 16  ;;  %v6085_v16 = vld [vmem:[#allocation6 + $0x1960] sm:$0xff]   ;;  %v6093_v59 = vld [vmem:[#allocation6 + $0x1948] sm:$0xff]  }
 0x213   : > { %5662 = vmatprep.mubr.bf16.mxu0 %v5042_v28  ;;  %v2699_v63 = vrot.slane %v2697_v57, 4  ;;  %v2716_v62 = vrot.slane %v2714_v12, 5  ;;  %v2734_v47 = vshll.u32 %v6992_v61, 16  ;;  %v2739_v51 = vshrl.u32 %v2611_v2, 16  ;;  %v3037_v31 = vld [vmem:[#allocation2 + $0x10] sm:$0xe] }
 0x214   : > { %v2675_v23 = vor.u32 %v2674_v14, %v2671_v39  ;;  %v2722_v7 = vrot.slane %v2720_v58, 5  ;;  %v2742_v10 = vshll.u32 %v2611_v2, 16  ;;  %v2748_v19 = vshll.u32 %v6994_v30, 16  ;;  %v6094_v12 = vld [vmem:[#allocation6 + $0x1988] sm:$0xff]  }
 0x215   : > { %5659 = vmatpush3.bf16.msra.mxu0 %v6073_v53  ;;  %5683 = vmatpush3.bf16.msra.mxu1 %v6074_v17  ;;  %v2610_v53 = vld [vmem:[#allocation2 + $0x30] sm:$0xf]  ;;  %v2703_v4 = vor.u32 %v2702_v6, %v2699_v63  ;;  %v2717_v29 = vor.u32 %v2716_v62, %v2713_v15  ;;  %v3064_v14 = vrot.slane %v6961_v60, 5  ;;  %v2741_v1 = vrot.slane %v2739_v51, 4  ;;  %v6088_v60 = vld [vmem:[#allocation6 + $0x1998] sm:$0xff]  }
 0x216   : > { %v2676_v42 = vrot.slane %v2675_v23, 4  ;;  %5660 = vmatprep.subr.bf16.mxu0 %v6075_v18  ;;  %5684 = vmatprep.subr.bf16.mxu1 %v6076_v22  ;;  %v2725_v26 = vshrl.u32 %v2610_v53, 16  ;;  %v2728_v17 = vshll.u32 %v2610_v53, 16  ;;  %v2744_v0 = vrot.slane %v2742_v10, 5  ;;  %v3040_v15 = vld [vmem:[#allocation2 + $0x28] sm:$0xe] }
 0x217   : > { %v2704_v55 = vrot.slane %v2703_v4, 4  ;;  %v2736_v32 = vrot.slane %v2734_v47, 5  ;;  %v5057_v23 = vcombine.low %v2610_v53, %v2611_v2  ;;  %v2750_v5 = vrot.slane %v2748_v19, 5  ;;  %v6095_v2 = vld [vmem:[#allocation6 + $0x1940] sm:$0xff]   ;;  %v6098_v51 = vld [vmem:[#allocation2 + $0x18] ss:$8 sps:$4 sm:$0xff]  }
 0x218   : > { %v2681_v9 = vsel %vm6595_vm9, %v2676_v42, %v2680_v21  ;;  %v2727_v56 = vrot.slane %v2725_v26, 4  ;;  %v2730_v39 = vrot.slane %v2728_v17, 5  ;;  %v6087_v21 = vld [vmem:[#allocation6 + $0x1958] sm:$0xff]   ;;  %v2745_v44 = vor.u32 %v2744_v0, %v2741_v1 }
 0x219   : > { %5661 = vmatpush3.bf16.msra.mxu0 %v6075_v18  ;;  %v5043_v33 = vcombine.low %v2681_v9, %v2695_v37  ;;  %5685 = vmatpush3.bf16.msra.mxu1 %v6076_v22  ;;  %v2718_v18 = vrot.slane %v2717_v29, 4  ;;  %v2709_v20 = vsel %vm6595_vm9, %v2704_v55, %v2708_v54  ;;  %v3068_v8 = vrot.slane %v6963_v50, 5  ;;  %v3035_v37 = vld [vmem:[#allocation2] sm:$0xe]  ;;  %v6100_v10 = vld [vmem:[#allocation6 + $0x1a38] sm:$0xff]  }
 0x21a   : > { %5694 = vmatprep.subr.bf16.mxu0 %v6079_v24  ;;  %5718 = vmatprep.subr.bf16.mxu1 %v6080_v36  ;;  %v2731_v22 = vor.u32 %v2730_v39, %v2727_v56  ;;  %v6092_v50 = vld [vmem:[#allocation6 + $0x1990] sm:$0xff]   ;;  %v5068_v58 = vrot.slane %v3037_v31, 9  ;;  %v3072_v53 = vrot.slane %v6969_v11, 5  ;;  %v3076_v6 = vrot.slane %v6971_v13, 5  ;;  %v6099_v13 = vld [vmem:[#allocation6 + $0x19f8] sm:$0xff]  }
 0x21b   : > { %v2723_v27 = vsel %vm6595_vm9, %v2718_v18, %v2722_v7  ;;  %v3039_v54 = vld [vmem:[#allocation2 + $0x20] sm:$0xe]  ;;  %v3080_v62 = vrot.slane %v6986_v49, 5  ;;  %v6096_v7 = vld [vmem:[#allocation6 + $0x1980] sm:$0xff]   ;;  %v3084_v4 = vrot.slane %v6988_v52, 5  ;;  %v5071_v47 = vrot.slane %v3040_v15, 9 }
 0x21c   : > { %5663 = vmatmul.mubr.bf16.vlgmr.msra.gmra.mxu0 %v5043_v33  ;;  %5687 = vmatmul.mubr.bf16.vlgmr.msra.gmra.mxu1 %v5055_v34  ;;  %v5044_v28 = vcombine.low %v2709_v20, %v2723_v27  ;;  %v2732_v42 = vrot.slane %v2731_v22, 4  ;;  %v3036_v33 = vld [vmem:[#allocation2 + $0x8] sm:$0xe]  ;;  %v3073_v26 = vsel %vm6674_vm12, %v5068_v58, %v3072_v53  ;;  %v5070_v17 = vrot.slane %v3039_v54, 9  ;;  %v3042_v49 = vld [vmem:[#allocation2 + $0x38] sm:$0xe] }
 0x21d   : > { %5695 = vmatpush3.bf16.msra.mxu0 %v6079_v24  ;;  %5719 = vmatpush3.bf16.msra.mxu1 %v6080_v36  ;;  %v2746_v24 = vrot.slane %v2745_v44, 4  ;;  %v6091_v36 = vld [vmem:[#allocation6 + $0x1950] sm:$0xff]   ;;  %v3085_v19 = vsel %vm6674_vm12, %v5071_v47, %v3084_v4  ;;  %v3092_v55 = vrot.slane %v6994_v30, 5  ;;  %v5073_v39 = vrot.slane %v3042_v49, 9  ;;  %v6105_v0 = vld [vmem:[#allocation2 + $0x28] ss:$8 sps:$4 sm:$0xff]  }
 0x21e   : > { %5696 = vmatprep.subr.bf16.mxu0 %v6081_v40  ;;  %5720 = vmatprep.subr.bf16.mxu1 %v6082_v43  ;;  %v2737_v9 = vsel %vm6595_vm9, %v2732_v42, %v2736_v32  ;;  %v3081_v52 = vsel %vm6674_vm12, %v5070_v17, %v3080_v62  ;;  %v6102_v18 = vld [vmem:[#allocation6 + $0x1a30] sm:$0xff]   ;;  %v6103_v30 = vld [vmem:[#allocation6 + $0x19e8] sm:$0xff]   ;;  %v6107_v27 = vld [vmem:[#allocation6 + $0x19e0] sm:$0xff]  }
 0x21f   : > { %5690 = vmatprep.mubr.bf16.mxu1 %v5056_v25  ;;  %5666 = vmatprep.mubr.bf16.mxu0 %v5044_v28  ;;  %v2751_v34 = vsel %vm6595_vm9, %v2746_v24, %v2750_v5  ;;  %v3038_v25 = vld [vmem:[#allocation2 + $0x18] sm:$0xe]  ;;  %v5076_v1 = vcombine.low %v3081_v52, %v3085_v19  ;;  %v3419_v44 = vld [vmem:[#allocation2 + $0xc] sm:$0x1]  ;;  %v3420_v5 = vld [vmem:[#allocation2 + $0x10] sm:$0xf] }
 0x220   : > { %v5045_v35 = vcombine.low %v2737_v9, %v2751_v34  ;;  %v5069_v63 = vrot.slane %v3038_v25, 9  ;;  %v6104_v22 = vld [vmem:[#allocation6 + $0x1a28] sm:$0xff]   ;;  %v3449_v24 = vshrl.u32 %v3420_v5, 16  ;;  %v3700_v9 = vld [vmem:[#allocation2 + $0x8] sm:$0xe] }
 0x221   : > { %5697 = vmatpush3.bf16.msra.mxu0 %v6081_v40  ;;  %5721 = vmatpush3.bf16.msra.mxu1 %v6082_v43  ;;  %v5066_v40 = vrot.slane %v3035_v37, 9  ;;  %v5067_v43 = vrot.slane %v3036_v33, 9  ;;  %v6106_v32 = vld [vmem:[#allocation2 + $0x38] ss:$8 sps:$4 sm:$0xff]   ;;  %v3701_v33 = vld [vmem:[#allocation2 + $0x10] sm:$0xe] }
 0x222   : > { %5698 = vmatprep.subr.bf16.mxu0 %v6083_v45  ;;  %5722 = vmatprep.subr.bf16.mxu1 %v6084_v48  ;;  %v3077_v11 = vsel %vm6674_vm12, %v5069_v63, %v3076_v6  ;;  %v5110_v34 = vrot.slane %v3700_v9, 9  ;;  %v3422_v31 = vld [vmem:[#allocation2 + $0x18] sm:$0xf]  ;;  %v3424_v63 = vld [vmem:[#allocation2 + $0x20] sm:$0xf]  ;;  %v6109_v54 = vld [vmem:[#allocation6 + $0x19d8] sm:$0xff]  }
 0x223   : > { %v3065_v57 = vsel %vm6674_vm12, %v5066_v40, %v3064_v14  ;;  %v3069_v3 = vsel %vm6674_vm12, %v5067_v43, %v3068_v8  ;;  %v5075_v29 = vcombine.low %v3073_v26, %v3077_v11  ;;  %v6101_v14 = vld [vmem:[#allocation6 + $0x19f0] sm:$0xff]   ;;  %v3444_v8 = vshll.u32 %v3419_v44, 16  ;;  %v6108_v43 = vld [vmem:[#allocation6 + $0x1a20] sm:$0xff]   ;;  %v3702_v26 = vld [vmem:[#allocation2 + $0x18] sm:$0xe] }
 0x224   : > { %5691 = vmatmul.mubr.bf16.gmra.mxu1 %v5057_v23  ;;  %v5074_v46 = vcombine.low %v3065_v57, %v3069_v3  ;;  %5667 = vmatmul.mubr.bf16.gmra.mxu0 %v5045_v35  ;;  %v3418_v23 = vld [vmem:[#allocation2 + $0x8] sm:$0xf]  ;;  %v3726_v40 = vrot.slane %v3419_v44, 5  ;;  %v3425_v6 = vld [vmem:[#allocation2 + $0x24] sm:$0x1]  ;;  %v3466_v62 = vshll.u32 %v3422_v31, 16 }
 0x225   : > { %5699 = vmatpush3.bf16.msra.mxu0 %v6083_v45  ;;  %5723 = vmatpush3.bf16.msra.mxu1 %v6084_v48  ;;  %v6097_v45 = vld [vmem:[#allocation2 + $0x8] ss:$8 sps:$4 sm:$0xff]   ;;  %v3435_v28 = vshrl.u32 %v3418_v23, 16  ;;  %v3438_v42 = vshll.u32 %v3418_v23, 16  ;;  %v3446_v57 = vrot.slane %v3444_v8, 5  ;;  %v3477_v4 = vshrl.u32 %v3424_v63, 16 }
 0x226   : > { %5700 = vmatprep.subr.bf16.mxu0 %v6085_v16  ;;  %5724 = vmatprep.subr.bf16.mxu1 %v6086_v38  ;;  %v3727_v58 = vsel %vm6674_vm12, %v5110_v34, %v3726_v40  ;;  %v6110_v11 = vld [vmem:[#allocation6 + $0x1a18] sm:$0xff]   ;;  %v3703_v49 = vld [vmem:[#allocation2 + $0x20] sm:$0xe]  ;;  %v3468_v52 = vrot.slane %v3466_v62, 5  ;;  %v6113_v23 = vld [vmem:[#allocation6 + $0x19c8] sm:$0xff]  }
 0x227   : > { %5734 = vmatprep.mubr.bf16.mxu1 %v6097_v45  ;;  %5710 = vmatprep.mubr.bf16.mxu0 %v5074_v46  ;;  %v3437_v45 = vrot.slane %v3435_v28, 4  ;;  %v3440_v35 = vrot.slane %v3438_v42, 5  ;;  %v5111_v46 = vrot.slane %v3701_v33, 9  ;;  %v6114_v44 = vld [vmem:[#allocation6 + $0x1a08] sm:$0xff]   ;;  %v7040_v28 = vld [vmem:[#allocation2 + $0x2c] sm:$0x1] }
 0x228   : > { %v3428_v8 = vld [vmem:[#allocation2 + $0x30] sm:$0xf]  ;;  %v3500_v34 = vshll.u32 %v7040_v28, 16 }
 0x229   : > { %5701 = vmatpush3.bf16.msra.mxu0 %v6085_v16  ;;  %5725 = vmatpush3.bf16.msra.mxu1 %v6086_v38  ;;  %v3041_v16 = vld [vmem:[#allocation2 + $0x30] sm:$0xe]  ;;  %v3088_v38 = vrot.slane %v6992_v61, 5  ;;  %v3093_v61 = vsel %vm6674_vm12, %v5073_v39, %v3092_v55  ;;  %v3505_v40 = vshrl.u32 %v3428_v8, 16 }
 0x22a   : > { %5702 = vmatprep.subr.bf16.mxu0 %v6087_v21  ;;  %5726 = vmatprep.subr.bf16.mxu1 %v6088_v60  ;;  %v5072_v56 = vrot.slane %v3041_v16, 9  ;;  %v3480_v16 = vshll.u32 %v3424_v63, 16 }
 0x22c   : > { %v3089_v20 = vsel %vm6674_vm12, %v5072_v56, %v3088_v38  ;;  %v6112_v38 = vld [vmem:[#allocation6 + $0x1a10] sm:$0xff]   ;;  %v3479_v56 = vrot.slane %v3477_v4, 4  ;;  %v3482_v39 = vrot.slane %v3480_v16, 5 }
 0x22d   : > { %5703 = vmatpush3.bf16.msra.mxu0 %v6087_v21  ;;  %5727 = vmatpush3.bf16.msra.mxu1 %v6088_v60  ;;  %v5077_v21 = vcombine.low %v3089_v20, %v3093_v61  ;;  %v3421_v60 = vld [vmem:[#allocation2 + $0x14] sm:$0x1] }
 0x22e   : > { %5704 = vmatprep.subr.bf16.mxu0 %v6091_v36  ;;  %5728 = vmatprep.subr.bf16.mxu1 %v6092_v50  ;;  %v3458_v37 = vshll.u32 %v3421_v60, 16  ;;  %v3730_v53 = vrot.slane %v3421_v60, 5  ;;  %v3426_v60 = vld [vmem:[#allocation2 + $0x28] sm:$0xf] }
 0x22f   : > { %v3491_v9 = vshrl.u32 %v3426_v60, 16 }
 0x230   : > { %v3460_v25 = vrot.slane %v3458_v37, 5  ;;  %v3731_v17 = vsel %vm6674_vm12, %v5111_v46, %v3730_v53  ;;  %v6116_v46 = vld [vmem:[#allocation6 + $0x1a00] sm:$0xff]  }
 0x231   : > { %5705 = vmatpush3.bf16.msra.mxu0 %v6091_v36  ;;  %5729 = vmatpush3.bf16.msra.mxu1 %v6092_v50  ;;  %v3452_v36 = vshll.u32 %v3420_v5, 16  ;;  %v3451_v50 = vrot.slane %v3449_v24, 4  ;;  %v7046_v24 = vld [vmem:[#allocation2 + $0x34] sm:$0x1] }
 0x232   : > { %5706 = vmatprep.subr.bf16.mxu0 %v6093_v59  ;;  %5730 = vmatprep.subr.bf16.mxu1 %v6094_v12 }
 0x233   : > { %v3454_v3 = vrot.slane %v3452_v36, 5  ;;  %v3494_v36 = vshll.u32 %v3426_v60, 16 }
 0x235   : > { %5707 = vmatpush3.bf16.msra.mxu0 %v6093_v59  ;;  %5731 = vmatpush3.bf16.msra.mxu1 %v6094_v12  ;;  %v3423_v59 = vld [vmem:[#allocation2 + $0x1c] sm:$0x1]  ;;  %v3441_v12 = vor.u32 %v3440_v35, %v3437_v45  ;;  %v3455_v15 = vor.u32 %v3454_v3, %v3451_v50  ;;  %v3493_v50 = vrot.slane %v3491_v9, 4  ;;  %v3432_v3 = vld [vmem:[#allocation2 + $0x40] sm:$0xf] }
 0x236   : > { %5708 = vmatprep.subr.bf16.mxu0 %v6095_v2  ;;  %5732 = vmatprep.subr.bf16.mxu1 %v6096_v7  ;;  %v3734_v20 = vrot.slane %v3423_v59, 5  ;;  %v7056_v45 = vld [vmem:[#allocation2 + $0x3c] sm:$0x1]  ;;  %v3533_v4 = vshrl.u32 %v3432_v3, 16 }
 0x239   : > { %5709 = vmatpush3.bf16.msra.mxu0 %v6095_v2  ;;  %5733 = vmatpush3.bf16.msra.mxu1 %v6096_v7  ;;  %v3463_v2 = vshrl.u32 %v3422_v31, 16  ;;  %v3472_v7 = vshll.u32 %v3423_v59, 16  ;;  %v3496_v31 = vrot.slane %v3494_v36, 5  ;;  %v3502_v59 = vrot.slane %v3500_v34, 5 }
 0x23a   : > { %5742 = vmatprep.subr.bf16.mxu0 %v6099_v13  ;;  %5766 = vmatprep.subr.bf16.mxu1 %v6100_v10 }
 0x23b   : > { %v3465_v47 = vrot.slane %v3463_v2, 4  ;;  %v7034_v19 = vrot.slane %v3472_v7, 5  ;;  %v3528_v7 = vshll.u32 %v7056_v45, 16 }
 0x23c   : > { %5711 = vmatmul.mubr.bf16.vlgmr.msra.gmra.mxu0 %v5075_v29  ;;  %5735 = vmatmul.mubr.bf16.vlgmr.msra.gmra.mxu1 %v6098_v51  ;;  %v6111_v29 = vld [vmem:[#allocation6 + $0x19d0] sm:$0xff]   ;;  %v3456_v51 = vrot.slane %v3455_v15, 4 }
 0x23d   : > { %5743 = vmatpush3.bf16.msra.mxu0 %v6099_v13  ;;  %5767 = vmatpush3.bf16.msra.mxu1 %v6100_v10  ;;  %v3442_v13 = vrot.slane %v3441_v12, 4  ;;  %v5118_v10 = vcombine.low %v3727_v58, %v3731_v17  ;;  %v3507_v12 = vrot.slane %v3505_v40, 4  ;;  %v3514_v58 = vshll.u32 %v7046_v24, 16 }
 0x23e   : > { %5744 = vmatprep.subr.bf16.mxu0 %v6101_v14  ;;  %5768 = vmatprep.subr.bf16.mxu1 %v6102_v18 }
 0x23f   : > { %5714 = vmatprep.mubr.bf16.mxu0 %v5076_v1  ;;  %5738 = vmatprep.mubr.bf16.mxu1 %v6105_v0  ;;  %v3447_v55 = vsel %vm6595_vm9, %v3442_v13, %v3446_v57  ;;  %v3469_v1 = vor.u32 %v3468_v52, %v3465_v47  ;;  %v5112_v0 = vrot.slane %v3702_v26, 9  ;;  %v3508_v57 = vshll.u32 %v3428_v8, 16 }
 0x240   : > { %v3536_v26 = vshll.u32 %v3432_v3, 16  ;;  %v3516_v47 = vrot.slane %v3514_v58, 5  ;;  %v6124_v3 = vld [vmem:[#allocation6 + $0x1aa0] sm:$0xff]   ;;  %v7089_v58 = vld [vmem:[#allocation2 + $0x1c] sm:$0x1] }
 0x241   : > { %5745 = vmatpush3.bf16.msra.mxu0 %v6101_v14  ;;  %5769 = vmatpush3.bf16.msra.mxu1 %v6102_v18  ;;  %v3486_v14 = vshll.u32 %v3425_v6, 16  ;;  %v3461_v18 = vsel %vm6595_vm9, %v3456_v51, %v3460_v25  ;;  %v7044_v42 = vsel %vm6674_vm12, %v5112_v0, %v3734_v20  ;;  %v6115_v25 = vld [vmem:[#allocation6 + $0x19c0] sm:$0xff]   ;;  %v3510_v2 = vrot.slane %v3508_v57, 5 }
 0x242   : > { %5746 = vmatprep.subr.bf16.mxu0 %v6103_v30  ;;  %5770 = vmatprep.subr.bf16.mxu1 %v6104_v22  ;;  %v5098_v61 = vcombine.low %v3447_v55, %v3461_v18  ;;  %v3704_v55 = vld [vmem:[#allocation2 + $0x28] sm:$0xe]  ;;  %v3530_v18 = vrot.slane %v3528_v7, 5 }
 0x243   : > { %v3511_v17 = vor.u32 %v3510_v2, %v3507_v12  ;;  %v5114_v0 = vrot.slane %v3704_v55, 9  ;;  %v4083_v12 = vld [vmem:[#allocation2 + $0x18] sm:$0xf] }
 0x244   : > { %5715 = vmatmul.mubr.bf16.gmra.mxu0 %v5077_v21  ;;  %5739 = vmatmul.mubr.bf16.gmra.mxu1 %v6106_v32  ;;  %v5113_v32 = vrot.slane %v3703_v49, 9  ;;  %v3470_v21 = vrot.slane %v3469_v1, 4  ;;  %v3535_v49 = vrot.slane %v3533_v4, 4  ;;  %v4112_v2 = vshrl.u32 %v4083_v12, 16 }
 0x245   : > { %5747 = vmatpush3.bf16.msra.mxu0 %v6103_v30  ;;  %5771 = vmatpush3.bf16.msra.mxu1 %v6104_v22  ;;  %v3483_v30 = vor.u32 %v3482_v39, %v3479_v56  ;;  %v3488_v22 = vrot.slane %v3486_v14, 5  ;;  %v3705_v56 = vld [vmem:[#allocation2 + $0x30] sm:$0xe]  ;;  %v3746_v39 = vrot.slane %v7046_v24, 5  ;;  %v6118_v14 = vld [vmem:[#allocation6 + $0x1ab8] sm:$0xff]   ;;  %v6120_v24 = vld [vmem:[#allocation6 + $0x1ab0] sm:$0xff]  }
 0x246   : > { %5748 = vmatprep.subr.bf16.mxu0 %v6107_v27  ;;  %5772 = vmatprep.subr.bf16.mxu1 %v6108_v43  ;;  %v3475_v37 = vsel %vm6595_vm9, %v3470_v21, %v7034_v19  ;;  %v3512_v19 = vrot.slane %v3511_v17, 4  ;;  %v5115_v20 = vrot.slane %v3705_v56, 9 }
 0x247   : > { %5782 = vmatprep.mubr.bf16.mxu1 %v5118_v10  ;;  %5758 = vmatprep.mubr.bf16.mxu0 %v5098_v61  ;;  %v3484_v5 = vrot.slane %v3483_v30, 4  ;;  %v3742_v10 = vrot.slane %v7040_v28, 5  ;;  %v3706_v61 = vld [vmem:[#allocation2 + $0x38] sm:$0xe]  ;;  %v6119_v30 = vld [vmem:[#allocation6 + $0x1a70] sm:$0xff]  }
 0x248   : > { %v3747_v60 = vsel %vm6674_vm12, %v5115_v20, %v3746_v39  ;;  %v5116_v28 = vrot.slane %v3706_v61, 9 }
 0x249   : > { %5749 = vmatpush3.bf16.msra.mxu0 %v6107_v27  ;;  %5773 = vmatpush3.bf16.msra.mxu1 %v6108_v43  ;;  %v3738_v27 = vrot.slane %v3425_v6, 5  ;;  %v3430_v43 = vld [vmem:[#allocation2 + $0x38] sm:$0xf]  ;;  %v3489_v35 = vsel %vm6595_vm9, %v3484_v5, %v3488_v22  ;;  %v3497_v6 = vor.u32 %v3496_v31, %v3493_v50  ;;  %v3743_v5 = vsel %vm6674_vm12, %v5114_v0, %v3742_v10  ;;  %v6123_v31 = vld [vmem:[#allocation6 + $0x1a60] sm:$0xff]   ;;  %v6127_v10 = vld [vmem:[#allocation6 + $0x1a50] sm:$0xff]  }
 0x24a   : > { %5750 = vmatprep.subr.bf16.mxu0 %v6109_v54  ;;  %5774 = vmatprep.subr.bf16.mxu1 %v6110_v11  ;;  %v3519_v53 = vshrl.u32 %v3430_v43, 16  ;;  %v3522_v15 = vshll.u32 %v3430_v43, 16  ;;  %v5099_v52 = vcombine.low %v3475_v37, %v3489_v35  ;;  %v6121_v37 = vld [vmem:[#allocation6 + $0x1a68] sm:$0xff]  }
 0x24b   : > { %v7053_v33 = vsel %vm6674_vm12, %v5113_v32, %v3738_v27  ;;  %v3498_v13 = vrot.slane %v3497_v6, 4  ;;  %v3517_v32 = vsel %vm6595_vm9, %v3512_v19, %v3516_v47  ;;  %v3707_v27 = vld [vmem:[#allocation2 + $0x40] sm:$0xe]  ;;  %v6122_v43 = vld [vmem:[#allocation6 + $0x1aa8] sm:$0xff]  }
 0x24c   : > { %v5119_v63 = vcombine.low %v7044_v42, %v7053_v33  ;;  %v3521_v62 = vrot.slane %v3519_v53, 4  ;;  %v3524_v16 = vrot.slane %v3522_v15, 5  ;;  %v3750_v42 = vrot.slane %v7056_v45, 5  ;;  %v4085_v47 = vld [vmem:[#allocation2 + $0x20] sm:$0xf] }
 0x24d   : > { %5751 = vmatpush3.bf16.msra.mxu0 %v6109_v54  ;;  %5775 = vmatpush3.bf16.msra.mxu1 %v6110_v11  ;;  %v7063_v54 = vld [vmem:[#allocation2 + $0x44] sm:$0x1]  ;;  %v6117_v11 = vld [vmem:[#allocation6 + $0x1a78] sm:$0xff]   ;;  %v3503_v22 = vsel %vm6595_vm9, %v3498_v13, %v3502_v59  ;;  %v5117_v8 = vrot.slane %v3707_v27, 9  ;;  %v5120_v33 = vcombine.low %v3743_v5, %v3747_v60  ;;  %v7087_v59 = vld [vmem:[#allocation2 + $0x14] sm:$0x1] }
 0x24e   : > { %5752 = vmatprep.subr.bf16.mxu0 %v6111_v29  ;;  %5776 = vmatprep.subr.bf16.mxu1 %v6112_v38  ;;  %v3542_v51 = vshll.u32 %v7063_v54, 16  ;;  %v5100_v9 = vcombine.low %v3503_v22, %v3517_v32  ;;  %v3754_v36 = vrot.slane %v7063_v54, 5  ;;  %v3751_v45 = vsel %vm6674_vm12, %v5116_v28, %v3750_v42 }
 0x24f   : > { %v4107_v6 = vshll.u32 %v7087_v59, 16  ;;  %v4115_v54 = vshll.u32 %v4083_v12, 16  ;;  %v4121_v15 = vshll.u32 %v7089_v58, 16  ;;  %v4114_v13 = vrot.slane %v4112_v2, 4 }
 0x250   : > { %v3544_v21 = vrot.slane %v3542_v51, 5  ;;  %v3755_v35 = vsel %vm6674_vm12, %v5117_v8, %v3754_v36  ;;  %v7095_v51 = vld [vmem:[#allocation2 + $0x2c] sm:$0x1]  ;;  %v4129_v55 = vshll.u32 %v4085_v47, 16  ;;  %v4089_v36 = vld [vmem:[#allocation2 + $0x30] sm:$0xf] }
 0x251   : > { %5753 = vmatpush3.bf16.msra.mxu0 %v6111_v29  ;;  %5777 = vmatpush3.bf16.msra.mxu1 %v6112_v38  ;;  %v3538_v29 = vrot.slane %v3536_v26, 5  ;;  %v3525_v38 = vor.u32 %v3524_v16, %v3521_v62  ;;  %v5121_v57 = vcombine.low %v3751_v45, %v3755_v35  ;;  %v6125_v62 = vld [vmem:[#allocation6 + $0x1a58] sm:$0xff]   ;;  %v4117_v17 = vrot.slane %v4115_v54, 5  ;;  %v6131_v45 = vld [vmem:[#allocation6 + $0x1a40] sm:$0xff]  }
 0x252   : > { %5754 = vmatprep.subr.bf16.mxu0 %v6113_v23  ;;  %5778 = vmatprep.subr.bf16.mxu1 %v6114_v44  ;;  %v6126_v26 = vld [vmem:[#allocation6 + $0x1a98] sm:$0xff]   ;;  %v4123_v19 = vrot.slane %v4121_v15, 5  ;;  %v4131_v20 = vrot.slane %v4129_v55, 5  ;;  %v4149_v61 = vshll.u32 %v7095_v51, 16 }
 0x253   : > { %v3539_v1 = vor.u32 %v3538_v29, %v3535_v49  ;;  %v7093_v49 = vld [vmem:[#allocation2 + $0x24] sm:$0x1]  ;;  %v4087_v29 = vld [vmem:[#allocation2 + $0x28] sm:$0xf] }
 0x254   : > { %v4135_v39 = vshll.u32 %v7093_v49, 16  ;;  %v4151_v8 = vrot.slane %v4149_v61, 5  ;;  %v6136_v61 = vld [vmem:[#allocation6 + $0x1af0] sm:$0xff]  }
 0x255   : > { %5755 = vmatpush3.bf16.msra.mxu0 %v6113_v23  ;;  %5779 = vmatpush3.bf16.msra.mxu1 %v6114_v44  ;;  %v3526_v23 = vrot.slane %v3525_v38, 4  ;;  %v3540_v44 = vrot.slane %v3539_v1, 4  ;;  %v4126_v38 = vshrl.u32 %v4085_v47, 16 }
 0x256   : > { %5756 = vmatprep.subr.bf16.mxu0 %v6115_v25  ;;  %5780 = vmatprep.subr.bf16.mxu1 %v6116_v46  ;;  %v4137_v60 = vrot.slane %v4135_v39, 5 }
 0x257   : > { %v3531_v34 = vsel %vm6595_vm9, %v3526_v23, %v3530_v18  ;;  %v3545_v40 = vsel %vm6595_vm9, %v3540_v44, %v3544_v21  ;;  %v4143_v18 = vshll.u32 %v4087_v29, 16  ;;  %v4128_v0 = vrot.slane %v4126_v38, 4  ;;  %v6129_v44 = vld [vmem:[#allocation6 + $0x1a48] sm:$0xff]  }
 0x258   : > { %v5101_v50 = vcombine.low %v3531_v34, %v3545_v40  ;;  %v7105_v34 = vld [vmem:[#allocation2 + $0x3c] sm:$0x1]  ;;  %v4154_v40 = vshrl.u32 %v4089_v36, 16 }
 0x259   : > { %5757 = vmatpush3.bf16.msra.mxu0 %v6115_v25  ;;  %5781 = vmatpush3.bf16.msra.mxu1 %v6116_v46  ;;  %v6133_v25 = vld [vmem:[#allocation2 + $0x10] ss:$8 sps:$4 sm:$0xff]   ;;  %v4145_v23 = vrot.slane %v4143_v18, 5  ;;  %v4132_v27 = vor.u32 %v4131_v20, %v4128_v0 }
 0x25a   : > { %5790 = vmatprep.subr.bf16.mxu0 %v6117_v11  ;;  %5814 = vmatprep.subr.bf16.mxu1 %v6118_v14  ;;  %v4081_v46 = vld [vmem:[#allocation2 + $0x10] sm:$0xf]  ;;  %v4156_v12 = vrot.slane %v4154_v40, 4  ;;  %v4368_v40 = vld [vmem:[#allocation2 + $0x38] sm:$0xe] }
 0x25b   : > { %v4098_v53 = vshrl.u32 %v4081_v46, 16  ;;  %v4133_v42 = vrot.slane %v4132_v27, 4 }
 0x25c   : > { %5759 = vmatmul.mubr.bf16.vlgmr.msra.gmra.mxu0 %v5099_v52  ;;  %5783 = vmatmul.mubr.bf16.vlgmr.msra.gmra.mxu1 %v5119_v63  ;;  %v4101_v63 = vshll.u32 %v4081_v46, 16  ;;  %v4118_v52 = vor.u32 %v4117_v17, %v4114_v13 }
 0x25d   : > { %5791 = vmatpush3.bf16.msra.mxu0 %v6117_v11  ;;  %5815 = vmatpush3.bf16.msra.mxu1 %v6118_v14  ;;  %v4100_v7 = vrot.slane %v4098_v53, 4  ;;  %v4109_v11 = vrot.slane %v4107_v6, 5  ;;  %v4140_v14 = vshrl.u32 %v4087_v29, 16  ;;  %v4138_v35 = vsel %vm6595_vm9, %v4133_v42, %v4137_v60  ;;  %v7113_v6 = vld [vmem:[#allocation2 + $0x44] sm:$0x1] }
 0x25e   : > { %5792 = vmatprep.subr.bf16.mxu0 %v6119_v30  ;;  %5816 = vmatprep.subr.bf16.mxu1 %v6120_v24  ;;  %v4103_v4 = vrot.slane %v4101_v63, 5  ;;  %v4119_v1 = vrot.slane %v4118_v52, 4  ;;  %v4177_v63 = vshll.u32 %v7105_v34, 16  ;;  %v4191_v17 = vshll.u32 %v7113_v6, 16  ;;  %v6134_v52 = vld [vmem:[#allocation2 + $0x20] ss:$8 sps:$4 sm:$0xff]  }
 0x25f   : > { %5762 = vmatprep.mubr.bf16.mxu0 %v5100_v9  ;;  %5786 = vmatprep.mubr.bf16.mxu1 %v5120_v33  ;;  %v4142_v32 = vrot.slane %v4140_v14, 4  ;;  %v4091_v33 = vld [vmem:[#allocation2 + $0x38] sm:$0xf]  ;;  %v4393_v60 = vrot.slane %v7089_v58, 5  ;;  %v4363_v42 = vld [vmem:[#allocation2 + $0x10] sm:$0xe] }
 0x260   : > { %v4104_v16 = vor.u32 %v4103_v4, %v4100_v7  ;;  %v4124_v21 = vsel %vm6595_vm9, %v4119_v1, %v4123_v19  ;;  %v6135_v19 = vld [vmem:[#allocation6 + $0x1af8] sm:$0xff]   ;;  %v4193_v20 = vrot.slane %v4191_v17, 5  ;;  %v4401_v17 = vrot.slane %v7095_v51, 5 }
 0x261   : > { %5793 = vmatpush3.bf16.msra.mxu0 %v6119_v30  ;;  %5817 = vmatpush3.bf16.msra.mxu1 %v6120_v24  ;;  %v6128_v30 = vld [vmem:[#allocation6 + $0x1a90] sm:$0xff]   ;;  %v4146_v28 = vor.u32 %v4145_v23, %v4142_v32  ;;  %v6130_v24 = vld [vmem:[#allocation6 + $0x1a88] sm:$0xff]  }
 0x262   : > { %5794 = vmatprep.subr.bf16.mxu0 %v6121_v37  ;;  %5818 = vmatprep.subr.bf16.mxu1 %v6122_v43  ;;  %v4105_v56 = vrot.slane %v4104_v16, 4 }
 0x263   : > { %v4147_v9 = vrot.slane %v4146_v28, 4 }
 0x264   : > { %5763 = vmatmul.mubr.bf16.gmra.mxu0 %v5101_v50  ;;  %5787 = vmatmul.mubr.bf16.gmra.mxu1 %v5121_v57  ;;  %v4110_v22 = vsel %vm6595_vm9, %v4105_v56, %v4109_v11  ;;  %v4171_v57 = vshll.u32 %v4091_v33, 16  ;;  %v7115_v11 = vld [vmem:[#allocation2 + $0x4c] sm:$0x1] }
 0x265   : > { %5795 = vmatpush3.bf16.msra.mxu0 %v6121_v37  ;;  %5819 = vmatpush3.bf16.msra.mxu1 %v6122_v43  ;;  %v5142_v5 = vcombine.low %v4110_v22, %v4124_v21  ;;  %v7103_v37 = vld [vmem:[#allocation2 + $0x34] sm:$0x1]  ;;  %v4157_v43 = vshll.u32 %v4089_v36, 16  ;;  %v4152_v46 = vsel %vm6595_vm9, %v4147_v9, %v4151_v8  ;;  %v4205_v56 = vshll.u32 %v7115_v11, 16  ;;  %v4364_v8 = vld [vmem:[#allocation2 + $0x18] sm:$0xe] }
 0x266   : > { %5796 = vmatprep.subr.bf16.mxu0 %v6123_v31  ;;  %5820 = vmatprep.subr.bf16.mxu1 %v6124_v3  ;;  %v4163_v50 = vshll.u32 %v7103_v37, 16  ;;  %v4173_v15 = vrot.slane %v4171_v57, 5  ;;  %v5143_v1 = vcombine.low %v4138_v35, %v4152_v46  ;;  %v5154_v9 = vrot.slane %v4363_v42, 9  ;;  %v6140_v46 = vld [vmem:[#allocation6 + $0x1ae0] sm:$0xff]  }
 0x267   : > { %5806 = vmatprep.mubr.bf16.mxu0 %v6133_v25  ;;  %5830 = vmatprep.mubr.bf16.mxu1 %v5142_v5  ;;  %v6132_v25 = vld [vmem:[#allocation6 + $0x1a80] sm:$0xff]   ;;  %v4159_v53 = vrot.slane %v4157_v43, 5  ;;  %v4207_v21 = vrot.slane %v4205_v56, 5  ;;  %v5155_v36 = vrot.slane %v4364_v8, 9  ;;  %v5159_v35 = vrot.slane %v4368_v40, 9 }
 0x268   : > { %v4165_v2 = vrot.slane %v4163_v50, 5  ;;  %v4409_v50 = vrot.slane %v7105_v34, 5 }
 0x269   : > { %5797 = vmatpush3.bf16.msra.mxu0 %v6123_v31  ;;  %5821 = vmatpush3.bf16.msra.mxu1 %v6124_v3  ;;  %v4168_v31 = vshrl.u32 %v4091_v33, 16  ;;  %v4093_v3 = vld [vmem:[#allocation2 + $0x40] sm:$0xf]  ;;  %v4160_v4 = vor.u32 %v4159_v53, %v4156_v12  ;;  %v4367_v33 = vld [vmem:[#allocation2 + $0x30] sm:$0xe]  ;;  %v6141_v53 = vld [vmem:[#allocation6 + $0x1ad8] sm:$0xff]  }
 0x26a   : > { %5798 = vmatprep.subr.bf16.mxu0 %v6125_v62  ;;  %5822 = vmatprep.subr.bf16.mxu1 %v6126_v26  ;;  %v4182_v7 = vshrl.u32 %v4093_v3, 16  ;;  %v4185_v13 = vshll.u32 %v4093_v3, 16  ;;  %v5158_v58 = vrot.slane %v4367_v33, 9  ;;  %v4394_v3 = vsel %vm6674_vm12, %v5155_v36, %v4393_v60 }
 0x26b   : > { %v4170_v54 = vrot.slane %v4168_v31, 4  ;;  %v4161_v38 = vrot.slane %v4160_v4, 4  ;;  %v6138_v31 = vld [vmem:[#allocation2 + $0x40] ss:$8 sps:$4 sm:$0xff]  }
 0x26c   : > { %v4184_v16 = vrot.slane %v4182_v7, 4  ;;  %v4187_v55 = vrot.slane %v4185_v13, 5  ;;  %v4370_v7 = vld [vmem:[#allocation2 + $0x48] sm:$0xe] }
 0x26d   : > { %5799 = vmatpush3.bf16.msra.mxu0 %v6125_v62  ;;  %5823 = vmatpush3.bf16.msra.mxu1 %v6126_v26  ;;  %v4095_v62 = vld [vmem:[#allocation2 + $0x48] sm:$0xf]  ;;  %v4179_v26 = vrot.slane %v4177_v63, 5  ;;  %v4174_v47 = vor.u32 %v4173_v15, %v4170_v54  ;;  %v4166_v22 = vsel %vm6595_vm9, %v4161_v38, %v4165_v2  ;;  %v6142_v63 = vld [vmem:[#allocation6 + $0x1ad0] sm:$0xff]   ;;  %v6143_v2 = vld [vmem:[#allocation6 + $0x1ac8] sm:$0xff]  }
 0x26e   : > { %5800 = vmatprep.subr.bf16.mxu0 %v6127_v10  ;;  %5824 = vmatprep.subr.bf16.mxu1 %v6128_v30  ;;  %v4196_v29 = vshrl.u32 %v4095_v62, 16  ;;  %v4188_v0 = vor.u32 %v4187_v55, %v4184_v16  ;;  %v4365_v54 = vld [vmem:[#allocation2 + $0x20] sm:$0xe]  ;;  %v4366_v15 = vld [vmem:[#allocation2 + $0x28] sm:$0xe]  ;;  %v4413_v16 = vrot.slane %v7113_v6, 5 }
 0x26f   : > { %v4175_v39 = vrot.slane %v4174_v47, 4  ;;  %v5156_v4 = vrot.slane %v4365_v54, 9  ;;  %v5157_v13 = vrot.slane %v4366_v15, 9 }
 0x270   : > { %v4198_v14 = vrot.slane %v4196_v29, 4  ;;  %v4189_v27 = vrot.slane %v4188_v0, 4  ;;  %v5161_v29 = vrot.slane %v4370_v7, 9 }
 0x271   : > { %5801 = vmatpush3.bf16.msra.mxu0 %v6127_v10  ;;  %5825 = vmatpush3.bf16.msra.mxu1 %v6128_v30  ;;  %v4199_v10 = vshll.u32 %v4095_v62, 16  ;;  %v6137_v30 = vld [vmem:[#allocation2 + $0x30] ss:$8 sps:$4 sm:$0xff]   ;;  %v4180_v32 = vsel %vm6595_vm9, %v4175_v39, %v4179_v26  ;;  %v4369_v62 = vld [vmem:[#allocation2 + $0x40] sm:$0xe]  ;;  %v4397_v26 = vrot.slane %v7093_v49, 5  ;;  %v4402_v49 = vsel %vm6674_vm12, %v5157_v13, %v4401_v17 }
 0x272   : > { %5802 = vmatprep.subr.bf16.mxu0 %v6129_v44  ;;  %5826 = vmatprep.subr.bf16.mxu1 %v6130_v24  ;;  %v5144_v28 = vcombine.low %v4166_v22, %v4180_v32  ;;  %v5160_v47 = vrot.slane %v4369_v62, 9 }
 0x273   : > { %v4201_v18 = vrot.slane %v4199_v10, 5  ;;  %v4417_v10 = vrot.slane %v7115_v11, 5 }
 0x274   : > { %v4414_v51 = vsel %vm6674_vm12, %v5160_v47, %v4413_v16 }
 0x275   : > { %5803 = vmatpush3.bf16.msra.mxu0 %v6129_v44  ;;  %5827 = vmatpush3.bf16.msra.mxu1 %v6130_v24  ;;  %v4202_v23 = vor.u32 %v4201_v18, %v4198_v14  ;;  %v4389_v44 = vrot.slane %v7087_v59, 5  ;;  %v4194_v24 = vsel %vm6595_vm9, %v4189_v27, %v4193_v20  ;;  %v6139_v59 = vld [vmem:[#allocation6 + $0x1ae8] sm:$0xff]   ;;  %v4418_v6 = vsel %vm6674_vm12, %v5161_v29, %v4417_v10 }
 0x276   : > { %5804 = vmatprep.subr.bf16.mxu0 %v6131_v45  ;;  %5828 = vmatprep.subr.bf16.mxu1 %v6132_v25  ;;  %v5165_v38 = vcombine.low %v4414_v51, %v4418_v6 }
 0x277   : > { %v4203_v5 = vrot.slane %v4202_v23, 4  ;;  %v4390_v57 = vsel %vm6674_vm12, %v5154_v9, %v4389_v44 }
 0x278   : > { %v5162_v34 = vcombine.low %v4390_v57, %v4394_v3 }
 0x279   : > { %5805 = vmatpush3.bf16.msra.mxu0 %v6131_v45  ;;  %5829 = vmatpush3.bf16.msra.mxu1 %v6132_v25  ;;  %v4208_v43 = vsel %vm6595_vm9, %v4203_v5, %v4207_v21  ;;  %v4405_v45 = vrot.slane %v7103_v37, 5  ;;  %v4410_v37 = vsel %vm6674_vm12, %v5159_v35, %v4409_v50 }
 0x27a   : > { %5838 = vmatprep.subr.bf16.mxu0 %v6135_v19  ;;  %5878 = vmatprep.subr.bf16.mxu1 %v6135_v19  ;;  %v5145_v25 = vcombine.low %v4194_v24, %v4208_v43 }
 0x27b   : > { %v4406_v41 = vsel %vm6674_vm12, %v5158_v58, %v4405_v45 }
 0x27c   : > { %5807 = vmatmul.mubr.bf16.vlgmr.msra.gmra.mxu0 %v6134_v52  ;;  %5831 = vmatmul.mubr.bf16.vlgmr.msra.gmra.mxu1 %v5143_v1  ;;  %v5164_v12 = vcombine.low %v4406_v41, %v4410_v37  ;;  %v6144_v52 = vld [vmem:[#allocation6 + $0x1ac0] sm:$0xff]  }
 0x27d   : > { %5839 = vmatpush3.bf16.msra.mxu0 %v6135_v19  ;;  %5886 = vmatpush3.bf16.msra.mxu1 %v6135_v19  ;;  %v4398_v19 = vsel %vm6674_vm12, %v5156_v4, %v4397_v26 }
 0x27e   : > { %5840 = vmatprep.subr.bf16.mxu0 %v6136_v61  ;;  %5879 = vmatprep.subr.bf16.mxu1 %v6136_v61  ;;  %v5163_v11 = vcombine.low %v4398_v19, %v4402_v49 }
 0x27f   : > { %5810 = vmatprep.mubr.bf16.mxu0 %v6137_v30  ;;  %5834 = vmatprep.mubr.bf16.mxu1 %v5144_v28 }
 0x281   : > { %5841 = vmatpush3.bf16.msra.mxu0 %v6136_v61  ;;  %5887 = vmatpush3.bf16.msra.mxu1 %v6136_v61 }
 0x282   : > { %5842 = vmatprep.subr.bf16.mxu0 %v6139_v59  ;;  %5880 = vmatprep.subr.bf16.mxu1 %v6139_v59 }
 0x284   : > { %5811 = vmatmul.mubr.bf16.gmra.mxu0 %v6138_v31  ;;  %5835 = vmatmul.mubr.bf16.gmra.mxu1 %v5145_v25 }
 0x285   : > { %5843 = vmatpush3.bf16.msra.mxu0 %v6139_v59  ;;  %5888 = vmatpush3.bf16.msra.mxu1 %v6139_v59 }
 0x286   : > { %5844 = vmatprep.subr.bf16.mxu0 %v6140_v46  ;;  %5881 = vmatprep.subr.bf16.mxu1 %v6140_v46 }
 0x287   : > { %5854 = vmatprep.mubr.bf16.mxu0 %v5162_v34  ;;  %5858 = vmatprep.mubr.bf16.mxu1 %v5164_v12 }
 0x289   : > { %5845 = vmatpush3.bf16.msra.mxu0 %v6140_v46  ;;  %5889 = vmatpush3.bf16.msra.mxu1 %v6140_v46 }
 0x28a   : > { %5846 = vmatprep.subr.bf16.mxu0 %v6141_v53  ;;  %5882 = vmatprep.subr.bf16.mxu1 %v6141_v53 }
 0x28d   : > { %5847 = vmatpush3.bf16.msra.mxu0 %v6141_v53  ;;  %5890 = vmatpush3.bf16.msra.mxu1 %v6141_v53 }
 0x28e   : > { %5848 = vmatprep.subr.bf16.mxu0 %v6142_v63  ;;  %5883 = vmatprep.subr.bf16.mxu1 %v6142_v63 }
 0x291   : > { %5849 = vmatpush3.bf16.msra.mxu0 %v6142_v63  ;;  %5891 = vmatpush3.bf16.msra.mxu1 %v6142_v63 }
 0x292   : > { %5850 = vmatprep.subr.bf16.mxu0 %v6143_v2  ;;  %5884 = vmatprep.subr.bf16.mxu1 %v6143_v2 }
 0x295   : > { %5851 = vmatpush3.bf16.msra.mxu0 %v6143_v2  ;;  %5892 = vmatpush3.bf16.msra.mxu1 %v6143_v2 }
 0x296   : > { %5852 = vmatprep.subr.bf16.mxu0 %v6144_v52  ;;  %5885 = vmatprep.subr.bf16.mxu1 %v6144_v52 }
 0x299   : > { %5853 = vmatpush3.bf16.msra.mxu0 %v6144_v52  ;;  %5893 = vmatpush3.bf16.msra.mxu1 %v6144_v52 }
 0x29c   : > { %5855 = vmatmul.mubr.bf16.vlgmr.msra.gmra.mxu0 %v5163_v11  ;;  %5859 = vmatmul.mubr.bf16.vlgmr.msra.gmra.mxu1 %v5165_v38 }
 0x2dc   : > { %v5664_v55 = vpop.f32.mrf.mxu0  ;;  %v5688_v39 = vpop.f32.mrf.mxu1 }
 0x2dd   : > { %v3013_v29 = vadd.f32 %v5688_v39, %v5664_v55 }
 0x2de   : > { %v2867_v56 = vpop.f32.mrf.mxu0  ;;  %v3004_v18 = vpop.f32.mrf.mxu1 }
 0x2df   : > { %v3005_v52 = vadd.f32 %v3004_v18, %v2867_v56 }
 0x2e0   : > { %v5665_v14 = vpop.f32.mrf.mxu0  ;;  %v5689_v20 = vpop.f32.mrf.mxu1 }
 0x2e1   : > { %v3016_v19 = vadd.f32 %v5689_v20, %v5665_v14 }
 0x2e2   : > { %v2870_v1 = vpop.f32.mrf.mxu0  ;;  %v3007_v48 = vpop.f32.mrf.mxu1 }
 0x2e4   : > { %v5668_v0 = vpop.f32.mrf.mxu0  ;;  %v5692_v30 = vpop.f32.mrf.mxu1 }
 0x2e5   : > { %v3029_v10 = vadd.f32 %v5692_v30, %v5668_v0 }
 0x2e6   : > { %v2883_v61 = vpop.f32.mrf.mxu0  ;;  %v3020_v32 = vpop.f32.mrf.mxu1 }
 0x2e7   : > { %v3021_v6 = vadd.f32 %v3020_v32, %v2883_v61 }
 0x2e8   : > { %v5669_v22 = vpop.f32.mrf.mxu0  ;;  %v5693_v27 = vpop.f32.mrf.mxu1 }
 0x2e9   : > { %v3032_v11 = vadd.f32 %v5693_v27, %v5669_v22 }
 0x2ea   : > { %v2886_v23 = vpop.f32.mrf.mxu0  ;;  %v3023_v5 = vpop.f32.mrf.mxu1 }
 0x2eb   : > { %v3024_v0 = vadd.f32 %v3023_v5, %v2886_v23 }
 0x2fc   : > { %v5712_v21 = vpop.f32.mrf.mxu0  ;;  %v5736_v60 = vpop.f32.mrf.mxu1 }
 0x2fd   : > { %v3242_v49 = vadd.f32 %v5712_v21, %v3013_v29 }
 0x2fe   : > { %v3209_v44 = vpop.f32.mrf.mxu0  ;;  %v3379_v42 = vpop.f32.mrf.mxu1 }
 0x2ff   : > { %v3412_v56 = vadd.f32 %v5736_v60, %v3242_v49 }
 0x300   : > { %v5713_v28 = vpop.f32.mrf.mxu0  ;;  %v5737_v24 = vpop.f32.mrf.mxu1 }
 0x301   : > { %v3243_v39 = vadd.f32 %v5713_v28, %v3016_v19 }
 0x302   : > { %v3212_v8 = vpop.f32.mrf.mxu0  ;;  %v3382_v36 = vpop.f32.mrf.mxu1 }
 0x303   : > { %v3413_v32 = vadd.f32 %v5737_v24, %v3243_v39 }
 0x304   : > { %v5716_v9 = vpop.f32.mrf.mxu0  ;;  %v5740_v40 = vpop.f32.mrf.mxu1 }
 0x305   : > { %v3246_v38 = vadd.f32 %v5716_v9, %v3029_v10 }
 0x306   : > { %v3225_v33 = vpop.f32.mrf.mxu0  ;;  %v3395_v43 = vpop.f32.mrf.mxu1 }
 0x307   : > { %v3244_v30 = vadd.f32 %v3225_v33, %v3021_v6  ;;  %v3416_v20 = vadd.f32 %v5740_v40, %v3246_v38 }
 0x308   : > { %v5717_v59 = vpop.f32.mrf.mxu0  ;;  %v5741_v45 = vpop.f32.mrf.mxu1 }
 0x309   : > { %v3247_v18 = vadd.f32 %v5717_v59, %v3032_v11  ;;  %v3414_v27 = vadd.f32 %v3395_v43, %v3244_v30 }
 0x30a   : > { %v3228_v58 = vpop.f32.mrf.mxu0  ;;  %v3398_v50 = vpop.f32.mrf.mxu1 }
 0x30b   : > { %v3245_v21 = vadd.f32 %v3228_v58, %v3024_v0  ;;  %v3417_v9 = vadd.f32 %v5741_v45, %v3247_v18 }
 0x30d   : > { %v3415_v28 = vadd.f32 %v3398_v50, %v3245_v21 }
 0x31c   : > { %v5760_v35 = vpop.f32.mrf.mxu0  ;;  %v5784_v57 = vpop.f32.mrf.mxu1 }
 0x31d   : > { %v3694_v61 = vadd.f32 %v5760_v35, %v3412_v56 }
 0x31e   : > { %v3661_v31 = vpop.f32.mrf.mxu0  ;;  %v3871_v25 = vpop.f32.mrf.mxu1 }
 0x31f   : > { %v3904_v33 = vadd.f32 %v5784_v57, %v3694_v61 }
 0x320   : > { %v5761_v3 = vpop.f32.mrf.mxu0  ;;  %v5785_v37 = vpop.f32.mrf.mxu1 }
 0x322   : > { %v3664_v41 = vpop.f32.mrf.mxu0  ;;  %v7151_v34 = vpop.f32.mrf.mxu1 }
 0x323   : > { %7269 = vst [vmem:[#allocation13_spill] sm:$0xff] %v7151_v34 }
 0x324   : > { %v5764_v46 = vpop.f32.mrf.mxu0  ;;  %v5788_v12 = vpop.f32.mrf.mxu1 }
 0x325   : > { %v3698_v10 = vadd.f32 %v5764_v46, %v3416_v20 }
 0x326   : > { %v3677_v53 = vpop.f32.mrf.mxu0  ;;  %v3887_v63 = vpop.f32.mrf.mxu1 }
 0x327   : > { %v3908_v40 = vadd.f32 %v5788_v12, %v3698_v10 }
 0x328   : > { %v5765_v2 = vpop.f32.mrf.mxu0  ;;  %v5789_v54 = vpop.f32.mrf.mxu1 }
 0x329   : > { %v3699_v23 = vadd.f32 %v5765_v2, %v3417_v9 }
 0x32a   : > { %v3680_v15 = vpop.f32.mrf.mxu0  ;;  %v3890_v7 = vpop.f32.mrf.mxu1  ;;  %v7273_v46 = vld [vmem:[#allocation13_spill] sm:$0xff] }
 0x32b   : > { %v3697_v59 = vadd.f32 %v3680_v15, %v3415_v28 }
 0x33c   : > { %v5808_v62 = vpop.f32.mrf.mxu0  ;;  %v5832_v4 = vpop.f32.mrf.mxu1 }
 0x33d   : > { %v4075_v24 = vadd.f32 %v5808_v62, %v3904_v33 }
 0x33e   : > { %v4042_v26 = vpop.f32.mrf.mxu0  ;;  %v7153_v13 = vpop.f32.mrf.mxu1 }
 0x33f   : > { %7270 = vst [vmem:[#allocation14_spill] sm:$0xff] %v7153_v13  ;;  %v3008_v13 = vadd.f32 %v3007_v48, %v2870_v1 }
 0x340   : > { %v5809_v17 = vpop.f32.mrf.mxu0  ;;  %v7155_v47 = vpop.f32.mrf.mxu1 }
 0x341   : > { %7271 = vst [vmem:[#allocation15_spill] sm:$0xff] %v7155_v47  ;;  %v3240_v47 = vadd.f32 %v3209_v44, %v3005_v52  ;;  %v3241_v14 = vadd.f32 %v3212_v8, %v3008_v13  ;;  %v3695_v44 = vadd.f32 %v5761_v3, %v3413_v32  ;;  %v3696_v52 = vadd.f32 %v3677_v53, %v3414_v27 }
 0x342   : > { %v4045_v16 = vpop.f32.mrf.mxu0  ;;  %v7157_v51 = vpop.f32.mrf.mxu1  ;;  %v3909_v13 = vadd.f32 %v5789_v54, %v3699_v23  ;;  %v3907_v53 = vadd.f32 %v3890_v7, %v3697_v59 }
 0x343   : > { %7272 = vst [vmem:[#allocation16_spill] sm:$0xff] %v7157_v51  ;;  %v3410_v51 = vadd.f32 %v3379_v42, %v3240_v47  ;;  %v3411_v1 = vadd.f32 %v3382_v36, %v3241_v14  ;;  %v3905_v42 = vadd.f32 %v5785_v37, %v3695_v44  ;;  %v3906_v35 = vadd.f32 %v3887_v63, %v3696_v52 }
 0x344   : > { %v5812_v34 = vpop.f32.mrf.mxu0  ;;  %v5836_v55 = vpop.f32.mrf.mxu1 }
 0x345   : > { %v3692_v48 = vadd.f32 %v3661_v31, %v3410_v51  ;;  %v3693_v60 = vadd.f32 %v3664_v41, %v3411_v1  ;;  %v4079_v43 = vadd.f32 %v5812_v34, %v3908_v40  ;;  %v4076_v3 = vadd.f32 %v5809_v17, %v3905_v42  ;;  %v5174_v17 = vld [vmem:[#allocation8 + $0xb] ss:$0 sm:$0xff] }
 0x346   : > { %v4058_v29 = vpop.f32.mrf.mxu0  ;;  %v4340_v22 = vpop.f32.mrf.mxu1  ;;  %v4357_v41 = vadd.f32 %v5832_v4, %v4075_v24  ;;  %v7274_v62 = vld [vmem:[#allocation14_spill] sm:$0xff] }
 0x347   : > { %v3902_v58 = vadd.f32 %v3871_v25, %v3692_v48  ;;  %v3903_v36 = vadd.f32 %v7273_v46, %v3693_v60  ;;  %v4077_v2 = vadd.f32 %v4058_v29, %v3906_v35  ;;  %v4361_v15 = vadd.f32 %v5836_v55, %v4079_v43 }
 0x348   : > { %v5813_v5 = vpop.f32.mrf.mxu0  ;;  %v5837_v8 = vpop.f32.mrf.mxu1  ;;  %v7275_v54 = vld [vmem:[#allocation15_spill] sm:$0xff] }
 0x349   : > { %v4073_v31 = vadd.f32 %v4042_v26, %v3902_v58  ;;  %v4080_v47 = vadd.f32 %v5813_v5, %v3909_v13  ;;  %v4074_v19 = vadd.f32 %v4045_v16, %v3903_v36  ;;  %v4358_v34 = vadd.f32 %v7275_v54, %v4076_v3 }
 0x34a   : > { %v4061_v45 = vpop.f32.mrf.mxu0  ;;  %v4343_v50 = vpop.f32.mrf.mxu1  ;;  %v4359_v6 = vadd.f32 %v4340_v22, %v4077_v2  ;;  %v7276_v38 = vld [vmem:[#allocation16_spill] sm:$0xff] }
 0x34b   : > { %v4078_v25 = vadd.f32 %v4061_v45, %v3907_v53  ;;  %v4355_v63 = vadd.f32 %v7274_v62, %v4073_v31  ;;  %v4362_v26 = vadd.f32 %v5837_v8, %v4080_v47  ;;  %v4356_v39 = vadd.f32 %v7276_v38, %v4074_v19 }
 0x34d   : > { %v4360_v0 = vadd.f32 %v4343_v50, %v4078_v25 }
 0x35c   : > { %v5856_v57 = vpop.f32.mrf.mxu0  ;;  %v5860_v12 = vpop.f32.mrf.mxu1 }
 0x35d   : > { %v4567_v49 = vadd.f32 %v5856_v57, %v4357_v41  ;;  %v4571_v11 = vadd.f32 %v5860_v12, %v4361_v15 }
 0x35e   : > { %v4534_v37 = vpop.f32.mrf.mxu0  ;;  %v4550_v51 = vpop.f32.mrf.mxu1 }
 0x35f   : > { %v4565_v4 = vadd.f32 %v4534_v37, %v4355_v63  ;;  %v4569_v30 = vadd.f32 %v4550_v51, %v4359_v6  ;;  %v4583_v14 = vadd.f32 %v5174_v17, %v4567_v49  ;;  %v4587_v32 = vadd.f32 %v5174_v17, %v4571_v11 }
 0x360   : > { %v5857_v7 = vpop.f32.mrf.mxu0  ;;  %v5861_v55 = vpop.f32.mrf.mxu1 }
 0x361   : > { %v4568_v16 = vadd.f32 %v5857_v7, %v4358_v34  ;;  %v4572_v18 = vadd.f32 %v5861_v55, %v4362_v26  ;;  %v4581_v27 = vadd.f32 %v5174_v17, %v4565_v4  ;;  %v4585_v1 = vadd.f32 %v5174_v17, %v4569_v30 }
 0x362   : > { %v4537_v56 = vpop.f32.mrf.mxu0  ;;  %v4553_v29 = vpop.f32.mrf.mxu1 }
 0x363   : > { %v4584_v20 = vadd.f32 %v5174_v17, %v4568_v16  ;;  %v4566_v21 = vadd.f32 %v4537_v56, %v4356_v39  ;;  %v4588_v61 = vadd.f32 %v5174_v17, %v4572_v18  ;;  %v4570_v22 = vadd.f32 %v4553_v29, %v4360_v0 }
 0x365   : > { %v5199_v9 = vpack.c.bf16 %v4584_v20, %v4583_v14  ;;  %v4582_v10 = vadd.f32 %v5174_v17, %v4566_v21  ;;  %v5209_v48 = vpack.c.bf16 %v4588_v61, %v4587_v32  ;;  %v4586_v44 = vadd.f32 %v5174_v17, %v4570_v22 }
 0x367   : > { %5211 = vst [vmem:[%s6581_s18 + $0x8] sm:$0xff] %v5199_v9   ;;  %v5194_v28 = vpack.c.bf16 %v4582_v10, %v4581_v27  ;;  %5213 = vst [vmem:[%s6581_s18 + $0x18] sm:$0xff] %v5209_v48   ;;  %v5204_v52 = vpack.c.bf16 %v4586_v44, %v4585_v1 }
 0x369   : > { %5195 = vst [vmem:[%s6581_s18] sm:$0xff] %v5194_v28   ;;  %5212 = vst [vmem:[%s6581_s18 + $0x10] sm:$0xff] %v5204_v52  }
 0x36a   : > { %6238 = shalt.err (!%p6235_p11)
}
 0x36b   : > { %s6239_s8 = scalar_lea.hbm %s7169_s24, 512  ;;  %s6243_s18 = scalar_lea.hbm %s7220_s3, 1024 }
 0x36c   : > { %p6240_p9 = scmp.ne.s32.totalorder %s7169_s24, %s6239_s8  ;;  %p6244_p6 = scmp.lt.s32.totalorder %s7169_s24, %s7220_s3 }
 0x36d   : > { %p6245_p8 = scmp.lt.s32.totalorder %s6243_s18, %s6239_s8 }
 0x36e   : > { %p6241_p1 = pnand %p6240_p9, %p7277_p7 }
 0x36f   : > { %p6246_p10 = por %p6245_p8, %p6244_p6 }
 0x370   : > { %p6242_p4 = pneg %p6241_p1 }
 0x372   : > { %p6247_p2 = pnand %p6246_p10, %p6242_p4 }
 0x374   : > { %6250 = shalt.err (!%p6247_p2)
}
 0x375   : > { %s6312_s28 = smov 64   ;;  %s6313_s29 = smov 4  }
 0x376   : > { %5904 = dma.vmem_to_hbm [thread:$0]  (%p7277_p7), %s7171_s6, 512, %s7169_s24, %s4606_s16, %s6312_s28, %s6312_s28, %s6313_s29  }
 0x377 PF: > { %s4634_s4 = sand.u32 1, %s6285_s12   ;;  %p7278_p12 = scmp.ne.s32.totalorder %s7234_s19, 0 }
 0x378   : > { %p7279_p13 = scmp.ge.s32.totalorder %s6297_s15, 2  ;;  %s4635_s11 = scalar_lea.sflag [#allocation5], %s4634_s4 }
 0x37a   : > { %p5918_p0 = pnand %p7279_p13, %p7278_p12 }
 0x37c   : > { %p5919_p5 = pneg %p5918_p0 }
 0x37e   : > { %6280 = dma.done.wait (%p5919_p5), %s4635_s11, 512  }
 0x37f   : > { %6282 = vsyncadd (%p5919_p5), %s4635_s11, 4294966784  ;;  %p17_p3 = scmp.ge.s32.totalorder %s6409_s9, 4   ;;  %s7280_s12 = smov %s6289_s13 }
 0x380   : > { %s7281_s13 = smov %s6293_s14  ;;  %s7282_s14 = smov %s6418_s17 }
 0x381   : > { %s7283_s15 = smov %s6409_s9  ;;  %19 = sbr.rel (!%p17_p3) target bundleno = 6 (0x6), region = 127 }
 0x386   :  { %4640 = vsyncpa [#allocation4], 1 }
 0x387   :  { %4642 = vsyncpa [#allocation4 + $0x1], 1 }
 0x388   :  { %4643 = vsyncpa [#allocation7], 1 }
 0x389   :  { %4644 = vsyncpa [#allocation5], 1 }
 0x38a   :  { %4646 = vsyncpa [#allocation5 + $0x1], 1 }

</bundles_post_ra>
